<compile_context>
chip_gen: v5e
topology: v5e:2x2
jax: 0.10.0
libtpu: 0.0.40
codegen_flags: <defaults>
</compile_context>

<pallas_src>
import functools

import jax
import jax.numpy as jnp
from jax import lax
from jax.experimental import pallas as pl
from jax.experimental.pallas import tpu as pltpu


# ---------------------------------------------------------------------------
# Device heuristics (Python/trace time only).
# ---------------------------------------------------------------------------

def _tpu_generation():
    """Best-effort TPU generation (5, 6, 7, ...) or None if unknown."""
    try:
        kind = jax.devices()[0].device_kind.lower()
    except Exception:  # pragma: no cover - defensive
        return None
    for gen in (7, 6, 5, 4):
        if f"v{gen}" in kind or kind.startswith(f"tpu{gen}") or f" {gen}x" in kind:
            return gen
    return None


def _pick_exp_dtype():
    gen = _tpu_generation()
    if gen is not None and gen >= 6:
        return jnp.bfloat16   # bf16 EUP on v6e/v7x
    return jnp.float32        # v5e / unknown: no bf16 EUP


def _pick_batch_block(B, requested=None):
    """Largest divisor of B giving the generation-appropriate number of steps."""
    if requested is not None:
        bb = max(1, min(requested, B))
    else:
        gen = _tpu_generation()
        if gen is not None and gen >= 7:
            target_steps = 4   # 2 TensorCores -> >=2 pipelined steps per core
        else:
            target_steps = 2   # single TC: fewer, bigger steps, keep pipelining
        bb = max(1, B // target_steps)
    while B % bb:
        bb -= 1
    return bb


def _vmem_estimate_bytes(bb, T, C, H, x_itemsize, exp_dtype):
    """Rough VMEM working-set estimate (inputs/outputs are double-buffered)."""
    exp_size = jnp.dtype(exp_dtype).itemsize
    blocks = (2 * bb * T * C * x_itemsize        # x block, double-buffered
              + 2 * C * 3 * H * 2                # bf16 fused weight, double-buffered
              + 2 * bb * T * H * x_itemsize)     # output block, double-buffered
    interm = (bb * T * C * 2                     # x bf16 copy (if cast)
              + bb * T * 3 * H * 4               # qvk f32
              + 3 * bb * T * H * 2               # q, v, k bf16
              + 2 * bb * T * T * 4               # wei f32 + mask/where temp
              + bb * T * T * exp_size            # e
              + bb * T * H * 4 + bb * T * 4)     # acc f32, sums
    est = int(1.5 * (blocks + interm)) + (2 << 20)
    return min(max(est, 32 << 20), 64 << 20)


# ---------------------------------------------------------------------------
# Init-time weight fusion (analogue of storing module parameters pre-packed).
# ---------------------------------------------------------------------------

def fuse_head_weights(wk, wq, wv):
    """One-time fusion of the three (C, H) projections into a bf16 (C, 3H) slab.

    Column order is [q * (1/sqrt(H)) | v | k]: q at lane offset 0 and k at lane
    offset 2H (=128 for H=64) so both q@k^T operands slice at 128-lane-aligned
    offsets. The softmax scale is folded into the q columns here (init time).
    """
    H = wq.shape[1]
    scale = 1.0 / (float(H) ** 0.5)
    fused = jnp.concatenate(
        [wq.astype(jnp.float32) * scale,
         wv.astype(jnp.float32),
         wk.astype(jnp.float32)],
        axis=1)
    return fused.astype(jnp.bfloat16)


# ---------------------------------------------------------------------------
# Kernel.
# ---------------------------------------------------------------------------

def _head_kernel(x_ref, wqvk_ref, o_ref, *, exp_dtype):
    # x_ref block:    (Bb, T, C)
    # wqvk_ref block: (C, 3H) bf16   -- [ Wq*scale | Wv | Wk ] fused at init
    # o_ref block:    (Bb, T, H)
    Bb, T, C = x_ref.shape
    H = o_ref.shape[-1]

    x = x_ref[...]
    if x.dtype != jnp.bfloat16:
        x = x.astype(jnp.bfloat16)            # MXU operand (f32 accumulation below)
    w = wqvk_ref[...]                          # already bf16

    # Fused projection: one MXU push for q|v|k.
    qvk = jnp.dot(
        x.reshape(Bb * T, C), w, preferred_element_type=jnp.float32
    ).reshape(Bb, T, 3 * H)                    # (Bb, T, 3H) f32

    # Column order [q|v|k]: q and k slices are 128-lane aligned (H=64).
    q = qvk[:, :, 0:H].astype(jnp.bfloat16)            # scale already folded in
    v = qvk[:, :, H:2 * H].astype(jnp.bfloat16)
    k = qvk[:, :, 2 * H:3 * H].astype(jnp.bfloat16)

    # Attention scores: contract on the head dim directly (no explicit k.T).
    wei = jnp.einsum("bqd,bkd->bqk", q, k,
                     preferred_element_type=jnp.float32)       # (Bb, T, T) f32

    # Causal mask (tril), built once per grid step and broadcast over Bb.
    row = lax.broadcasted_iota(jnp.int32, (T, T), 0)
    col = lax.broadcasted_iota(jnp.int32, (T, T), 1)
    causal = (col <= row)[None, :, :]
    wei = jnp.where(causal, wei, -jnp.inf)

    # Numerically stable softmax; exp runs in bf16 on v6e/v7x (EUP-bound at
    # H=64), f32 elsewhere. 1/sum is folded into the final (Bb,T,H) scaling.
    m = jnp.max(wei, axis=-1, keepdims=True)                   # finite (diag unmasked)
    e = jnp.exp((wei - m).astype(exp_dtype))                   # masked entries -> 0
    s = jnp.sum(e, axis=-1, keepdims=True, dtype=jnp.float32)  # (Bb, T, 1), > 0

    # dropout: identity (eval mode)

    acc = jnp.einsum("bqk,bkd->bqd", e.astype(jnp.bfloat16), v,
                     preferred_element_type=jnp.float32)       # (Bb, T, H) f32
    out = acc * pl.reciprocal(s, approx=True)

    o_ref[...] = out.astype(o_ref.dtype)


# ---------------------------------------------------------------------------
# Wrapper.
# ---------------------------------------------------------------------------

def head_forward(x, wqvk_fused, *, batch_block=None, exp_dtype=None):
    """x: (B, T, C); wqvk_fused: (C, 3H) bf16 from fuse_head_weights.

    Returns (B, T, H) in x.dtype. Eval-mode forward of the PyTorch `Head`.
    """
    B, T, C = x.shape
    three_h = wqvk_fused.shape[1]
    H = three_h // 3

    bb = _pick_batch_block(B, batch_block)
    if exp_dtype is None:
        exp_dtype = _pick_exp_dtype()
    grid = (B // bb,)

    x_itemsize = jnp.dtype(x.dtype).itemsize
    vmem_bytes = _vmem_estimate_bytes(bb, T, C, H, x_itemsize, exp_dtype)

    cost = pl.CostEstimate(
        flops=2 * B * T * C * three_h + 4 * B * T * T * H,
        transcendentals=B * T * T,
        bytes_accessed=(x.size * x_itemsize
                        + wqvk_fused.size * jnp.dtype(wqvk_fused.dtype).itemsize
                        + B * T * H * x_itemsize),
    )

    kernel = functools.partial(_head_kernel, exp_dtype=exp_dtype)

    return pl.pallas_call(
        kernel,
        out_shape=jax.ShapeDtypeStruct((B, T, H), x.dtype),
        grid_spec=pltpu.PrefetchScalarGridSpec(
            num_scalar_prefetch=0,
            grid=grid,
            in_specs=[
                pl.BlockSpec((bb, T, C), lambda b: (b, 0, 0)),
                pl.BlockSpec((C, three_h), lambda b: (0, 0)),
            ],
            out_specs=pl.BlockSpec((bb, T, H), lambda b: (b, 0, 0)),
        ),
        compiler_params=pltpu.CompilerParams(
            dimension_semantics=("parallel",),
            vmem_limit_bytes=vmem_bytes,
        ),
        cost_estimate=cost,
    )(x, wqvk_fused)


def head_reference(x, wk, wq, wv):
    """Pure-JAX f32 reference matching the PyTorch forward (eval mode)."""
    k = x @ wk
    q = x @ wq
    v = x @ wv
    scale = 1.0 / jnp.sqrt(jnp.float32(k.shape[-1]))
    wei = jnp.einsum("btd,bsd->bts", q, k) * scale
    T = x.shape[1]
    tril = jnp.tril(jnp.ones((T, T), dtype=bool))
    wei = jnp.where(tril, wei, -jnp.inf)
    wei = jax.nn.softmax(wei, axis=-1)
    return wei @ v


if __name__ == "__main__":
    # Shapes consistent with the module: n_embd=512, T <= block_size(256), head_size=64.
    B, T, C, H = 4, 128, 512, 64

    key = jax.random.PRNGKey(0)
    kx, kk, kq, kv = jax.random.split(key, 4)

    x = jax.random.normal(kx, (B, T, C), dtype=jnp.float32)
    # Deterministic init mimicking nn.Linear(n_embd, head_size, bias=False),
    # stored transposed as (C, H).
    bound = 1.0 / jnp.sqrt(jnp.float32(C))
    wk = jax.random.uniform(kk, (C, H), jnp.float32, -bound, bound)
    wq = jax.random.uniform(kq, (C, H), jnp.float32, -bound, bound)
    wv = jax.random.uniform(kv, (C, H), jnp.float32, -bound, bound)

    # Init-time weight fusion (analogous to storing module parameters).
    wqvk = fuse_head_weights(wk, wq, wv)

    out = head_forward(x, wqvk)
    jax.block_until_ready(out)

    ref = head_reference(x, wk, wq, wv)
    assert out.shape == (B, T, H)
    # bf16 MXU operands / bf16 attention probabilities (f32 accumulation) ->
    # compare against the f32 reference with bf16-appropriate tolerance.
    assert jnp.allclose(out, ref, atol=5e-2, rtol=5e-2), "mismatch vs reference"

    print("KERNEL_OK")
</pallas_src>

<mosaic_0001>
module attributes {stable_mosaic.version = 11 : i64} {
  func.func @_head_kernel(%arg0: i32, %arg1: memref<2x128x512xf32, #tpu.memory_space<vmem>>, %arg2: memref<512x192xbf16, #tpu.memory_space<vmem>>, %arg3: memref<2x128x64xf32, #tpu.memory_space<vmem>>) attributes {dimension_semantics = [#tpu.dimension_semantics<parallel>], iteration_bounds = array<i64: 2>, scalar_prefetch = 0 : i64, scratch_operands = 0 : i64, tpu.core_type = #tpu.core_type<tc>, window_params = [{transform_indices = @transform_0, window_bounds = array<i64: 2, 128, 512>}, {pipeline_mode = #tpu.pipeline_mode<synchronous>, transform_indices = @transform_1, window_bounds = array<i64: 512, 192>}, {transform_indices = @transform_2, window_bounds = array<i64: 2, 128, 64>}]} {
    %c0 = arith.constant 0 : index
    %c0_0 = arith.constant 0 : index
    %c0_1 = arith.constant 0 : index
    %0 = vector.load %arg1[%c0, %c0_0, %c0_1] : memref<2x128x512xf32, #tpu.memory_space<vmem>>, vector<2x128x512xf32>
    %1 = arith.truncf %0 : vector<2x128x512xf32> to vector<2x128x512xbf16>
    %c0_2 = arith.constant 0 : index
    %c0_3 = arith.constant 0 : index
    %2 = vector.load %arg2[%c0_2, %c0_3] : memref<512x192xbf16, #tpu.memory_space<vmem>>, vector<512x192xbf16>
    %3 = vector.shape_cast %1 : vector<2x128x512xbf16> to vector<256x512xbf16>
    %cst = arith.constant dense<0.000000e+00> : vector<256x192xf32>
    %4 = tpu.matmul %3, %2, %cst {dimension_numbers = #tpu.dot_dimension_numbers<[1], [0], [0], [1], [0, 0, 1, 1], [], []>} : vector<256x512xbf16>, vector<512x192xbf16>, vector<256x192xf32> -> vector<256x192xf32>
    %5 = vector.shape_cast %4 : vector<256x192xf32> to vector<2x128x192xf32>
    %6 = vector.extract_strided_slice %5 {offsets = [0, 0, 0], sizes = [2, 128, 64], strides = [1, 1, 1]} : vector<2x128x192xf32> to vector<2x128x64xf32>
    %7 = arith.truncf %6 : vector<2x128x64xf32> to vector<2x128x64xbf16>
    %8 = vector.extract_strided_slice %5 {offsets = [0, 0, 64], sizes = [2, 128, 64], strides = [1, 1, 1]} : vector<2x128x192xf32> to vector<2x128x64xf32>
    %9 = arith.truncf %8 : vector<2x128x64xf32> to vector<2x128x64xbf16>
    %10 = vector.extract_strided_slice %5 {offsets = [0, 0, 128], sizes = [2, 128, 64], strides = [1, 1, 1]} : vector<2x128x192xf32> to vector<2x128x64xf32>
    %11 = arith.truncf %10 : vector<2x128x64xf32> to vector<2x128x64xbf16>
    "tpu.trace_start"() <{level = 10 : i32, message = "bqd,bkd->bqk"}> : () -> ()
    %cst_4 = arith.constant dense<0.000000e+00> : vector<2x128x128xf32>
    %12 = tpu.matmul %7, %11, %cst_4 {dimension_numbers = #tpu.dot_dimension_numbers<[2], [2], [1], [1], [0, 0, 0, 1, 1, 1], [0], [0]>} : vector<2x128x64xbf16>, vector<2x128x64xbf16>, vector<2x128x128xf32> -> vector<2x128x128xf32>
    "tpu.trace_stop"() : () -> ()
    %13 = tpu.iota {dimensions = array<i32: 0>} : vector<128x128xi32>
    %14 = tpu.iota {dimensions = array<i32: 1>} : vector<128x128xi32>
    %15 = arith.cmpi sle, %14, %13 : vector<128x128xi32>
    %16 = vector.shape_cast %15 : vector<128x128xi1> to vector<1x128x128xi1>
    %cst_5 = arith.constant 0xFF800000 : f32
    %17 = vector.shape_cast %16 : vector<1x128x128xi1> to vector<1x128x128xi1>
    %18 = vector.broadcast %17 : vector<1x128x128xi1> to vector<2x128x128xi1>
    %19 = vector.broadcast %cst_5 : f32 to vector<2x128x128xf32>
    %20 = arith.select %18, %12, %19 : vector<2x128x128xi1>, vector<2x128x128xf32>
    %cst_6 = arith.constant dense<0xFF800000> : vector<2x128xf32>
    %21 = vector.multi_reduction <maximumf>, %20, %cst_6 [2] : vector<2x128x128xf32> to vector<2x128xf32>
    %22 = vector.shape_cast %21 : vector<2x128xf32> to vector<2x128x1xf32>
    %23 = vector.broadcast %22 : vector<2x128x1xf32> to vector<2x128x128xf32>
    %24 = arith.subf %20, %23 : vector<2x128x128xf32>
    %25 = math.exp %24 : vector<2x128x128xf32>
    %cst_7 = arith.constant dense<0.000000e+00> : vector<2x128xf32>
    %26 = vector.multi_reduction <add>, %25, %cst_7 [2] : vector<2x128x128xf32> to vector<2x128xf32>
    %27 = vector.shape_cast %26 : vector<2x128xf32> to vector<2x128x1xf32>
    %28 = arith.truncf %25 : vector<2x128x128xf32> to vector<2x128x128xbf16>
    "tpu.trace_start"() <{level = 10 : i32, message = "bqk,bkd->bqd"}> : () -> ()
    %cst_8 = arith.constant dense<0.000000e+00> : vector<2x128x64xf32>
    %29 = tpu.matmul %28, %9, %cst_8 {dimension_numbers = #tpu.dot_dimension_numbers<[2], [1], [1], [2], [0, 0, 0, 1, 1, 2], [0], [0]>} : vector<2x128x128xbf16>, vector<2x128x64xbf16>, vector<2x128x64xf32> -> vector<2x128x64xf32>
    "tpu.trace_stop"() : () -> ()
    %30 = tpu.reciprocal %27 {approx = true} : vector<2x128x1xf32> -> vector<2x128x1xf32>
    %31 = vector.broadcast %30 : vector<2x128x1xf32> to vector<2x128x64xf32>
    %32 = arith.mulf %29, %31 : vector<2x128x64xf32>
    %c0_9 = arith.constant 0 : index
    %c0_10 = arith.constant 0 : index
    %c0_11 = arith.constant 0 : index
    %33 = vector.load %arg3[%c0_9, %c0_10, %c0_11] : memref<2x128x64xf32, #tpu.memory_space<vmem>>, vector<2x128x64xf32>
    tpu.vector_store %arg3[%c0_9, %c0_10, %c0_11], %32 {strides = array<i32>} : memref<2x128x64xf32, #tpu.memory_space<vmem>>, vector<2x128x64xf32>,
    return
  }
  func.func @transform_0(%arg0: i32) -> (i32, i32, i32) {
    %c0_i32 = arith.constant 0 : i32
    %c0_i32_0 = arith.constant 0 : i32
    %c0_i32_1 = arith.constant 0 : i32
    return %arg0, %c0_i32, %c0_i32_0 : i32, i32, i32
  }
  func.func @transform_1(%arg0: i32) -> (i32, i32) {
    %c0_i32 = arith.constant 0 : i32
    %c0_i32_0 = arith.constant 0 : i32
    %c0_i32_1 = arith.constant 0 : i32
    return %c0_i32, %c0_i32_0 : i32, i32
  }
  func.func @transform_2(%arg0: i32) -> (i32, i32, i32) {
    %c0_i32 = arith.constant 0 : i32
    %c0_i32_0 = arith.constant 0 : i32
    %c0_i32_1 = arith.constant 0 : i32
    return %arg0, %c0_i32, %c0_i32_0 : i32, i32, i32
  }
}

</mosaic_0001>

<bundles_post_ra>
// kernel: tpu_custom_call.1
= control target key start
LH: loop header
LB: loop body
LE: loop exit
PB: predicated region body
PF: predicated region fallthrough
CT: control target
= control target key end

     0   :  { %7 = vsyncpa [#allocation3], 0  ;;  %s5078_s0 = inlined_call_operand.hbm [shape: f32[4,128,512], index: 0, kind: input, shape index: {}]   ;;  %s5079_s1 = inlined_call_operand.vmem [shape: bf16[512,192], index: 1, kind: input, shape index: {}]   ;;  %s5080_s2 = inlined_call_operand.vmem [shape: f32[4,128,64], index: 2, kind: output, shape index: {}]  }
   0x1   :  { %9 = vsyncpa [#allocation3 + $0x1], 0  ;;  %s3568_s9 = smov 0   ;;  %s3570_s10 = smov 0  }
   0x2   :  { %s3572_s11 = smov 0   ;;  %s3574_s12 = smov 0  }
   0x3 LB: > { %s2960_s13 = sadd.s32 4294967295, %s3548_s12   ;;  %s3588_s14 = sadd.s32 1, %s3548_s12   ;;  %s3548_s12 = sphi %s3574_s12, %s5209_s12   ;;  %s3544_s11 = sphi %s3572_s11, %s5208_s11   ;;  %s3540_s10 = sphi %s3570_s10, %s5207_s10   ;;  %s3536_s9 = sphi %s3568_s9, %s5206_s9  }
   0x4   : > { %s19_s15 = ssub.s32 %s3548_s12, %s3588_s14  ;;  %s22_s16 = sadd.s32 1, %s3544_s11 }
   0x5   : > { %p20_p0 = scmp.eq.s32.totalorder %s19_s15, 0  ;;  %p29_p1 = scmp.ne.s32.totalorder %s3544_s11, %s3540_s10 }
   0x6   : > { %p30_p2 = scmp.eq.s32.totalorder %s3548_s12, 0  ;;  %p35_p3 = scmp.ne.s32.totalorder %s3540_s10, %s3536_s9 }
   0x7   : > { %s3598_s17 = scalar_select %p20_p0, %s3544_s11, %s22_s16  }
   0x8   : > { %p3600_p4 = por %p30_p2, %p29_p1  ;;  %p36_p5 = scmp.eq.s32.totalorder %s2960_s13, 0 }
   0x9   : > { %p3320_p6 = scmp.lt.s32.totalorder %s3548_s12, 2  ;;  %s109_s20 = sand.u32 1, %s3544_s11  }
   0xa   : > { %p3607_p7 = por %p36_p5, %p35_p3  ;;  %s2964_s21 = sshll.u32 %s109_s20, 10 }
   0xb   : > { %s3248_s22 = sshll.u32 %s3548_s12, 10  ;;  %s113_s26 = scalar_lea.vmem [#allocation2], %s2964_s21 }
   0xc   : > { %s119_s25 = scalar_lea.hbm %s5078_s0, %s3248_s22  ;;  %s122_s27 = sshll.u32 %s113_s26, 4  ;;  %s123_s27 = int_to_ptr.vmem [resolvable:$true] %s122_s27 }
   0xd   : > { %s120_s28 = sshll.u32 %s119_s25, 4  ;;  %p3618_p8 = pnand %p3320_p6, %p3600_p4  ;;  %s121_s28 = int_to_ptr.hbm [resolvable:$true] %s120_s28 }
   0xe   : > { %p2968_p9 = scmp.ge.s32.totalorder %s3548_s12, 1  ;;  %s110_s30 = scalar_lea.sflag [#allocation3], %s109_s20 }
   0xf   : > { %s3484_s3 = sshra.s32 %s121_s28, 4  ;;  %p3488_p11 = pneg %p3618_p8  ;;  %s3485_s3 = int_to_ptr.hbm [resolvable:$true] %s3484_s3 }
  0x10   : > { %s3486_s4 = scalar_lea.hbm %s3485_s3, 1024  ;;  %s3491_s7 = scalar_lea.hbm %s5078_s0, 2048 }
  0x11   : > { %p3487_p10 = scmp.ne.s32.totalorder %s3485_s3, %s3486_s4  ;;  %p3492_p0 = scmp.lt.s32.totalorder %s3485_s3, %s5078_s0 }
  0x12   : > { %p3493_p1 = scmp.lt.s32.totalorder %s3491_s7, %s3486_s4 }
  0x13   : > { %p3489_p12 = pnand %p3488_p11, %p3487_p10 }
  0x14   : > { %p3494_p2 = por %p3493_p1, %p3492_p0 }
  0x15   : > { %p3490_p13 = pneg %p3489_p12 }
  0x17   : > { %p3495_p3 = pnand %p3494_p2, %p3490_p13 }
  0x19   : > { %3498 = shalt.err (!%p3495_p3)
}
  0x1a   : > { %s3550_s15 = smov 512   ;;  %s3551_s16 = smov 32  }
  0x1b   : > { %3319 = dma.hbm_to_vmem [thread:$0]  (!%p3618_p8), %s121_s28, 16384, %s123_s27, %s110_s30, %s3550_s15, %s3550_s15, %s3551_s16  }
  0x1c   : > { %p130_p4 = scmp.lt.s32.totalorder %s3548_s12, 3 }
  0x1e   : > { %p131_p5 = pnand %p2968_p9, %p130_p4 }
  0x20   : > { %134 = sbr.rel (%p131_p5) target bundleno = 1348 (0x544), region = 28 }
  0x25   : > { %s136_s18 = sand.u32 1, %s3540_s10  }
  0x26   : > { %s2969_s20 = sshll.u32 %s136_s18, 10  ;;  %s137_s21 = scalar_lea.sflag [#allocation3], %s136_s18 }
  0x27   : > { %s3637_s22 = scalar_lea.vmem [#allocation2], %s2969_s20 }
  0x28   : > { %3531 = dma.done.wait (%p3607_p7), %s137_s21, 16384  }
  0x29   : > { %3533 = vsyncadd (%p3607_p7), %s137_s21, 4294950912  ;;  %v3031_v0 = vld [vmem:[%s5079_s1 + $0x70] sm:$0xf]  ;;  %v3265_v1 = vld [vmem:[%s5079_s1 + $0x74] sm:$0xf0]  ;;  %s3552_s29 = smov 64  }
  0x2a   : > { %v3095_v2 = vld [vmem:[%s5079_s1 + $0xf0] sm:$0xf]  ;;  %v3032_v3 = vor.u32 %v3265_v1, %v3031_v0  ;;  %v3281_v4 = vld [vmem:[%s5079_s1 + $0xf4] sm:$0xf0]  ;;  %v3023_v11 = vld [vmem:[%s5079_s1 + $0x60] sm:$0xf] }
  0x2b   : > { %v3159_v5 = vld [vmem:[%s5079_s1 + $0x170] sm:$0xf]  ;;  %v3297_v6 = vld [vmem:[%s5079_s1 + $0x174] sm:$0xf0]  ;;  %v3096_v7 = vor.u32 %v3281_v4, %v3095_v2  ;;  %v3263_v13 = vld [vmem:[%s5079_s1 + $0x64] sm:$0xf0] }
  0x2c   : > { %v3160_v8 = vor.u32 %v3297_v6, %v3159_v5  ;;  %v3223_v9 = vld [vmem:[%s5079_s1 + $0x1f0] sm:$0xf]  ;;  %v3313_v10 = vld [vmem:[%s5079_s1 + $0x1f4] sm:$0xf0]  ;;  %1067 = vmatpush.bf16.msra.mxu0 %v3032_v3  ;;  %v3087_v14 = vld [vmem:[%s5079_s1 + $0xe0] sm:$0xf]  ;;  %v3024_v16 = vor.u32 %v3263_v13, %v3023_v11 }
  0x2d   : > { %v3224_v12 = vor.u32 %v3313_v10, %v3223_v9  ;;  %v3279_v15 = vld [vmem:[%s5079_s1 + $0xe4] sm:$0xf0]  ;;  %1156 = vmatpush.bf16.msra.mxu1 %v3096_v7  ;;  %v3151_v18 = vld [vmem:[%s5079_s1 + $0x160] sm:$0xf]  ;;  %v3015_v23 = vld [vmem:[%s5079_s1 + $0x50] sm:$0xf] }
  0x2e   : > { %1245 = vmatpush.bf16.msra.mxu2 %v3160_v8  ;;  %v3088_v17 = vor.u32 %v3279_v15, %v3087_v14  ;;  %v3295_v19 = vld [vmem:[%s5079_s1 + $0x164] sm:$0xf0]  ;;  %v3215_v20 = vld [vmem:[%s5079_s1 + $0x1e0] sm:$0xf]  ;;  %v3261_v24 = vld [vmem:[%s5079_s1 + $0x54] sm:$0xf0] }
  0x2f   : > { %1334 = vmatpush.bf16.msra.mxu3 %v3224_v12  ;;  %v3152_v21 = vor.u32 %v3295_v19, %v3151_v18  ;;  %v3311_v22 = vld [vmem:[%s5079_s1 + $0x1e4] sm:$0xf0]  ;;  %v3079_v26 = vld [vmem:[%s5079_s1 + $0xd0] sm:$0xf]  ;;  %v3277_v27 = vld [vmem:[%s5079_s1 + $0xd4] sm:$0xf0]  ;;  %v3016_v29 = vor.u32 %v3261_v24, %v3015_v23 }
  0x30   : > { %v3216_v25 = vor.u32 %v3311_v22, %v3215_v20  ;;  %v3143_v28 = vld [vmem:[%s5079_s1 + $0x150] sm:$0xf]  ;;  %1068 = vmatpush.bf16.msra.mxu0 %v3024_v16  ;;  %v3293_v30 = vld [vmem:[%s5079_s1 + $0x154] sm:$0xf0]  ;;  %v3080_v33 = vor.u32 %v3277_v27, %v3079_v26  ;;  %v3007_v35 = vld [vmem:[%s5079_s1 + $0x40] sm:$0xf] }
  0x31   : > { %v3207_v31 = vld [vmem:[%s5079_s1 + $0x1d0] sm:$0xf]  ;;  %v3309_v32 = vld [vmem:[%s5079_s1 + $0x1d4] sm:$0xf0]  ;;  %1157 = vmatpush.bf16.msra.mxu1 %v3088_v17  ;;  %v3144_v34 = vor.u32 %v3293_v30, %v3143_v28  ;;  %v3259_v36 = vld [vmem:[%s5079_s1 + $0x44] sm:$0xf0] }
  0x32   : > { %1246 = vmatpush.bf16.msra.mxu2 %v3152_v21  ;;  %v3071_v37 = vld [vmem:[%s5079_s1 + $0xc0] sm:$0xf]  ;;  %v3208_v38 = vor.u32 %v3309_v32, %v3207_v31  ;;  %v3275_v39 = vld [vmem:[%s5079_s1 + $0xc4] sm:$0xf0]  ;;  %v3008_v44 = vor.u32 %v3259_v36, %v3007_v35  ;;  %v2999_v47 = vld [vmem:[%s5079_s1 + $0x30] sm:$0xf] }
  0x33   : > { %1335 = vmatpush.bf16.msra.mxu3 %v3216_v25  ;;  %v3135_v40 = vld [vmem:[%s5079_s1 + $0x140] sm:$0xf]  ;;  %v3291_v41 = vld [vmem:[%s5079_s1 + $0x144] sm:$0xf0]  ;;  %v3072_v45 = vor.u32 %v3275_v39, %v3071_v37  ;;  %v3257_v48 = vld [vmem:[%s5079_s1 + $0x34] sm:$0xf0] }
  0x34   : > { %v3199_v42 = vld [vmem:[%s5079_s1 + $0x1c0] sm:$0xf]  ;;  %v3307_v43 = vld [vmem:[%s5079_s1 + $0x1c4] sm:$0xf0]  ;;  %1069 = vmatpush.bf16.msra.mxu0 %v3016_v29  ;;  %v3136_v46 = vor.u32 %v3291_v41, %v3135_v40  ;;  %v3063_v49 = vld [vmem:[%s5079_s1 + $0xb0] sm:$0xf]  ;;  %v3000_v56 = vor.u32 %v3257_v48, %v2999_v47 }
  0x35   : > { %1158 = vmatpush.bf16.msra.mxu1 %v3080_v33  ;;  %v3200_v50 = vor.u32 %v3307_v43, %v3199_v42  ;;  %v3273_v51 = vld [vmem:[%s5079_s1 + $0xb4] sm:$0xf0]  ;;  %v3127_v52 = vld [vmem:[%s5079_s1 + $0x130] sm:$0xf]  ;;  %v2991_v57 = vld [vmem:[%s5079_s1 + $0x20] sm:$0xf] }
  0x36   : > { %1247 = vmatpush.bf16.msra.mxu2 %v3144_v34  ;;  %v3289_v53 = vld [vmem:[%s5079_s1 + $0x134] sm:$0xf0]  ;;  %v3191_v54 = vld [vmem:[%s5079_s1 + $0x1b0] sm:$0xf]  ;;  %v3064_v58 = vor.u32 %v3273_v51, %v3063_v49  ;;  %v3255_v60 = vld [vmem:[%s5079_s1 + $0x24] sm:$0xf0] }
  0x37   : > { %1336 = vmatpush.bf16.msra.mxu3 %v3208_v38  ;;  %v3305_v55 = vld [vmem:[%s5079_s1 + $0x1b4] sm:$0xf0]  ;;  %v3128_v59 = vor.u32 %v3289_v53, %v3127_v52  ;;  %v3055_v61 = vld [vmem:[%s5079_s1 + $0xa0] sm:$0xf]  ;;  %v3271_v62 = vld [vmem:[%s5079_s1 + $0xa4] sm:$0xf0]  ;;  %v2992_v6 = vor.u32 %v3255_v60, %v2991_v57 }
  0x38   : > { %1070 = vmatpush.bf16.msra.mxu0 %v3008_v44  ;;  %v3192_v63 = vor.u32 %v3305_v55, %v3191_v54  ;;  %v3119_v0 = vld [vmem:[%s5079_s1 + $0x120] sm:$0xf]  ;;  %v3287_v1 = vld [vmem:[%s5079_s1 + $0x124] sm:$0xf0]  ;;  %v2983_v4 = vld [vmem:[%s5079_s1 + $0x10] sm:$0xf]  ;;  %v3056_v10 = vor.u32 %v3271_v62, %v3055_v61 }
  0x39   : > { %1159 = vmatpush.bf16.msra.mxu1 %v3072_v45  ;;  %v3183_v2 = vld [vmem:[%s5079_s1 + $0x1a0] sm:$0xf]  ;;  %v3303_v3 = vld [vmem:[%s5079_s1 + $0x1a4] sm:$0xf0]  ;;  %v3253_v5 = vld [vmem:[%s5079_s1 + $0x14] sm:$0xf0]  ;;  %v3120_v11 = vor.u32 %v3287_v1, %v3119_v0 }
  0x3a   : > { %1248 = vmatpush.bf16.msra.mxu2 %v3136_v46  ;;  %v3047_v7 = vld [vmem:[%s5079_s1 + $0x90] sm:$0xf]  ;;  %v3269_v8 = vld [vmem:[%s5079_s1 + $0x94] sm:$0xf0]  ;;  %v3184_v15 = vor.u32 %v3303_v3, %v3183_v2  ;;  %v2975_v16 = vld [vmem:[%s5079_s1] sm:$0xf]  ;;  %v2984_v24 = vor.u32 %v3253_v5, %v2983_v4 }
  0x3b   : > { %1337 = vmatpush.bf16.msra.mxu3 %v3200_v50  ;;  %v3111_v9 = vld [vmem:[%s5079_s1 + $0x110] sm:$0xf]  ;;  %v3285_v12 = vld [vmem:[%s5079_s1 + $0x114] sm:$0xf0]  ;;  %v3251_v17 = vld [vmem:[%s5079_s1 + $0x4] sm:$0xf0]  ;;  %v3048_v25 = vor.u32 %v3269_v8, %v3047_v7 }
  0x3c   : > { %1071 = vmatpush.bf16.msra.mxu0 %v3000_v56  ;;  %v3175_v13 = vld [vmem:[%s5079_s1 + $0x190] sm:$0xf]  ;;  %v3301_v14 = vld [vmem:[%s5079_s1 + $0x194] sm:$0xf0]  ;;  %v171_v18 = vld [vmem:[%s3637_s22] sm:$0xff]  ;;  %v3112_v30 = vor.u32 %v3285_v12, %v3111_v9  ;;  %v2976_v38 = vor.u32 %v3251_v17, %v2975_v16  ;;  %vm1923_vm0 = vcmask 523264  }
  0x3d   : > { %1160 = vmatpush.bf16.msra.mxu1 %v3064_v58  ;;  %v172_v19 = vld [vmem:[%s3637_s22 + $0x8] sm:$0xff]  ;;  %v175_v20 = vld [vmem:[%s3637_s22 + $0x20] sm:$0xff]  ;;  %v173_v23 = vld [vmem:[%s3637_s22 + $0x10] sm:$0xff]  ;;  %v3176_v34 = vor.u32 %v3301_v14, %v3175_v13 }
  0x3e   : > { %1249 = vmatpush.bf16.msra.mxu2 %v3128_v59  ;;  %v176_v21 = vld [vmem:[%s3637_s22 + $0x28] sm:$0xff]  ;;  %v299_v22 = vpack.c.bf16 %v172_v19, %v171_v18  ;;  %v174_v27 = vld [vmem:[%s3637_s22 + $0x18] sm:$0xff]  ;;  %v177_v28 = vld [vmem:[%s3637_s22 + $0x30] sm:$0xff] }
  0x3f   : > { %1338 = vmatpush.bf16.msra.mxu3 %v3192_v63  ;;  %v301_v26 = vpack.c.bf16 %v176_v21, %v175_v20  ;;  %v178_v29 = vld [vmem:[%s3637_s22 + $0x38] sm:$0xff]  ;;  %v3039_v31 = vld [vmem:[%s5079_s1 + $0x80] sm:$0xf]  ;;  %v300_v32 = vpack.c.bf16 %v174_v27, %v173_v23  ;;  %v3267_v35 = vld [vmem:[%s5079_s1 + $0x84] sm:$0xf0] }
  0x40   : > { %1072 = vmatpush.bf16.msra.mxu0 %v2992_v6  ;;  %v302_v33 = vpack.c.bf16 %v178_v29, %v177_v28  ;;  %v3103_v36 = vld [vmem:[%s5079_s1 + $0x100] sm:$0xf]  ;;  %v3283_v37 = vld [vmem:[%s5079_s1 + $0x104] sm:$0xf0]  ;;  %v491_v41 = vunpack.c.l.b16 %v299_v22  ;;  %v492_v43 = vunpack.c.h.b16 %v299_v22  ;;  %v3040_v47 = vor.u32 %v3267_v35, %v3039_v31  ;;  %v181_v60 = vld [vmem:[%s3637_s22 + $0x50] sm:$0xff] }
  0x41   : > { %1161 = vmatpush.bf16.msra.mxu1 %v3056_v10  ;;  %v3167_v39 = vld [vmem:[%s5079_s1 + $0x180] sm:$0xf]  ;;  %v3299_v40 = vld [vmem:[%s5079_s1 + $0x184] sm:$0xf0]  ;;  %v495_v42 = vunpack.c.l.b16 %v301_v26  ;;  %v496_v44 = vunpack.c.h.b16 %v301_v26  ;;  %v493_v45 = vunpack.c.l.b16 %v300_v32  ;;  %v3104_v48 = vor.u32 %v3283_v37, %v3103_v36  ;;  %v182_v61 = vld [vmem:[%s3637_s22 + $0x58] sm:$0xff] }
  0x42   : > { %1250 = vmatpush.bf16.msra.mxu2 %v3120_v11  ;;  %v497_v46 = vunpack.c.l.b16 %v302_v33  ;;  %v494_v49 = vunpack.c.h.b16 %v300_v32  ;;  %v498_v50 = vunpack.c.h.b16 %v302_v33  ;;  %v3168_v51 = vor.u32 %v3299_v40, %v3167_v39  ;;  %v179_v56 = vld [vmem:[%s3637_s22 + $0x40] sm:$0xff]  ;;  %v180_v57 = vld [vmem:[%s3637_s22 + $0x48] sm:$0xff]  ;;  %v185_v62 = vld [vmem:[%s3637_s22 + $0x70] sm:$0xff] }
  0x43   : > { %1339 = vmatpush.bf16.msra.mxu3 %v3184_v15  ;;  %v3843_v52 = vpack.c.b16 %v495_v42, %v491_v41  ;;  %v3845_v53 = vpack.c.b16 %v496_v44, %v492_v43  ;;  %v183_v58 = vld [vmem:[%s3637_s22 + $0x60] sm:$0xff]  ;;  %v184_v59 = vld [vmem:[%s3637_s22 + $0x68] sm:$0xff]  ;;  %v186_v63 = vld [vmem:[%s3637_s22 + $0x78] sm:$0xff]  ;;  %v303_v0 = vpack.c.bf16 %v180_v57, %v179_v56  ;;  %v304_v2 = vpack.c.bf16 %v182_v61, %v181_v60 }
  0x44   : > { %1073 = vmatpush.bf16.msra.mxu0 %v2984_v24  ;;  %v3847_v54 = vpack.c.b16 %v497_v46, %v493_v45  ;;  %v3849_v55 = vpack.c.b16 %v498_v50, %v494_v49  ;;  %v305_v1 = vpack.c.bf16 %v184_v59, %v183_v58  ;;  %v306_v3 = vpack.c.bf16 %v186_v63, %v185_v62  ;;  %v187_v16 = vld [vmem:[%s3637_s22 + $0x80] sm:$0xff]  ;;  %v188_v17 = vld [vmem:[%s3637_s22 + $0x88] sm:$0xff]  ;;  %v189_v20 = vld [vmem:[%s3637_s22 + $0x90] sm:$0xff] }
  0x45   : > { %1162 = vmatpush.bf16.msra.mxu1 %v3048_v25  ;;  %v499_v4 = vunpack.c.l.b16 %v303_v0  ;;  %v500_v6 = vunpack.c.h.b16 %v303_v0  ;;  %v501_v8 = vunpack.c.l.b16 %v304_v2  ;;  %v502_v10 = vunpack.c.h.b16 %v304_v2  ;;  %v191_v18 = vld [vmem:[%s3637_s22 + $0xa0] sm:$0xff]  ;;  %v192_v19 = vld [vmem:[%s3637_s22 + $0xa8] sm:$0xff]  ;;  %v190_v21 = vld [vmem:[%s3637_s22 + $0x98] sm:$0xff] }
  0x46   : > { %1251 = vmatpush.bf16.msra.mxu2 %v3112_v30  ;;  %v503_v5 = vunpack.c.l.b16 %v305_v1  ;;  %v504_v7 = vunpack.c.h.b16 %v305_v1  ;;  %v505_v9 = vunpack.c.l.b16 %v306_v3  ;;  %v506_v11 = vunpack.c.h.b16 %v306_v3  ;;  %v193_v22 = vld [vmem:[%s3637_s22 + $0xb0] sm:$0xff]  ;;  %v194_v23 = vld [vmem:[%s3637_s22 + $0xb8] sm:$0xff]  ;;  %v195_v40 = vld [vmem:[%s3637_s22 + $0xc0] sm:$0xff] }
  0x47   : > { %1340 = vmatpush.bf16.msra.mxu3 %v3176_v34  ;;  %v307_v24 = vpack.c.bf16 %v188_v17, %v187_v16  ;;  %v309_v25 = vpack.c.bf16 %v192_v19, %v191_v18  ;;  %v308_v26 = vpack.c.bf16 %v190_v21, %v189_v20  ;;  %v310_v27 = vpack.c.bf16 %v194_v23, %v193_v22  ;;  %v196_v41 = vld [vmem:[%s3637_s22 + $0xc8] sm:$0xff]  ;;  %v199_v42 = vld [vmem:[%s3637_s22 + $0xe0] sm:$0xff]  ;;  %v197_v44 = vld [vmem:[%s3637_s22 + $0xd0] sm:$0xff] }
  0x48   : > { %1074 = vmatpush.bf16.msra.mxu0 %v2976_v38  ;;  %v3863_v12 = vpack.c.b16 %v503_v5, %v499_v4  ;;  %v3865_v13 = vpack.c.b16 %v504_v7, %v500_v6  ;;  %v3867_v14 = vpack.c.b16 %v505_v9, %v501_v8  ;;  %v3869_v15 = vpack.c.b16 %v506_v11, %v502_v10  ;;  %v200_v43 = vld [vmem:[%s3637_s22 + $0xe8] sm:$0xff]  ;;  %v198_v45 = vld [vmem:[%s3637_s22 + $0xd8] sm:$0xff]  ;;  %v201_v46 = vld [vmem:[%s3637_s22 + $0xf0] sm:$0xff] }
  0x49   : > { %1163 = vmatpush.bf16.msra.mxu1 %v3040_v47  ;;  %v507_v28 = vunpack.c.l.b16 %v307_v24  ;;  %v511_v29 = vunpack.c.l.b16 %v309_v25  ;;  %v508_v30 = vunpack.c.h.b16 %v307_v24  ;;  %v512_v31 = vunpack.c.h.b16 %v309_v25  ;;  %v202_v47 = vld [vmem:[%s3637_s22 + $0xf8] sm:$0xff]  ;;  %v203_v4 = vld [vmem:[%s3637_s22 + $0x100] sm:$0xff]  ;;  %v204_v5 = vld [vmem:[%s3637_s22 + $0x108] sm:$0xff] }
  0x4a   : > { %1252 = vmatpush.bf16.msra.mxu2 %v3104_v48  ;;  %v509_v32 = vunpack.c.l.b16 %v308_v26  ;;  %v513_v33 = vunpack.c.l.b16 %v310_v27  ;;  %v510_v34 = vunpack.c.h.b16 %v308_v26  ;;  %v514_v35 = vunpack.c.h.b16 %v310_v27  ;;  %v207_v6 = vld [vmem:[%s3637_s22 + $0x120] sm:$0xff]  ;;  %v208_v7 = vld [vmem:[%s3637_s22 + $0x128] sm:$0xff]  ;;  %v205_v8 = vld [vmem:[%s3637_s22 + $0x110] sm:$0xff] }
  0x4b   : > { %1341 = vmatpush.bf16.msra.mxu3 %v3168_v51  ;;  %1075 = vmatmul.bf16.vlgmr.msra.gmra.mxu0 %v3843_v52  ;;  %v3883_v36 = vpack.c.b16 %v511_v29, %v507_v28  ;;  %v3885_v37 = vpack.c.b16 %v512_v31, %v508_v30  ;;  %v311_v48 = vpack.c.bf16 %v196_v41, %v195_v40  ;;  %v206_v9 = vld [vmem:[%s3637_s22 + $0x118] sm:$0xff]  ;;  %v209_v10 = vld [vmem:[%s3637_s22 + $0x130] sm:$0xff] }
  0x4c   : > { %1164 = vmatmul.bf16.vlgmr.msra.gmra.mxu1 %v3845_v53  ;;  %v3887_v38 = vpack.c.b16 %v513_v33, %v509_v32  ;;  %v3889_v39 = vpack.c.b16 %v514_v35, %v510_v34  ;;  %v313_v49 = vpack.c.bf16 %v200_v43, %v199_v42  ;;  %v312_v50 = vpack.c.bf16 %v198_v45, %v197_v44  ;;  %v210_v11 = vld [vmem:[%s3637_s22 + $0x138] sm:$0xff]  ;;  %v211_v32 = vld [vmem:[%s3637_s22 + $0x140] sm:$0xff]  ;;  %v212_v33 = vld [vmem:[%s3637_s22 + $0x148] sm:$0xff] }
  0x4d   : > { %1253 = vmatmul.bf16.vlgmr.msra.gmra.mxu2 %v3847_v54  ;;  %v314_v51 = vpack.c.bf16 %v202_v47, %v201_v46  ;;  %v515_v56 = vunpack.c.l.b16 %v311_v48  ;;  %v516_v58 = vunpack.c.h.b16 %v311_v48  ;;  %v315_v16 = vpack.c.bf16 %v204_v5, %v203_v4  ;;  %v215_v34 = vld [vmem:[%s3637_s22 + $0x160] sm:$0xff]  ;;  %v216_v35 = vld [vmem:[%s3637_s22 + $0x168] sm:$0xff]  ;;  %v213_v40 = vld [vmem:[%s3637_s22 + $0x150] sm:$0xff] }
  0x4e   : > { %1342 = vmatmul.bf16.vlgmr.msra.gmra.mxu3 %v3849_v55  ;;  %v519_v57 = vunpack.c.l.b16 %v313_v49  ;;  %v520_v59 = vunpack.c.h.b16 %v313_v49  ;;  %v517_v60 = vunpack.c.l.b16 %v312_v50  ;;  %v518_v62 = vunpack.c.h.b16 %v312_v50  ;;  %v214_v41 = vld [vmem:[%s3637_s22 + $0x158] sm:$0xff]  ;;  %v217_v42 = vld [vmem:[%s3637_s22 + $0x170] sm:$0xff]  ;;  %v219_v4 = vld [vmem:[%s3637_s22 + $0x180] sm:$0xff] }
  0x4f   : > { %v521_v61 = vunpack.c.l.b16 %v314_v51  ;;  %v522_v63 = vunpack.c.h.b16 %v314_v51  ;;  %v317_v17 = vpack.c.bf16 %v208_v7, %v207_v6  ;;  %v316_v18 = vpack.c.bf16 %v206_v9, %v205_v8  ;;  %v218_v43 = vld [vmem:[%s3637_s22 + $0x178] sm:$0xff]  ;;  %v220_v5 = vld [vmem:[%s3637_s22 + $0x188] sm:$0xff]  ;;  %v223_v6 = vld [vmem:[%s3637_s22 + $0x1a0] sm:$0xff] }
  0x50   : > { %v3903_v0 = vpack.c.b16 %v519_v57, %v515_v56  ;;  %v3905_v1 = vpack.c.b16 %v520_v59, %v516_v58  ;;  %v318_v19 = vpack.c.bf16 %v210_v11, %v209_v10  ;;  %v523_v20 = vunpack.c.l.b16 %v315_v16  ;;  %v224_v7 = vld [vmem:[%s3637_s22 + $0x1a8] sm:$0xff]  ;;  %v221_v8 = vld [vmem:[%s3637_s22 + $0x190] sm:$0xff]  ;;  %v222_v9 = vld [vmem:[%s3637_s22 + $0x198] sm:$0xff] }
  0x51   : > { %v3907_v2 = vpack.c.b16 %v521_v61, %v517_v60  ;;  %v3909_v3 = vpack.c.b16 %v522_v63, %v518_v62  ;;  %v527_v21 = vunpack.c.l.b16 %v317_v17  ;;  %v524_v22 = vunpack.c.h.b16 %v315_v16  ;;  %v225_v10 = vld [vmem:[%s3637_s22 + $0x1b0] sm:$0xff]  ;;  %v226_v11 = vld [vmem:[%s3637_s22 + $0x1b8] sm:$0xff] }
  0x52   : > { %v528_v23 = vunpack.c.h.b16 %v317_v17  ;;  %v525_v24 = vunpack.c.l.b16 %v316_v18  ;;  %v529_v25 = vunpack.c.l.b16 %v318_v19  ;;  %v526_v26 = vunpack.c.h.b16 %v316_v18 }
  0x53   : > { %v530_v27 = vunpack.c.h.b16 %v318_v19  ;;  %v3923_v28 = vpack.c.b16 %v527_v21, %v523_v20  ;;  %v319_v44 = vpack.c.bf16 %v212_v33, %v211_v32  ;;  %v321_v45 = vpack.c.bf16 %v216_v35, %v215_v34 }
  0x54   : > { %v3925_v29 = vpack.c.b16 %v528_v23, %v524_v22  ;;  %v3927_v30 = vpack.c.b16 %v529_v25, %v525_v24  ;;  %v320_v46 = vpack.c.bf16 %v214_v41, %v213_v40  ;;  %v322_v47 = vpack.c.bf16 %v218_v43, %v217_v42  ;;  %v227_v40 = vld [vmem:[%s3637_s22 + $0x1c0] sm:$0xff]  ;;  %v228_v41 = vld [vmem:[%s3637_s22 + $0x1c8] sm:$0xff] }
  0x55   : > { %v3929_v31 = vpack.c.b16 %v530_v27, %v526_v26  ;;  %v531_v48 = vunpack.c.l.b16 %v319_v44  ;;  %v535_v49 = vunpack.c.l.b16 %v321_v45  ;;  %v532_v50 = vunpack.c.h.b16 %v319_v44  ;;  %v231_v42 = vld [vmem:[%s3637_s22 + $0x1e0] sm:$0xff]  ;;  %v232_v43 = vld [vmem:[%s3637_s22 + $0x1e8] sm:$0xff]  ;;  %v229_v44 = vld [vmem:[%s3637_s22 + $0x1d0] sm:$0xff] }
  0x56   : > { %v536_v51 = vunpack.c.h.b16 %v321_v45  ;;  %v533_v56 = vunpack.c.l.b16 %v320_v46  ;;  %v537_v57 = vunpack.c.l.b16 %v322_v47  ;;  %v534_v58 = vunpack.c.h.b16 %v320_v46  ;;  %v230_v45 = vld [vmem:[%s3637_s22 + $0x1d8] sm:$0xff]  ;;  %v233_v46 = vld [vmem:[%s3637_s22 + $0x1f0] sm:$0xff] }
  0x57   : > { %v538_v59 = vunpack.c.h.b16 %v322_v47  ;;  %v3943_v60 = vpack.c.b16 %v535_v49, %v531_v48  ;;  %v323_v16 = vpack.c.bf16 %v220_v5, %v219_v4  ;;  %v325_v17 = vpack.c.bf16 %v224_v7, %v223_v6  ;;  %v234_v47 = vld [vmem:[%s3637_s22 + $0x1f8] sm:$0xff] }
  0x58   : > { %v3945_v61 = vpack.c.b16 %v536_v51, %v532_v50  ;;  %v3947_v62 = vpack.c.b16 %v537_v57, %v533_v56  ;;  %v324_v18 = vpack.c.bf16 %v222_v9, %v221_v8  ;;  %v326_v19 = vpack.c.bf16 %v226_v11, %v225_v10 }
  0x59   : > { %v3949_v63 = vpack.c.b16 %v538_v59, %v534_v58  ;;  %v539_v20 = vunpack.c.l.b16 %v323_v16  ;;  %v543_v21 = vunpack.c.l.b16 %v325_v17  ;;  %v540_v22 = vunpack.c.h.b16 %v323_v16  ;;  %v235_v16 = vld [vmem:[%s3637_s22 + $0x200] sm:$0xff] }
  0x5a   : > { %v544_v23 = vunpack.c.h.b16 %v325_v17  ;;  %v541_v24 = vunpack.c.l.b16 %v324_v18  ;;  %v545_v25 = vunpack.c.l.b16 %v326_v19  ;;  %v542_v26 = vunpack.c.h.b16 %v324_v18  ;;  %v236_v17 = vld [vmem:[%s3637_s22 + $0x208] sm:$0xff]  ;;  %v239_v18 = vld [vmem:[%s3637_s22 + $0x220] sm:$0xff] }
  0x5b   : > { %1080 = vmatmul.bf16.gmra.mxu0 %v3863_v12  ;;  %v546_v27 = vunpack.c.h.b16 %v326_v19  ;;  %v3963_v32 = vpack.c.b16 %v543_v21, %v539_v20  ;;  %v327_v48 = vpack.c.bf16 %v228_v41, %v227_v40  ;;  %v329_v49 = vpack.c.bf16 %v232_v43, %v231_v42  ;;  %v240_v19 = vld [vmem:[%s3637_s22 + $0x228] sm:$0xff]  ;;  %v237_v20 = vld [vmem:[%s3637_s22 + $0x210] sm:$0xff]  ;;  %v238_v21 = vld [vmem:[%s3637_s22 + $0x218] sm:$0xff] }
  0x5c   : > { %1169 = vmatmul.bf16.gmra.mxu1 %v3865_v13  ;;  %v3965_v33 = vpack.c.b16 %v544_v23, %v540_v22  ;;  %v3967_v34 = vpack.c.b16 %v545_v25, %v541_v24  ;;  %v328_v50 = vpack.c.bf16 %v230_v45, %v229_v44  ;;  %v330_v51 = vpack.c.bf16 %v234_v47, %v233_v46  ;;  %v241_v22 = vld [vmem:[%s3637_s22 + $0x230] sm:$0xff]  ;;  %v242_v23 = vld [vmem:[%s3637_s22 + $0x238] sm:$0xff] }
  0x5d   : > { %1258 = vmatmul.bf16.gmra.mxu2 %v3867_v14  ;;  %v3969_v35 = vpack.c.b16 %v546_v27, %v542_v26  ;;  %v547_v56 = vunpack.c.l.b16 %v327_v48  ;;  %v551_v57 = vunpack.c.l.b16 %v329_v49  ;;  %v548_v58 = vunpack.c.h.b16 %v327_v48 }
  0x5e   : > { %1347 = vmatmul.bf16.gmra.mxu3 %v3869_v15  ;;  %v552_v59 = vunpack.c.h.b16 %v329_v49  ;;  %v549_v4 = vunpack.c.l.b16 %v328_v50  ;;  %v553_v5 = vunpack.c.l.b16 %v330_v51  ;;  %v550_v6 = vunpack.c.h.b16 %v328_v50 }
  0x5f   : > { %v554_v7 = vunpack.c.h.b16 %v330_v51  ;;  %v3983_v8 = vpack.c.b16 %v551_v57, %v547_v56  ;;  %v331_v24 = vpack.c.bf16 %v236_v17, %v235_v16  ;;  %v333_v25 = vpack.c.bf16 %v240_v19, %v239_v18  ;;  %v246_v16 = vld [vmem:[%s3637_s22 + $0x258] sm:$0xff]  ;;  %v249_v17 = vld [vmem:[%s3637_s22 + $0x270] sm:$0xff] }
  0x60   : > { %v3985_v9 = vpack.c.b16 %v552_v59, %v548_v58  ;;  %v3987_v10 = vpack.c.b16 %v553_v5, %v549_v4  ;;  %v332_v26 = vpack.c.bf16 %v238_v21, %v237_v20  ;;  %v334_v27 = vpack.c.bf16 %v242_v23, %v241_v22  ;;  %v243_v59 = vld [vmem:[%s3637_s22 + $0x240] sm:$0xff]  ;;  %v244_v4 = vld [vmem:[%s3637_s22 + $0x248] sm:$0xff]  ;;  %v250_v18 = vld [vmem:[%s3637_s22 + $0x278] sm:$0xff] }
  0x61   : > { %v3989_v11 = vpack.c.b16 %v554_v7, %v550_v6  ;;  %v555_v40 = vunpack.c.l.b16 %v331_v24  ;;  %v559_v41 = vunpack.c.l.b16 %v333_v25  ;;  %v556_v42 = vunpack.c.h.b16 %v331_v24  ;;  %v247_v5 = vld [vmem:[%s3637_s22 + $0x260] sm:$0xff]  ;;  %v248_v6 = vld [vmem:[%s3637_s22 + $0x268] sm:$0xff]  ;;  %v245_v7 = vld [vmem:[%s3637_s22 + $0x250] sm:$0xff] }
  0x62   : > { %v560_v43 = vunpack.c.h.b16 %v333_v25  ;;  %v557_v44 = vunpack.c.l.b16 %v332_v26  ;;  %v561_v45 = vunpack.c.l.b16 %v334_v27  ;;  %v558_v46 = vunpack.c.h.b16 %v332_v26 }
  0x63   : > { %v562_v47 = vunpack.c.h.b16 %v334_v27  ;;  %v4003_v48 = vpack.c.b16 %v559_v41, %v555_v40  ;;  %v335_v20 = vpack.c.bf16 %v244_v4, %v243_v59  ;;  %v337_v21 = vpack.c.bf16 %v248_v6, %v247_v5 }
  0x64   : > { %v4005_v50 = vpack.c.b16 %v560_v43, %v556_v42  ;;  %v4007_v51 = vpack.c.b16 %v561_v45, %v557_v44  ;;  %v336_v25 = vpack.c.bf16 %v246_v16, %v245_v7  ;;  %v338_v26 = vpack.c.bf16 %v250_v18, %v249_v17 }
  0x65   : > { %5123 = vst [vmem:[#allocation5_spill] sm:$0xff] %v4003_v48  ;;  %v4009_v57 = vpack.c.b16 %v562_v47, %v558_v46  ;;  %v563_v42 = vunpack.c.l.b16 %v335_v20  ;;  %v567_v43 = vunpack.c.l.b16 %v337_v21  ;;  %v564_v44 = vunpack.c.h.b16 %v335_v20 }
  0x66   : > { %5124 = vst [vmem:[#allocation6_spill] sm:$0xff] %v4005_v50  ;;  %v568_v45 = vunpack.c.h.b16 %v337_v21  ;;  %v565_v46 = vunpack.c.l.b16 %v336_v25  ;;  %v569_v47 = vunpack.c.l.b16 %v338_v26  ;;  %v251_v21 = vld [vmem:[%s3637_s22 + $0x280] sm:$0xff] }
  0x67   : > { %5125 = vst [vmem:[#allocation7_spill] sm:$0xff] %v4007_v51  ;;  %v4023_v4 = vpack.c.b16 %v567_v43, %v563_v42  ;;  %v258_v42 = vld [vmem:[%s3637_s22 + $0x2b8] sm:$0xff] }
  0x68   : > { %5126 = vst [vmem:[#allocation8_spill] sm:$0xff] %v4009_v57  ;;  %v4025_v7 = vpack.c.b16 %v568_v45, %v564_v44  ;;  %v4027_v16 = vpack.c.b16 %v569_v47, %v565_v46 }
  0x69   : > { %5127 = vst [vmem:[#allocation9_spill] sm:$0xff] %v4023_v4 }
  0x6a   : > { %5128 = vst [vmem:[#allocation10_spill] sm:$0xff] %v4025_v7 }
  0x6b   : > { %1085 = vmatmul.bf16.gmra.mxu0 %v3883_v36  ;;  %5129 = vst [vmem:[#allocation11_spill] sm:$0xff] %v4027_v16 }
  0x6c   : > { %1174 = vmatmul.bf16.gmra.mxu1 %v3885_v37 }
  0x6d   : > { %1263 = vmatmul.bf16.gmra.mxu2 %v3887_v38 }
  0x6e   : > { %1352 = vmatmul.bf16.gmra.mxu3 %v3889_v39 }
  0x7b   : > { %1090 = vmatmul.bf16.gmra.mxu0 %v3903_v0 }
  0x7c   : > { %1179 = vmatmul.bf16.gmra.mxu1 %v3905_v1 }
  0x7d   : > { %1268 = vmatmul.bf16.gmra.mxu2 %v3907_v2 }
  0x7e   : > { %1357 = vmatmul.bf16.gmra.mxu3 %v3909_v3 }
  0x8b   : > { %1095 = vmatmul.bf16.gmra.mxu0 %v3923_v28 }
  0x8c   : > { %1184 = vmatmul.bf16.gmra.mxu1 %v3925_v29 }
  0x8d   : > { %1273 = vmatmul.bf16.gmra.mxu2 %v3927_v30 }
  0x8e   : > { %1362 = vmatmul.bf16.gmra.mxu3 %v3929_v31 }
  0x9b   : > { %1100 = vmatmul.bf16.gmra.mxu0 %v3943_v60 }
  0x9c   : > { %1189 = vmatmul.bf16.gmra.mxu1 %v3945_v61 }
  0x9d   : > { %1278 = vmatmul.bf16.gmra.mxu2 %v3947_v62 }
  0x9e   : > { %1367 = vmatmul.bf16.gmra.mxu3 %v3949_v63 }
  0xab   : > { %1105 = vmatmul.bf16.gmra.mxu0 %v3963_v32 }
  0xac   : > { %1194 = vmatmul.bf16.gmra.mxu1 %v3965_v33 }
  0xad   : > { %1283 = vmatmul.bf16.gmra.mxu2 %v3967_v34 }
  0xae   : > { %1372 = vmatmul.bf16.gmra.mxu3 %v3969_v35 }
  0xbb   : > { %1110 = vmatmul.bf16.gmra.mxu0 %v3983_v8 }
  0xbc   : > { %1199 = vmatmul.bf16.gmra.mxu1 %v3985_v9 }
  0xbd   : > { %1288 = vmatmul.bf16.gmra.mxu2 %v3987_v10 }
  0xbe   : > { %1377 = vmatmul.bf16.gmra.mxu3 %v3989_v11 }
  0xc8   : > { %v1076_v49 = vpop.f32.mrf.mxu0 }
  0xc9   : > { %v1165_v56 = vpop.f32.mrf.mxu1 }
  0xca   : > { %v1166_v58 = vadd.f32 %v1165_v56, %v1076_v49  ;;  %v566_v49 = vunpack.c.h.b16 %v336_v25  ;;  %v570_v56 = vunpack.c.h.b16 %v338_v26  ;;  %v256_v25 = vld [vmem:[%s3637_s22 + $0x2a8] sm:$0xff]  ;;  %v253_v26 = vld [vmem:[%s3637_s22 + $0x290] sm:$0xff] }
  0xcb   : > { %1115 = vmatmul.bf16.gmra.mxu0 %v4003_v48 }
  0xcc   : > { %1204 = vmatmul.bf16.gmra.mxu1 %v4005_v50  ;;  %v4029_v18 = vpack.c.b16 %v570_v56, %v566_v49 }
  0xcd   : > { %1293 = vmatmul.bf16.gmra.mxu2 %v4007_v51 }
  0xce   : > { %1382 = vmatmul.bf16.gmra.mxu3 %v4009_v57  ;;  %5130 = vst [vmem:[#allocation12_spill] sm:$0xff] %v4029_v18 }
  0xd0   : > { %v1254_v19 = vpop.f32.mrf.mxu2  ;;  %v1078_v24 = vpop.f32.mrf.mxu0 }
  0xd1   : > { %v1255_v22 = vadd.f32 %v1254_v19, %v1166_v58  ;;  %v1343_v23 = vpop.f32.mrf.mxu3  ;;  %v1167_v27 = vpop.f32.mrf.mxu1 }
  0xd2   : > { %v1168_v41 = vadd.f32 %v1167_v27, %v1078_v24  ;;  %v255_v24 = vld [vmem:[%s3637_s22 + $0x2a0] sm:$0xff]  ;;  %v254_v27 = vld [vmem:[%s3637_s22 + $0x298] sm:$0xff] }
  0xd3   : > { %v1344_v40 = vadd.f32 %v1343_v23, %v1255_v22  ;;  %v252_v22 = vld [vmem:[%s3637_s22 + $0x288] sm:$0xff]  ;;  %v341_v47 = vpack.c.bf16 %v256_v25, %v255_v24 }
  0xd4   : > { %v339_v46 = vpack.c.bf16 %v252_v22, %v251_v21 }
  0xd5   : > { %v1779_v19 = vpack.c.bf16 %v1344_v40, %v1344_v40  ;;  %v576_v57 = vunpack.c.h.b16 %v341_v47 }
  0xd7   : > { %v1859_v43 = vunpack.c.l.b16 %v1779_v19 }
  0xd8   : > { %v1256_v59 = vpop.f32.mrf.mxu2  ;;  %v1081_v6 = vpop.f32.mrf.mxu0 }
  0xd9   : > { %v1257_v58 = vadd.f32 %v1256_v59, %v1168_v41  ;;  %v1345_v5 = vpop.f32.mrf.mxu3  ;;  %v1170_v17 = vpop.f32.mrf.mxu1  ;;  %v257_v41 = vld [vmem:[%s3637_s22 + $0x2b0] sm:$0xff]  ;;  %v340_v59 = vpack.c.bf16 %v254_v27, %v253_v26 }
  0xda   : > { %v1171_v44 = vadd.f32 %v1170_v17, %v1081_v6 }
  0xdb   : > { %v1346_v20 = vadd.f32 %v1345_v5, %v1257_v58  ;;  %1120 = vmatmul.bf16.gmra.mxu0 %v4023_v4  ;;  %v342_v58 = vpack.c.bf16 %v258_v42, %v257_v41  ;;  %v575_v4 = vunpack.c.l.b16 %v341_v47  ;;  %v573_v51 = vunpack.c.l.b16 %v340_v59 }
  0xdc   : > { %1209 = vmatmul.bf16.gmra.mxu1 %v4025_v7  ;;  %v571_v7 = vunpack.c.l.b16 %v339_v46  ;;  %v574_v19 = vunpack.c.h.b16 %v340_v59  ;;  %v3296_v59 = vld [vmem:[%s5079_s1 + $0x174] sm:$0xf] }
  0xdd   : > { %v1780_v23 = vpack.c.bf16 %v1346_v20, %v1346_v20  ;;  %1298 = vmatmul.bf16.gmra.mxu2 %v4027_v16  ;;  %v577_v50 = vunpack.c.l.b16 %v342_v58  ;;  %v578_v6 = vunpack.c.h.b16 %v342_v58  ;;  %v3161_v58 = vld [vmem:[%s5079_s1 + $0x178] sm:$0xf0] }
  0xde   : > { %1387 = vmatmul.bf16.gmra.mxu3 %v4029_v18  ;;  %v572_v18 = vunpack.c.h.b16 %v339_v46  ;;  %v266_v46 = vld [vmem:[%s3637_s22 + $0x2f8] sm:$0xff] }
  0xdf   : > { %v1860_v40 = vunpack.c.l.b16 %v1780_v23  ;;  %v4045_v23 = vpack.c.b16 %v575_v4, %v571_v7  ;;  %v4049_v41 = vpack.c.b16 %v577_v50, %v573_v51  ;;  %v259_v4 = vld [vmem:[%s3637_s22 + $0x2c0] sm:$0xff]  ;;  %v260_v7 = vld [vmem:[%s3637_s22 + $0x2c8] sm:$0xff]  ;;  %v261_v50 = vld [vmem:[%s3637_s22 + $0x2d0] sm:$0xff] }
  0xe0   : > { %v1259_v45 = vpop.f32.mrf.mxu2  ;;  %v1083_v56 = vpop.f32.mrf.mxu0  ;;  %v4047_v27 = vpack.c.b16 %v576_v57, %v572_v18  ;;  %v263_v57 = vld [vmem:[%s3637_s22 + $0x2e0] sm:$0xff]  ;;  %v264_v18 = vld [vmem:[%s3637_s22 + $0x2e8] sm:$0xff]  ;;  %v262_v51 = vld [vmem:[%s3637_s22 + $0x2d8] sm:$0xff] }
  0xe1   : > { %v1348_v49 = vpop.f32.mrf.mxu3  ;;  %v4043_v5 = vpack.c.b16 %v1860_v40, %v1859_v43  ;;  %v1172_v20 = vpop.f32.mrf.mxu1  ;;  %v1260_v16 = vadd.f32 %v1259_v45, %v1171_v44  ;;  %5132 = vst [vmem:[#allocation14_spill] sm:$0xff] %v4045_v23  ;;  %v4051_v43 = vpack.c.b16 %v578_v6, %v574_v19  ;;  %v265_v45 = vld [vmem:[%s3637_s22 + $0x2f0] sm:$0xff]  ;;  %v343_v19 = vpack.c.bf16 %v260_v7, %v259_v4 }
  0xe2   : > { %v1173_v21 = vadd.f32 %v1172_v20, %v1083_v56  ;;  %5133 = vst [vmem:[#allocation15_spill] sm:$0xff] %v4047_v27  ;;  %v345_v6 = vpack.c.bf16 %v264_v18, %v263_v57 }
  0xe3   : > { %5131 = vst [vmem:[#allocation13_spill] sm:$0xff] %v4043_v5  ;;  %v1349_v17 = vadd.f32 %v1348_v49, %v1260_v16 }
  0xe4   : > { %5134 = vst [vmem:[#allocation16_spill] sm:$0xff] %v4049_v41 }
  0xe5   : > { %5135 = vst [vmem:[#allocation17_spill] sm:$0xff] %v4051_v43  ;;  %v1781_v16 = vpack.c.bf16 %v1349_v17, %v1349_v17  ;;  %v3164_v17 = vor.u32 %v3296_v59, %v3161_v58 }
  0xe7   : > { %v1861_v47 = vunpack.c.l.b16 %v1781_v16  ;;  %v346_v16 = vpack.c.bf16 %v266_v46, %v265_v45  ;;  %1601 = vmatpush.bf16.msrb.mxu2 %v3164_v17  ;;  %v3264_v45 = vld [vmem:[%s5079_s1 + $0x74] sm:$0xf] }
  0xe8   : > { %v1261_v22 = vpop.f32.mrf.mxu2  ;;  %v1086_v26 = vpop.f32.mrf.mxu0 }
  0xe9   : > { %v1262_v24 = vadd.f32 %v1261_v22, %v1173_v21  ;;  %v1350_v25 = vpop.f32.mrf.mxu3  ;;  %v1175_v42 = vpop.f32.mrf.mxu1  ;;  %v585_v7 = vunpack.c.l.b16 %v346_v16  ;;  %v586_v18 = vunpack.c.h.b16 %v346_v16 }
  0xea   : > { %v1176_v56 = vadd.f32 %v1175_v42, %v1086_v26  ;;  %v579_v42 = vunpack.c.l.b16 %v343_v19 }
  0xeb   : > { %v1351_v40 = vadd.f32 %v1350_v25, %v1262_v24  ;;  %1125 = vmatmul.bf16.gmra.mxu0 %v4045_v23  ;;  %v344_v25 = vpack.c.bf16 %v262_v51, %v261_v50  ;;  %v3312_v50 = vld [vmem:[%s5079_s1 + $0x1f4] sm:$0xf]  ;;  %v3225_v51 = vld [vmem:[%s5079_s1 + $0x1f8] sm:$0xf0] }
  0xec   : > { %1214 = vmatmul.bf16.gmra.mxu1 %v4047_v27  ;;  %v3228_v58 = vor.u32 %v3312_v50, %v3225_v51  ;;  %v270_v50 = vld [vmem:[%s3637_s22 + $0x318] sm:$0xff] }
  0xed   : > { %v1782_v44 = vpack.c.bf16 %v1351_v40, %v1351_v40  ;;  %1303 = vmatmul.bf16.gmra.mxu2 %v4049_v41  ;;  %v584_v41 = vunpack.c.h.b16 %v345_v6  ;;  %v581_v4 = vunpack.c.l.b16 %v344_v25  ;;  %v582_v57 = vunpack.c.h.b16 %v344_v25  ;;  %v274_v51 = vld [vmem:[%s3637_s22 + $0x338] sm:$0xff] }
  0xee   : > { %1392 = vmatmul.bf16.gmra.mxu3 %v4051_v43  ;;  %v580_v43 = vunpack.c.h.b16 %v343_v19  ;;  %v3280_v19 = vld [vmem:[%s5079_s1 + $0xf4] sm:$0xf] }
  0xef   : > { %v1862_v49 = vunpack.c.l.b16 %v1782_v44  ;;  %v583_v44 = vunpack.c.l.b16 %v345_v6  ;;  %v3097_v6 = vld [vmem:[%s5079_s1 + $0xf8] sm:$0xf0]  ;;  %1690 = vmatpush.bf16.msrb.mxu3 %v3228_v58 }
  0xf0   : > { %v1264_v20 = vpop.f32.mrf.mxu2  ;;  %v1088_v22 = vpop.f32.mrf.mxu0  ;;  %v3100_v25 = vor.u32 %v3280_v19, %v3097_v6 }
  0xf1   : > { %v1353_v21 = vpop.f32.mrf.mxu3  ;;  %v4071_v24 = vpack.c.b16 %v1862_v49, %v1861_v47  ;;  %v1177_v40 = vpop.f32.mrf.mxu1  ;;  %v1265_v26 = vadd.f32 %v1264_v20, %v1176_v56  ;;  %v4084_v49 = vpack.c.b16 %v583_v44, %v579_v42  ;;  %v4086_v56 = vpack.c.b16 %v584_v41, %v580_v43  ;;  %v3033_v20 = vld [vmem:[%s5079_s1 + $0x78] sm:$0xf0]  ;;  %v267_v44 = vld [vmem:[%s3637_s22 + $0x300] sm:$0xff] }
  0xf2   : > { %v1178_v47 = vadd.f32 %v1177_v40, %v1088_v22  ;;  %v4097_v41 = vpack.c.b16 %v585_v7, %v581_v4  ;;  %v3036_v43 = vor.u32 %v3264_v45, %v3033_v20  ;;  %v4099_v40 = vpack.c.b16 %v586_v18, %v582_v57  ;;  %1512 = vmatpush.bf16.msrb.mxu1 %v3100_v25  ;;  %v268_v4 = vld [vmem:[%s3637_s22 + $0x308] sm:$0xff]  ;;  %v269_v18 = vld [vmem:[%s3637_s22 + $0x310] sm:$0xff] }
  0xf3   : > { %5136 = vst [vmem:[#allocation18_spill] sm:$0xff] %v4071_v24  ;;  %2603 = vrot.lane.b32.xlu2 %v4071_v24, %s3552_s29  ;;  %v1354_v59 = vadd.f32 %v1353_v21, %v1265_v26  ;;  %v272_v57 = vld [vmem:[%s3637_s22 + $0x328] sm:$0xff]  ;;  %v347_v19 = vpack.c.bf16 %v268_v4, %v267_v44  ;;  %v348_v25 = vpack.c.bf16 %v270_v50, %v269_v18 }
  0xf4   : > { %5137 = vst [vmem:[#allocation19_spill] sm:$0xff] %v4084_v49  ;;  %1423 = vmatpush.bf16.msrb.mxu0 %v3036_v43 }
  0xf5   : > { %5138 = vst [vmem:[#allocation20_spill] sm:$0xff] %v4086_v56  ;;  %v1783_v26 = vpack.c.bf16 %v1354_v59, %v1354_v59  ;;  %v273_v59 = vld [vmem:[%s3637_s22 + $0x330] sm:$0xff] }
  0xf6   : > { %5139 = vst [vmem:[#allocation21_spill] sm:$0xff] %v4097_v41 }
  0xf7   : > { %5140 = vst [vmem:[#allocation22_spill] sm:$0xff] %v4099_v40  ;;  %v1863_v45 = vunpack.c.l.b16 %v1783_v26 }
  0xf8   : > { %v1266_v46 = vpop.f32.mrf.mxu2  ;;  %v1091_v22 = vpop.f32.mrf.mxu0 }
  0xf9   : > { %v1267_v17 = vadd.f32 %v1266_v46, %v1178_v47  ;;  %v1355_v21 = vpop.f32.mrf.mxu3  ;;  %v1180_v16 = vpop.f32.mrf.mxu1  ;;  %v271_v47 = vld [vmem:[%s3637_s22 + $0x320] sm:$0xff] }
  0xfa   : > { %v1181_v58 = vadd.f32 %v1180_v16, %v1091_v22  ;;  %v349_v6 = vpack.c.bf16 %v272_v57, %v271_v47  ;;  %v590_v16 = vunpack.c.h.b16 %v348_v25 }
  0xfb   : > { %v1356_v42 = vadd.f32 %v1355_v21, %v1267_v17  ;;  %1130 = vmatmul.bf16.gmra.mxu0 %v4084_v49  ;;  %v588_v49 = vunpack.c.h.b16 %v347_v19 }
  0xfc   : > { %1219 = vmatmul.bf16.gmra.mxu1 %v4086_v56  ;;  %v591_v56 = vunpack.c.l.b16 %v349_v6  ;;  %v592_v26 = vunpack.c.h.b16 %v349_v6  ;;  %v280_v6 = vld [vmem:[%s3637_s22 + $0x368] sm:$0xff] }
  0xfd   : > { %v1784_v7 = vpack.c.bf16 %v1356_v42, %v1356_v42  ;;  %1308 = vmatmul.bf16.gmra.mxu2 %v4097_v41  ;;  %v350_v42 = vpack.c.bf16 %v274_v51, %v273_v59 }
  0xfe   : > { %1397 = vmatmul.bf16.gmra.mxu3 %v4099_v40  ;;  %v587_v40 = vunpack.c.l.b16 %v347_v19 }
  0xff   : > { %v1864_v46 = vunpack.c.l.b16 %v1784_v7  ;;  %v589_v7 = vunpack.c.l.b16 %v348_v25  ;;  %v593_v22 = vunpack.c.l.b16 %v350_v42  ;;  %v594_v44 = vunpack.c.h.b16 %v350_v42  ;;  %v281_v25 = vld [vmem:[%s3637_s22 + $0x370] sm:$0xff]  ;;  %v282_v42 = vld [vmem:[%s3637_s22 + $0x378] sm:$0xff] }
 0x100   : > { %v1269_v20 = vpop.f32.mrf.mxu2  ;;  %v1093_v21 = vpop.f32.mrf.mxu0  ;;  %v4117_v18 = vpack.c.b16 %v591_v56, %v587_v40  ;;  %v275_v56 = vld [vmem:[%s3637_s22 + $0x340] sm:$0xff]  ;;  %v276_v40 = vld [vmem:[%s3637_s22 + $0x348] sm:$0xff] }
 0x101   : > { %v1358_v17 = vpop.f32.mrf.mxu3  ;;  %v4113_v43 = vpack.c.b16 %v1864_v46, %v1863_v45  ;;  %v1182_v24 = vpop.f32.mrf.mxu1  ;;  %v1270_v41 = vadd.f32 %v1269_v20, %v1181_v58  ;;  %v4119_v45 = vpack.c.b16 %v592_v26, %v588_v49  ;;  %v4121_v46 = vpack.c.b16 %v593_v22, %v589_v7  ;;  %v279_v49 = vld [vmem:[%s3637_s22 + $0x360] sm:$0xff] }
 0x102   : > { %v1183_v47 = vadd.f32 %v1182_v24, %v1093_v21  ;;  %5142 = vst [vmem:[#allocation24_spill] sm:$0xff] %v4117_v18  ;;  %v4123_v20 = vpack.c.b16 %v594_v44, %v590_v16  ;;  %v278_v21 = vld [vmem:[%s3637_s22 + $0x358] sm:$0xff]  ;;  %v3294_v16 = vld [vmem:[%s5079_s1 + $0x164] sm:$0xf]  ;;  %v3153_v44 = vld [vmem:[%s5079_s1 + $0x168] sm:$0xf0] }
 0x103   : > { %5141 = vst [vmem:[#allocation23_spill] sm:$0xff] %v4113_v43  ;;  %2605 = vrot.lane.b32.xlu0 %v4113_v43, %s3552_s29  ;;  %v1359_v4 = vadd.f32 %v1358_v17, %v1270_v41  ;;  %v277_v17 = vld [vmem:[%s3637_s22 + $0x350] sm:$0xff] }
 0x104   : > { %5143 = vst [vmem:[#allocation25_spill] sm:$0xff] %v4119_v45  ;;  %v352_v43 = vpack.c.bf16 %v278_v21, %v277_v17 }
 0x105   : > { %5144 = vst [vmem:[#allocation26_spill] sm:$0xff] %v4121_v46  ;;  %v1785_v24 = vpack.c.bf16 %v1359_v4, %v1359_v4 }
 0x106   : > { %5145 = vst [vmem:[#allocation27_spill] sm:$0xff] %v4123_v20 }
 0x107   : > { %v1865_v26 = vunpack.c.l.b16 %v1785_v24 }
 0x108   : > { %v1271_v57 = vpop.f32.mrf.mxu2  ;;  %v1096_v51 = vpop.f32.mrf.mxu0 }
 0x109   : > { %v1272_v50 = vadd.f32 %v1271_v57, %v1183_v47  ;;  %v1360_v59 = vpop.f32.mrf.mxu3  ;;  %v1185_v58 = vpop.f32.mrf.mxu1  ;;  %v351_v47 = vpack.c.bf16 %v276_v40, %v275_v56  ;;  %v353_v57 = vpack.c.bf16 %v280_v6, %v279_v49  ;;  %v354_v56 = vpack.c.bf16 %v282_v42, %v281_v25  ;;  %v3025_v49 = vld [vmem:[%s5079_s1 + $0x68] sm:$0xf0]  ;;  %v3278_v6 = vld [vmem:[%s5079_s1 + $0xe4] sm:$0xf]  ;;  %v3260_v42 = vld [vmem:[%s5079_s1 + $0x54] sm:$0xf] }
 0x10a   : > { %v1186_v22 = vadd.f32 %v1185_v58, %v1096_v51  ;;  %v3217_v51 = vld [vmem:[%s5079_s1 + $0x1e8] sm:$0xf0]  ;;  %v3262_v58 = vld [vmem:[%s5079_s1 + $0x64] sm:$0xf] }
 0x10b   : > { %v1361_v41 = vadd.f32 %v1360_v59, %v1272_v50  ;;  %1135 = vmatmul.bf16.gmra.mxu0 %v4117_v18  ;;  %v3156_v50 = vor.u32 %v3294_v16, %v3153_v44  ;;  %v3310_v59 = vld [vmem:[%s5079_s1 + $0x1e4] sm:$0xf]  ;;  %v3089_v16 = vld [vmem:[%s5079_s1 + $0xe8] sm:$0xf0]  ;;  %v595_v17 = vunpack.c.l.b16 %v351_v47  ;;  %v599_v21 = vunpack.c.l.b16 %v353_v57 }
 0x10c   : > { %1224 = vmatmul.bf16.gmra.mxu1 %v4119_v45  ;;  %v3220_v40 = vor.u32 %v3310_v59, %v3217_v51  ;;  %v596_v25 = vunpack.c.h.b16 %v351_v47  ;;  %v597_v59 = vunpack.c.l.b16 %v352_v43  ;;  %v601_v51 = vunpack.c.l.b16 %v354_v56  ;;  %v3292_v47 = vld [vmem:[%s5079_s1 + $0x154] sm:$0xf] }
 0x10d   : > { %v1786_v19 = vpack.c.bf16 %v1361_v41, %v1361_v41  ;;  %1313 = vmatmul.bf16.gmra.mxu2 %v4121_v46  ;;  %v4189_v18 = vpack.c.b16 %v599_v21, %v595_v17  ;;  %v3073_v21 = vld [vmem:[%s5079_s1 + $0xc8] sm:$0xf0] }
 0x10e   : > { %1402 = vmatmul.bf16.gmra.mxu3 %v4123_v20  ;;  %1602 = vmatpush.bf16.msrb.mxu2 %v3156_v50  ;;  %v3028_v20 = vor.u32 %v3262_v58, %v3025_v49  ;;  %v3017_v50 = vld [vmem:[%s5079_s1 + $0x58] sm:$0xf0]  ;;  %v598_v49 = vunpack.c.h.b16 %v352_v43  ;;  %v3258_v43 = vld [vmem:[%s5079_s1 + $0x44] sm:$0xf]  ;;  %v4202_v17 = vpack.c.b16 %v601_v51, %v597_v59 }
 0x10f   : > { %v1866_v7 = vunpack.c.l.b16 %v1786_v19  ;;  %1691 = vmatpush.bf16.msrb.mxu3 %v3220_v40  ;;  %v3020_v58 = vor.u32 %v3260_v42, %v3017_v50  ;;  %v3145_v40 = vld [vmem:[%s5079_s1 + $0x158] sm:$0xf0]  ;;  %5147 = vst [vmem:[#allocation29_spill] sm:$0xff] %v4189_v18  ;;  %v3306_v51 = vld [vmem:[%s5079_s1 + $0x1c4] sm:$0xf] }
 0x110   : > { %v1274_v4 = vpop.f32.mrf.mxu2  ;;  %v1098_v41 = vpop.f32.mrf.mxu0  ;;  %1424 = vmatpush.bf16.msrb.mxu0 %v3028_v20  ;;  %v3081_v20 = vld [vmem:[%s5079_s1 + $0xd8] sm:$0xf0]  ;;  %5149 = vst [vmem:[#allocation31_spill] sm:$0xff] %v4202_v17 }
 0x111   : > { %v1363_v24 = vpop.f32.mrf.mxu3  ;;  %v4152_v19 = vpack.c.b16 %v1866_v7, %v1865_v26  ;;  %v1187_v44 = vpop.f32.mrf.mxu1  ;;  %v3092_v26 = vor.u32 %v3278_v6, %v3089_v16  ;;  %v1275_v7 = vadd.f32 %v1274_v4, %v1186_v22  ;;  %v3276_v22 = vld [vmem:[%s5079_s1 + $0xd4] sm:$0xf]  ;;  %v600_v4 = vunpack.c.h.b16 %v353_v57  ;;  %v3209_v42 = vld [vmem:[%s5079_s1 + $0x1d8] sm:$0xf0] }
 0x112   : > { %v602_v6 = vunpack.c.h.b16 %v354_v56  ;;  %v3084_v16 = vor.u32 %v3276_v22, %v3081_v20  ;;  %v3308_v57 = vld [vmem:[%s5079_s1 + $0x1d4] sm:$0xf]  ;;  %v3009_v56 = vld [vmem:[%s5079_s1 + $0x48] sm:$0xf0]  ;;  %v3274_v22 = vld [vmem:[%s5079_s1 + $0xc4] sm:$0xf] }
 0x113   : > { %5146 = vst [vmem:[#allocation28_spill] sm:$0xff] %v4152_v19  ;;  %2607 = vrot.lane.b32.xlu1 %v4152_v19, %s3552_s29  ;;  %1513 = vmatpush.bf16.msrb.mxu1 %v3092_v26  ;;  %v3148_v26 = vor.u32 %v3292_v47, %v3145_v40  ;;  %v1364_v50 = vadd.f32 %v1363_v24, %v1275_v7  ;;  %v283_v40 = vld [vmem:[%s3637_s22 + $0x380] sm:$0xff] }
 0x114   : > { %v1188_v19 = vadd.f32 %v1187_v44, %v1098_v41  ;;  %v3212_v46 = vor.u32 %v3308_v57, %v3209_v42  ;;  %1425 = vmatpush.bf16.msrb.mxu0 %v3020_v58  ;;  %v4200_v7 = vpack.c.b16 %v600_v4, %v596_v25  ;;  %v4213_v4 = vpack.c.b16 %v602_v6, %v598_v49  ;;  %v3201_v58 = vld [vmem:[%s5079_s1 + $0x1c8] sm:$0xf0]  ;;  %v285_v42 = vld [vmem:[%s3637_s22 + $0x390] sm:$0xff] }
 0x115   : > { %1603 = vmatpush.bf16.msrb.mxu2 %v3148_v26  ;;  %v3012_v59 = vor.u32 %v3258_v43, %v3009_v56  ;;  %v1787_v20 = vpack.c.bf16 %v1364_v50, %v1364_v50  ;;  %v287_v26 = vld [vmem:[%s3637_s22 + $0x3a0] sm:$0xff]  ;;  %v288_v57 = vld [vmem:[%s3637_s22 + $0x3a8] sm:$0xff]  ;;  %v3204_v6 = vor.u32 %v3306_v51, %v3201_v58  ;;  %v286_v43 = vld [vmem:[%s3637_s22 + $0x398] sm:$0xff] }
 0x116   : > { %5148 = vst [vmem:[#allocation30_spill] sm:$0xff] %v4200_v7  ;;  %1692 = vmatpush.bf16.msrb.mxu3 %v3212_v46  ;;  %v3076_v46 = vor.u32 %v3274_v22, %v3073_v21  ;;  %v289_v56 = vld [vmem:[%s3637_s22 + $0x3b0] sm:$0xff]  ;;  %v290_v22 = vld [vmem:[%s3637_s22 + $0x3b8] sm:$0xff] }
 0x117   : > { %1514 = vmatpush.bf16.msrb.mxu1 %v3084_v16  ;;  %5150 = vst [vmem:[#allocation32_spill] sm:$0xff] %v4213_v4  ;;  %v284_v16 = vld [vmem:[%s3637_s22 + $0x388] sm:$0xff]  ;;  %v3256_v21 = vld [vmem:[%s5079_s1 + $0x34] sm:$0xf]  ;;  %v3001_v50 = vld [vmem:[%s5079_s1 + $0x38] sm:$0xf0] }
 0x118   : > { %v1276_v45 = vpop.f32.mrf.mxu2  ;;  %v1101_v44 = vpop.f32.mrf.mxu0  ;;  %1426 = vmatpush.bf16.msrb.mxu0 %v3012_v59  ;;  %v3129_v58 = vld [vmem:[%s5079_s1 + $0x138] sm:$0xf0] }
 0x119   : > { %v1277_v24 = vadd.f32 %v1276_v45, %v1188_v19  ;;  %v1365_v41 = vpop.f32.mrf.mxu3  ;;  %v3290_v45 = vld [vmem:[%s5079_s1 + $0x144] sm:$0xf]  ;;  %v3137_v19 = vld [vmem:[%s5079_s1 + $0x148] sm:$0xf0]  ;;  %v1190_v25 = vpop.f32.mrf.mxu1 }
 0x11a   : > { %v3140_v49 = vor.u32 %v3290_v45, %v3137_v19  ;;  %v3065_v45 = vld [vmem:[%s5079_s1 + $0xb8] sm:$0xf0]  ;;  %v3288_v19 = vld [vmem:[%s5079_s1 + $0x134] sm:$0xf]  ;;  %v1191_v27 = vadd.f32 %v1190_v25, %v1101_v44  ;;  %1693 = vmatpush.bf16.msrb.mxu3 %v3204_v6  ;;  %v3270_v44 = vld [vmem:[%s5079_s1 + $0xa4] sm:$0xf] }
 0x11b   : > { %v1366_v47 = vadd.f32 %v1365_v41, %v1277_v24  ;;  %1140 = vmatmul.bf16.gmra.mxu0 %v4189_v18  ;;  %1515 = vmatpush.bf16.msrb.mxu1 %v3076_v46  ;;  %v3272_v41 = vld [vmem:[%s5079_s1 + $0xb4] sm:$0xf]  ;;  %v3004_v46 = vor.u32 %v3256_v21, %v3001_v50  ;;  %v4257_v21 = vpack.c.bf16 %v284_v16, %v283_v40  ;;  %v3121_v6 = vld [vmem:[%s5079_s1 + $0x128] sm:$0xf0] }
 0x11c   : > { %1229 = vmatmul.bf16.gmra.mxu1 %v4200_v7  ;;  %v3068_v51 = vor.u32 %v3272_v41, %v3065_v45  ;;  %v1867_v7 = vunpack.c.l.b16 %v1787_v20  ;;  %1604 = vmatpush.bf16.msrb.mxu2 %v3140_v49  ;;  %v4259_v50 = vpack.c.bf16 %v288_v57, %v287_v26  ;;  %v3132_v41 = vor.u32 %v3288_v19, %v3129_v58  ;;  %v2993_v20 = vld [vmem:[%s5079_s1 + $0x28] sm:$0xf0]  ;;  %v3286_v49 = vld [vmem:[%s5079_s1 + $0x124] sm:$0xf]  ;;  %v3268_v58 = vld [vmem:[%s5079_s1 + $0x94] sm:$0xf] }
 0x11d   : > { %v1788_v24 = vpack.c.bf16 %v1366_v47, %v1366_v47  ;;  %1318 = vmatmul.bf16.gmra.mxu2 %v4202_v17  ;;  %v3304_v47 = vld [vmem:[%s5079_s1 + $0x1b4] sm:$0xf]  ;;  %v3193_v17 = vld [vmem:[%s5079_s1 + $0x1b8] sm:$0xf0]  ;;  %v356_v26 = vpack.c.bf16 %v286_v43, %v285_v42  ;;  %v358_v57 = vpack.c.bf16 %v290_v22, %v289_v56  ;;  %1427 = vmatpush.bf16.msrb.mxu0 %v3004_v46  ;;  %v603_v56 = vunpack.c.l.b16 %v4257_v21 }
 0x11e   : > { %1407 = vmatmul.bf16.gmra.mxu3 %v4213_v4  ;;  %v3196_v45 = vor.u32 %v3304_v47, %v3193_v17  ;;  %v3254_v4 = vld [vmem:[%s5079_s1 + $0x24] sm:$0xf]  ;;  %v3057_v17 = vld [vmem:[%s5079_s1 + $0xa8] sm:$0xf0]  ;;  %v3124_v43 = vor.u32 %v3286_v49, %v3121_v6  ;;  %v607_v22 = vunpack.c.l.b16 %v4259_v50  ;;  %v3252_v46 = vld [vmem:[%s5079_s1 + $0x14] sm:$0xf]  ;;  %v604_v47 = vunpack.c.h.b16 %v4257_v21 }
 0x11f   : > { %v1868_v18 = vunpack.c.l.b16 %v1788_v24  ;;  %1516 = vmatpush.bf16.msrb.mxu1 %v3068_v51  ;;  %v2996_v19 = vor.u32 %v3254_v4, %v2993_v20  ;;  %v3060_v51 = vor.u32 %v3270_v44, %v3057_v17  ;;  %v3049_v20 = vld [vmem:[%s5079_s1 + $0x98] sm:$0xf0]  ;;  %v3284_v44 = vld [vmem:[%s5079_s1 + $0x114] sm:$0xf]  ;;  %v606_v49 = vunpack.c.h.b16 %v356_v26 }
 0x120   : > { %v1279_v59 = vpop.f32.mrf.mxu2  ;;  %v1103_v40 = vpop.f32.mrf.mxu0  ;;  %1605 = vmatpush.bf16.msrb.mxu2 %v3132_v41  ;;  %1694 = vmatpush.bf16.msrb.mxu3 %v3196_v45  ;;  %v605_v41 = vunpack.c.l.b16 %v356_v26  ;;  %v609_v45 = vunpack.c.l.b16 %v358_v57  ;;  %v3113_v17 = vld [vmem:[%s5079_s1 + $0x118] sm:$0xf0]  ;;  %v610_v6 = vunpack.c.h.b16 %v358_v57  ;;  %v4317_v48 = vpack.c.b16 %v607_v22, %v603_v56  ;;  %v3250_v57 = vld [vmem:[%s5079_s1 + $0x4] sm:$0xf]  ;;  %v3041_v22 = vld [vmem:[%s5079_s1 + $0x88] sm:$0xf0] }
 0x121   : > { %v1368_v25 = vpop.f32.mrf.mxu3  ;;  %v4270_v16 = vpack.c.b16 %v1868_v18, %v1867_v7  ;;  %v1192_v24 = vpop.f32.mrf.mxu1  ;;  %v3302_v18 = vld [vmem:[%s5079_s1 + $0x1a4] sm:$0xf]  ;;  %v3185_v7 = vld [vmem:[%s5079_s1 + $0x1a8] sm:$0xf0]  ;;  %v1280_v42 = vadd.f32 %v1279_v59, %v1191_v27  ;;  %v2985_v27 = vld [vmem:[%s5079_s1 + $0x18] sm:$0xf0]  ;;  %v608_v59 = vunpack.c.h.b16 %v4259_v50  ;;  %1428 = vmatpush.bf16.msrb.mxu0 %v2996_v19  ;;  %v3116_v23 = vor.u32 %v3284_v44, %v3113_v17 }
 0x122   : > { %v3188_v4 = vor.u32 %v3302_v18, %v3185_v7  ;;  %v2988_v21 = vor.u32 %v3252_v46, %v2985_v27  ;;  %v3300_v50 = vld [vmem:[%s5079_s1 + $0x194] sm:$0xf]  ;;  %v3177_v18 = vld [vmem:[%s5079_s1 + $0x198] sm:$0xf0]  ;;  %v2977_v19 = vld [vmem:[%s5079_s1 + $0x8] sm:$0xf0]  ;;  %v4330_v56 = vpack.c.b16 %v609_v45, %v605_v41  ;;  %v4341_v46 = vpack.c.b16 %v610_v6, %v606_v49 }
 0x123   : > { %5151 = vst [vmem:[#allocation33_spill] sm:$0xff] %v4270_v16  ;;  %2609 = vrot.lane.b32.xlu0 %v4270_v16, %s3552_s29  ;;  %1517 = vmatpush.bf16.msrb.mxu1 %v3060_v51  ;;  %v3052_v51 = vor.u32 %v3268_v58, %v3049_v20  ;;  %v1369_v7 = vadd.f32 %v1368_v25, %v1280_v42  ;;  %v3266_v25 = vld [vmem:[%s5079_s1 + $0x84] sm:$0xf]  ;;  %v292_v17 = vld [vmem:[%s3637_s22 + $0x3c8] sm:$0xff] }
 0x124   : > { %v1193_v16 = vadd.f32 %v1192_v24, %v1103_v40  ;;  %1606 = vmatpush.bf16.msrb.mxu2 %v3124_v43  ;;  %1695 = vmatpush.bf16.msrb.mxu3 %v3188_v4  ;;  %v3180_v26 = vor.u32 %v3300_v50, %v3177_v18  ;;  %v4328_v43 = vpack.c.b16 %v608_v59, %v604_v47  ;;  %v3282_v4 = vld [vmem:[%s5079_s1 + $0x104] sm:$0xf]  ;;  %v3169_v47 = vld [vmem:[%s5079_s1 + $0x188] sm:$0xf0]  ;;  %v293_v50 = vld [vmem:[%s3637_s22 + $0x3d0] sm:$0xff] }
 0x125   : > { %5152 = vst [vmem:[#allocation34_spill] sm:$0xff] %v4341_v46  ;;  %1429 = vmatpush.bf16.msrb.mxu0 %v2988_v21  ;;  %v2980_v27 = vor.u32 %v3250_v57, %v2977_v19  ;;  %v3298_v58 = vld [vmem:[%s5079_s1 + $0x184] sm:$0xf]  ;;  %v1789_v59 = vpack.c.bf16 %v1369_v7, %v1369_v7  ;;  %v3044_v45 = vor.u32 %v3266_v25, %v3041_v22  ;;  %v297_v18 = vld [vmem:[%s3637_s22 + $0x3f0] sm:$0xff]  ;;  %v298_v7 = vld [vmem:[%s3637_s22 + $0x3f8] sm:$0xff] }
 0x126   : > { %v291_v44 = vld [vmem:[%s3637_s22 + $0x3c0] sm:$0xff]  ;;  %v3172_v49 = vor.u32 %v3298_v58, %v3169_v47  ;;  %v362_v47 = vpack.c.bf16 %v298_v7, %v297_v18 }
 0x127   : > { %1518 = vmatpush.bf16.msrb.mxu1 %v3052_v51  ;;  %v295_v21 = vld [vmem:[%s3637_s22 + $0x3e0] sm:$0xff]  ;;  %v296_v51 = vld [vmem:[%s3637_s22 + $0x3e8] sm:$0xff]  ;;  %v1869_v57 = vunpack.c.l.b16 %v1789_v59 }
 0x128   : > { %v1281_v5 = vpop.f32.mrf.mxu2  ;;  %v1106_v42 = vpop.f32.mrf.mxu0  ;;  %1607 = vmatpush.bf16.msrb.mxu2 %v3116_v23  ;;  %1696 = vmatpush.bf16.msrb.mxu3 %v3180_v26  ;;  %v294_v23 = vld [vmem:[%s3637_s22 + $0x3d8] sm:$0xff]  ;;  %s2970_s22 = sshll.u32 %s2960_s13, 1 }
 0x129   : > { %v1282_v40 = vadd.f32 %v1281_v5, %v1193_v16  ;;  %v1370_v24 = vpop.f32.mrf.mxu3  ;;  %v3105_v5 = vld [vmem:[%s5079_s1 + $0x108] sm:$0xf0]  ;;  %v1195_v16 = vpop.f32.mrf.mxu1  ;;  %1430 = vmatpush.bf16.msrb.mxu0 %v2980_v27  ;;  %v360_v58 = vpack.c.bf16 %v294_v23, %v293_v50  ;;  %p165_p6 = scmp.lt.s32.totalorder %s2970_s22, 3 }
 0x12a   : > { %v3108_v20 = vor.u32 %v3282_v4, %v3105_v5  ;;  %v1196_v25 = vadd.f32 %v1195_v16, %v1106_v42 }
 0x12b   : > { %v1371_v41 = vadd.f32 %v1370_v24, %v1282_v40  ;;  %1145 = vmatmul.bf16.gmra.mxu0 %v4317_v48  ;;  %1519 = vmatpush.bf16.msrb.mxu1 %v3044_v45  ;;  %v359_v40 = vpack.c.bf16 %v292_v17, %v291_v44  ;;  %v361_v24 = vpack.c.bf16 %v296_v51, %v295_v21  ;;  %v613_v45 = vunpack.c.l.b16 %v360_v58  ;;  %s5211_s22 = smov (!%p165_p6, %s2970_s22), 3 }
 0x12c   : > { %1234 = vmatmul.bf16.gmra.mxu1 %v4328_v43  ;;  %1608 = vmatpush.bf16.msrb.mxu2 %v3108_v20  ;;  %v617_v20 = vunpack.c.l.b16 %v362_v47  ;;  %v614_v44 = vunpack.c.h.b16 %v360_v58  ;;  %v618_v17 = vunpack.c.h.b16 %v362_v47  ;;  %s3249_s12 = sshll.u32 %s5211_s22, 7 }
 0x12d   : > { %v1790_v6 = vpack.c.bf16 %v1371_v41, %v1371_v41  ;;  %1323 = vmatmul.bf16.gmra.mxu2 %v4330_v56  ;;  %1697 = vmatpush.bf16.msrb.mxu3 %v3172_v49  ;;  %v611_v27 = vunpack.c.l.b16 %v359_v40  ;;  %v615_v59 = vunpack.c.l.b16 %v361_v24  ;;  %v612_v42 = vunpack.c.h.b16 %v359_v40  ;;  %s4966_s5 = scalar_lea.vmem %s5080_s2, %s3249_s12 }
 0x12e   : > { %1412 = vmatmul.bf16.gmra.mxu3 %v4341_v46  ;;  %v616_v16 = vunpack.c.h.b16 %v361_v24 }
 0x12f   : > { %v1870_v19 = vunpack.c.l.b16 %v1790_v6  ;;  %v4365_v51 = vpack.c.b16 %v615_v59, %v611_v27 }
 0x130   : > { %v1284_v26 = vpop.f32.mrf.mxu2  ;;  %v1108_v4 = vpop.f32.mrf.mxu0  ;;  %v4367_v7 = vpack.c.b16 %v616_v16, %v612_v42 }
 0x131   : > { %v1373_v22 = vpop.f32.mrf.mxu3  ;;  %v4361_v5 = vpack.c.b16 %v1870_v19, %v1869_v57  ;;  %v1197_v41 = vpop.f32.mrf.mxu1  ;;  %v1285_v46 = vadd.f32 %v1284_v26, %v1196_v25  ;;  %v4369_v57 = vpack.c.b16 %v617_v20, %v613_v45  ;;  %v4371_v25 = vpack.c.b16 %v618_v17, %v614_v44 }
 0x132   : > { %v1198_v6 = vadd.f32 %v1197_v41, %v1108_v4 }
 0x133   : > { %2611 = vrot.lane.b32.xlu2 %v4361_v5, %s3552_s29  ;;  %v1374_v49 = vadd.f32 %v1373_v22, %v1285_v46 }
 0x135   : > { %v1791_v26 = vpack.c.bf16 %v1374_v49, %v1374_v49 }
 0x137   : > { %v1871_v46 = vunpack.c.l.b16 %v1791_v26 }
 0x138   : > { %v1286_v21 = vpop.f32.mrf.mxu2  ;;  %v1111_v18 = vpop.f32.mrf.mxu0 }
 0x139   : > { %v1287_v50 = vadd.f32 %v1286_v21, %v1198_v6  ;;  %v1375_v23 = vpop.f32.mrf.mxu3  ;;  %v1200_v19 = vpop.f32.mrf.mxu1 }
 0x13a   : > { %v1201_v4 = vadd.f32 %v1200_v19, %v1111_v18 }
 0x13b   : > { %v1376_v40 = vadd.f32 %v1375_v23, %v1287_v50  ;;  %1150 = vmatmul.bf16.gmra.mxu0 %v4365_v51 }
 0x13c   : > { %1239 = vmatmul.bf16.gmra.mxu1 %v4367_v7 }
 0x13d   : > { %v1792_v24 = vpack.c.bf16 %v1376_v40, %v1376_v40  ;;  %1328 = vmatmul.bf16.gmra.mxu2 %v4369_v57 }
 0x13e   : > { %1417 = vmatmul.bf16.gmra.mxu3 %v4371_v25 }
 0x13f   : > { %v1872_v22 = vunpack.c.l.b16 %v1792_v24 }
 0x140   : > { %v1289_v58 = vpop.f32.mrf.mxu2  ;;  %v1113_v41 = vpop.f32.mrf.mxu0 }
 0x141   : > { %v1378_v47 = vpop.f32.mrf.mxu3  ;;  %v4377_v27 = vpack.c.b16 %v1872_v22, %v1871_v46  ;;  %v1202_v59 = vpop.f32.mrf.mxu1  ;;  %v1290_v42 = vadd.f32 %v1289_v58, %v1201_v4 }
 0x142   : > { %v1203_v45 = vadd.f32 %v1202_v59, %v1113_v41 }
 0x143   : > { %2613 = vrot.lane.b32.xlu1 %v4377_v27, %s3552_s29  ;;  %v1379_v16 = vadd.f32 %v1378_v47, %v1290_v42 }
 0x145   : > { %v1793_v21 = vpack.c.bf16 %v1379_v16, %v1379_v16 }
 0x147   : > { %v1873_v19 = vunpack.c.l.b16 %v1793_v21 }
 0x148   : > { %v1291_v20 = vpop.f32.mrf.mxu2  ;;  %v1116_v49 = vpop.f32.mrf.mxu0 }
 0x149   : > { %v1292_v44 = vadd.f32 %v1291_v20, %v1203_v45  ;;  %v1380_v17 = vpop.f32.mrf.mxu3  ;;  %v1205_v6 = vpop.f32.mrf.mxu1 }
 0x14a   : > { %v1206_v23 = vadd.f32 %v1205_v6, %v1116_v49 }
 0x14b   : > { %v1381_v50 = vadd.f32 %v1380_v17, %v1292_v44  ;;  %1431 = vmatmul.bf16.vlgmr.msrb.gmra.mxu0 %v3843_v52 }
 0x14c   : > { %1520 = vmatmul.bf16.vlgmr.msrb.gmra.mxu1 %v3845_v53 }
 0x14d   : > { %v1794_v18 = vpack.c.bf16 %v1381_v50, %v1381_v50  ;;  %1609 = vmatmul.bf16.vlgmr.msrb.gmra.mxu2 %v3847_v54 }
 0x14e   : > { %1698 = vmatmul.bf16.vlgmr.msrb.gmra.mxu3 %v3849_v55 }
 0x14f   : > { %v1874_v26 = vunpack.c.l.b16 %v1794_v18 }
 0x150   : > { %v1294_v40 = vpop.f32.mrf.mxu2  ;;  %v1118_v22 = vpop.f32.mrf.mxu0 }
 0x151   : > { %v1295_v24 = vadd.f32 %v1294_v40, %v1206_v23  ;;  %v1383_v46 = vpop.f32.mrf.mxu3  ;;  %v4385_v4 = vpack.c.b16 %v1874_v26, %v1873_v19  ;;  %v1207_v58 = vpop.f32.mrf.mxu1 }
 0x152   : > { %v1208_v41 = vadd.f32 %v1207_v58, %v1118_v22 }
 0x153   : > { %5153 = vst [vmem:[#allocation35_spill] sm:$0xff] %v4385_v4  ;;  %v1384_v47 = vadd.f32 %v1383_v46, %v1295_v24  ;;  %2615 = vrot.lane.b32.xlu0 %v4385_v4, %s3552_s29 }
 0x155   : > { %v1795_v55 = vpack.c.bf16 %v1384_v47, %v1384_v47 }
 0x157   : > { %v2037_v44 = vunpack.c.l.b16 %v1795_v55 }
 0x158   : > { %v1296_v52 = vpop.f32.mrf.mxu2  ;;  %v1121_v54 = vpop.f32.mrf.mxu0 }
 0x159   : > { %v1297_v53 = vadd.f32 %v1296_v52, %v1208_v41  ;;  %v1385_v59 = vpop.f32.mrf.mxu3  ;;  %v1210_v42 = vpop.f32.mrf.mxu1 }
 0x15a   : > { %v1211_v45 = vadd.f32 %v1210_v42, %v1121_v54 }
 0x15b   : > { %v1386_v16 = vadd.f32 %v1385_v59, %v1297_v53  ;;  %1436 = vmatmul.bf16.gmra.mxu0 %v3863_v12 }
 0x15c   : > { %1525 = vmatmul.bf16.gmra.mxu1 %v3865_v13 }
 0x15d   : > { %v1796_v20 = vpack.c.bf16 %v1386_v16, %v1386_v16  ;;  %1614 = vmatmul.bf16.gmra.mxu2 %v3867_v14 }
 0x15e   : > { %1703 = vmatmul.bf16.gmra.mxu3 %v3869_v15 }
 0x15f   : > { %v2038_v17 = vunpack.c.l.b16 %v1796_v20 }
 0x160   : > { %v1299_v49 = vpop.f32.mrf.mxu2  ;;  %v1123_v23 = vpop.f32.mrf.mxu0 }
 0x161   : > { %v4393_v6 = vpack.c.b16 %v2038_v17, %v2037_v44  ;;  %v1300_v21 = vadd.f32 %v1299_v49, %v1211_v45  ;;  %v1388_v50 = vpop.f32.mrf.mxu3  ;;  %v1212_v18 = vpop.f32.mrf.mxu1 }
 0x162   : > { %v1213_v26 = vadd.f32 %v1212_v18, %v1123_v23 }
 0x163   : > { %5154 = vst [vmem:[#allocation36_spill] sm:$0xff] %v4393_v6  ;;  %v1389_v19 = vadd.f32 %v1388_v50, %v1300_v21 }
 0x165   : > { %v1797_v22 = vpack.c.bf16 %v1389_v19, %v1389_v19 }
 0x167   : > { %v2039_v58 = vunpack.c.l.b16 %v1797_v22 }
 0x168   : > { %v1301_v40 = vpop.f32.mrf.mxu2  ;;  %v1126_v46 = vpop.f32.mrf.mxu0 }
 0x169   : > { %v1302_v12 = vadd.f32 %v1301_v40, %v1213_v26  ;;  %v1390_v24 = vpop.f32.mrf.mxu3  ;;  %v1215_v13 = vpop.f32.mrf.mxu1 }
 0x16a   : > { %v1216_v41 = vadd.f32 %v1215_v13, %v1126_v46 }
 0x16b   : > { %v1391_v14 = vadd.f32 %v1390_v24, %v1302_v12  ;;  %1441 = vmatmul.bf16.gmra.mxu0 %v3883_v36 }
 0x16c   : > { %1530 = vmatmul.bf16.gmra.mxu1 %v3885_v37 }
 0x16d   : > { %v1798_v15 = vpack.c.bf16 %v1391_v14, %v1391_v14  ;;  %1619 = vmatmul.bf16.gmra.mxu2 %v3887_v38 }
 0x16e   : > { %1708 = vmatmul.bf16.gmra.mxu3 %v3889_v39 }
 0x16f   : > { %v2040_v47 = vunpack.c.l.b16 %v1798_v15 }
 0x170   : > { %v1304_v52 = vpop.f32.mrf.mxu2  ;;  %v1128_v54 = vpop.f32.mrf.mxu0 }
 0x171   : > { %v4399_v53 = vpack.c.b16 %v2040_v47, %v2039_v58  ;;  %v1393_v59 = vpop.f32.mrf.mxu3  ;;  %v1217_v42 = vpop.f32.mrf.mxu1  ;;  %v1305_v55 = vadd.f32 %v1304_v52, %v1216_v41 }
 0x172   : > { %v1218_v45 = vadd.f32 %v1217_v42, %v1128_v54 }
 0x173   : > { %5155 = vst [vmem:[#allocation37_spill] sm:$0xff] %v4399_v53  ;;  %v1394_v16 = vadd.f32 %v1393_v59, %v1305_v55 }
 0x175   : > { %v1799_v38 = vpack.c.bf16 %v1394_v16, %v1394_v16 }
 0x177   : > { %v2041_v21 = vunpack.c.l.b16 %v1799_v38 }
 0x178   : > { %v1306_v36 = vpop.f32.mrf.mxu2  ;;  %v1131_v37 = vpop.f32.mrf.mxu0 }
 0x179   : > { %v1307_v20 = vadd.f32 %v1306_v36, %v1218_v45  ;;  %v1395_v44 = vpop.f32.mrf.mxu3  ;;  %v1220_v17 = vpop.f32.mrf.mxu1 }
 0x17a   : > { %v1221_v23 = vadd.f32 %v1220_v17, %v1131_v37 }
 0x17b   : > { %v1396_v49 = vadd.f32 %v1395_v44, %v1307_v20  ;;  %1446 = vmatmul.bf16.gmra.mxu0 %v3903_v0 }
 0x17c   : > { %1535 = vmatmul.bf16.gmra.mxu1 %v3905_v1 }
 0x17d   : > { %v1800_v39 = vpack.c.bf16 %v1396_v49, %v1396_v49  ;;  %1624 = vmatmul.bf16.gmra.mxu2 %v3907_v2 }
 0x17e   : > { %1713 = vmatmul.bf16.gmra.mxu3 %v3909_v3 }
 0x17f   : > { %v2042_v50 = vunpack.c.l.b16 %v1800_v39 }
 0x180   : > { %v1309_v18 = vpop.f32.mrf.mxu2  ;;  %v1133_v26 = vpop.f32.mrf.mxu0 }
 0x181   : > { %v1398_v19 = vpop.f32.mrf.mxu3  ;;  %v4405_v40 = vpack.c.b16 %v2042_v50, %v2041_v21  ;;  %v1222_v12 = vpop.f32.mrf.mxu1  ;;  %v1310_v24 = vadd.f32 %v1309_v18, %v1221_v23 }
 0x182   : > { %v1223_v46 = vadd.f32 %v1222_v12, %v1133_v26 }
 0x183   : > { %5156 = vst [vmem:[#allocation38_spill] sm:$0xff] %v4405_v40  ;;  %2726 = vrot.lane.b32.xlu1 %v4405_v40, %s3552_s29  ;;  %v1399_v0 = vadd.f32 %v1398_v19, %v1310_v24 }
 0x185   : > { %v1801_v14 = vpack.c.bf16 %v1399_v0, %v1399_v0 }
 0x187   : > { %v2043_v47 = vunpack.c.l.b16 %v1801_v14 }
 0x188   : > { %v1311_v1 = vpop.f32.mrf.mxu2  ;;  %v1136_v22 = vpop.f32.mrf.mxu0 }
 0x189   : > { %v1312_v13 = vadd.f32 %v1311_v1, %v1223_v46  ;;  %v1400_v2 = vpop.f32.mrf.mxu3  ;;  %v1225_v3 = vpop.f32.mrf.mxu1 }
 0x18a   : > { %v1226_v52 = vadd.f32 %v1225_v3, %v1136_v22 }
 0x18b   : > { %v1401_v15 = vadd.f32 %v1400_v2, %v1312_v13  ;;  %1451 = vmatmul.bf16.gmra.mxu0 %v3923_v28 }
 0x18c   : > { %1540 = vmatmul.bf16.gmra.mxu1 %v3925_v29 }
 0x18d   : > { %v1802_v58 = vpack.c.bf16 %v1401_v15, %v1401_v15  ;;  %1629 = vmatmul.bf16.gmra.mxu2 %v3927_v30 }
 0x18e   : > { %1718 = vmatmul.bf16.gmra.mxu3 %v3929_v31 }
 0x18f   : > { %v2044_v41 = vunpack.c.l.b16 %v1802_v58 }
 0x190   : > { %v1314_v59 = vpop.f32.mrf.mxu2  ;;  %v1138_v42 = vpop.f32.mrf.mxu0 }
 0x191   : > { %v1403_v54 = vpop.f32.mrf.mxu3  ;;  %v4413_v55 = vpack.c.b16 %v2044_v41, %v2043_v47  ;;  %v1227_v16 = vpop.f32.mrf.mxu1  ;;  %v1315_v45 = vadd.f32 %v1314_v59, %v1226_v52 }
 0x192   : > { %v1228_v36 = vadd.f32 %v1227_v16, %v1138_v42 }
 0x193   : > { %5157 = vst [vmem:[#allocation39_spill] sm:$0xff] %v4413_v55  ;;  %2728 = vrot.lane.b32.xlu2 %v4413_v55, %s3552_s29  ;;  %v1404_v28 = vadd.f32 %v1403_v54, %v1315_v45 }
 0x195   : > { %v1803_v37 = vpack.c.bf16 %v1404_v28, %v1404_v28 }
 0x197   : > { %v2045_v49 = vunpack.c.l.b16 %v1803_v37  ;;  %v2608_v37 = vpop.permute.xlu1 %2607 }
 0x198   : > { %v1316_v29 = vpop.f32.mrf.mxu2  ;;  %v1141_v44 = vpop.f32.mrf.mxu0 }
 0x199   : > { %v1317_v20 = vadd.f32 %v1316_v29, %v1228_v36  ;;  %v1405_v30 = vpop.f32.mrf.mxu3  ;;  %v1230_v31 = vpop.f32.mrf.mxu1 }
 0x19a   : > { %v1231_v21 = vadd.f32 %v1230_v31, %v1141_v44 }
 0x19b   : > { %v1406_v17 = vadd.f32 %v1405_v30, %v1317_v20  ;;  %1456 = vmatmul.bf16.gmra.mxu0 %v3943_v60 }
 0x19c   : > { %1545 = vmatmul.bf16.gmra.mxu1 %v3945_v61 }
 0x19d   : > { %v1804_v38 = vpack.c.bf16 %v1406_v17, %v1406_v17  ;;  %1634 = vmatmul.bf16.gmra.mxu2 %v3947_v62 }
 0x19e   : > { %1723 = vmatmul.bf16.gmra.mxu3 %v3949_v63 }
 0x19f   : > { %v2046_v39 = vunpack.c.l.b16 %v1804_v38 }
 0x1a0   : > { %v1319_v50 = vpop.f32.mrf.mxu2  ;;  %v1143_v18 = vpop.f32.mrf.mxu0 }
 0x1a1   : > { %v1408_v23 = vpop.f32.mrf.mxu3  ;;  %v4421_v19 = vpack.c.b16 %v2046_v39, %v2045_v49  ;;  %v1232_v26 = vpop.f32.mrf.mxu1  ;;  %v1320_v12 = vadd.f32 %v1319_v50, %v1231_v21 }
 0x1a2   : > { %v1233_v24 = vadd.f32 %v1232_v26, %v1143_v18 }
 0x1a3   : > { %5158 = vst [vmem:[#allocation40_spill] sm:$0xff] %v4421_v19  ;;  %2730 = vrot.lane.b32.xlu0 %v4421_v19, %s3552_s29  ;;  %v1409_v60 = vadd.f32 %v1408_v23, %v1320_v12 }
 0x1a5   : > { %v1805_v1 = vpack.c.bf16 %v1409_v60, %v1409_v60 }
 0x1a7   : > { %v2047_v22 = vunpack.c.l.b16 %v1805_v1 }
 0x1a8   : > { %v1321_v61 = vpop.f32.mrf.mxu2  ;;  %v1146_v46 = vpop.f32.mrf.mxu0 }
 0x1a9   : > { %v1322_v0 = vadd.f32 %v1321_v61, %v1233_v24  ;;  %v1410_v62 = vpop.f32.mrf.mxu3  ;;  %v1235_v63 = vpop.f32.mrf.mxu1 }
 0x1aa   : > { %v1236_v14 = vadd.f32 %v1235_v63, %v1146_v46  ;;  %v5161_v46 = vld [vmem:[#allocation5_spill] sm:$0xff] }
 0x1ab   : > { %v1411_v13 = vadd.f32 %v1410_v62, %v1322_v0  ;;  %1461 = vmatmul.bf16.gmra.mxu0 %v3963_v32  ;;  %v4433_v32 = vpop.permute.xlu0 %2605 }
 0x1ac   : > { %1550 = vmatmul.bf16.gmra.mxu1 %v3965_v33 }
 0x1ad   : > { %v1806_v2 = vpack.c.bf16 %v1411_v13, %v1411_v13  ;;  %1639 = vmatmul.bf16.gmra.mxu2 %v3967_v34  ;;  %v5162_v13 = vld [vmem:[#allocation6_spill] sm:$0xff] }
 0x1ae   : > { %1728 = vmatmul.bf16.gmra.mxu3 %v3969_v35 }
 0x1af   : > { %v2048_v3 = vunpack.c.l.b16 %v1806_v2  ;;  %v5163_v2 = vld [vmem:[#allocation7_spill] sm:$0xff] }
 0x1b0   : > { %v1324_v15 = vpop.f32.mrf.mxu2  ;;  %v1148_v47 = vpop.f32.mrf.mxu0 }
 0x1b1   : > { %v1413_v58 = vpop.f32.mrf.mxu3  ;;  %v4429_v41 = vpack.c.b16 %v2048_v3, %v2047_v22  ;;  %v1237_v52 = vpop.f32.mrf.mxu1  ;;  %v1325_v59 = vadd.f32 %v1324_v15, %v1236_v14  ;;  %v5164_v22 = vld [vmem:[#allocation8_spill] sm:$0xff] }
 0x1b2   : > { %v1238_v54 = vadd.f32 %v1237_v52, %v1148_v47 }
 0x1b3   : > { %5159 = vst [vmem:[#allocation41_spill] sm:$0xff] %v4429_v41  ;;  %2732 = vrot.lane.b32.xlu2 %v4429_v41, %s3552_s29  ;;  %v1414_v33 = vadd.f32 %v1413_v58, %v1325_v59  ;;  %v2610_v29 = vpop.permute.xlu0 %2609 }
 0x1b5   : > { %v1807_v28 = vpack.c.bf16 %v1414_v33, %v1414_v33 }
 0x1b7   : > { %v2049_v30 = vunpack.c.l.b16 %v1807_v28 }
 0x1b8   : > { %v1326_v34 = vpop.f32.mrf.mxu2  ;;  %v1151_v16 = vpop.f32.mrf.mxu0 }
 0x1b9   : > { %v1327_v42 = vadd.f32 %v1326_v34, %v1238_v54  ;;  %v1415_v35 = vpop.f32.mrf.mxu3  ;;  %v1240_v45 = vpop.f32.mrf.mxu1 }
 0x1ba   : > { %v1241_v31 = vadd.f32 %v1240_v45, %v1151_v16 }
 0x1bb   : > { %v1416_v36 = vadd.f32 %v1415_v35, %v1327_v42  ;;  %1466 = vmatmul.bf16.gmra.mxu0 %v3983_v8  ;;  %v2604_v8 = vpop.permute.xlu2 %2603 }
 0x1bc   : > { %1555 = vmatmul.bf16.gmra.mxu1 %v3985_v9 }
 0x1bd   : > { %v1808_v20 = vpack.c.bf16 %v1416_v36, %v1416_v36  ;;  %1644 = vmatmul.bf16.gmra.mxu2 %v3987_v10 }
 0x1be   : > { %1733 = vmatmul.bf16.gmra.mxu3 %v3989_v11  ;;  %v2614_v11 = vpop.permute.xlu1 %2613 }
 0x1bf   : > { %v2050_v44 = vunpack.c.l.b16 %v1808_v20 }
 0x1c0   : > { %v1329_v17 = vpop.f32.mrf.mxu2  ;;  %v1153_v49 = vpop.f32.mrf.mxu0 }
 0x1c1   : > { %v1418_v38 = vpop.f32.mrf.mxu3  ;;  %v4439_v39 = vpack.c.b16 %v2050_v44, %v2049_v30  ;;  %v1242_v21 = vpop.f32.mrf.mxu1  ;;  %v1330_v50 = vadd.f32 %v1329_v17, %v1241_v31  ;;  %v5166_v44 = vld [vmem:[#allocation13_spill] sm:$0xff]  ;;  %v5168_v17 = vld [vmem:[#allocation10_spill] sm:$0xff] }
 0x1c2   : > { %v1243_v23 = vadd.f32 %v1242_v21, %v1153_v49 }
 0x1c3   : > { %5160 = vst [vmem:[#allocation42_spill] sm:$0xff] %v4439_v39  ;;  %2734 = vrot.lane.b32.xlu1 %v4439_v39, %s3552_s29  ;;  %v1419_v10 = vadd.f32 %v1418_v38, %v1330_v50  ;;  %v2612_v63 = vpop.permute.xlu2 %2611  ;;  %v5169_v38 = vld [vmem:[#allocation11_spill] sm:$0xff] }
 0x1c5   : > { %v2616_v9 = vpop.permute.xlu0 %2615  ;;  %v1809_v61 = vpack.c.bf16 %v1419_v10, %v1419_v10 }
 0x1c6   : > { %2625 = vmatpush.bf16.msra.mxu2 %v2616_v9 }
 0x1c7   : > { %v2051_v3 = vunpack.c.l.b16 %v1809_v61 }
 0x1c8   : > { %v1331_v18 = vpop.f32.mrf.mxu2  ;;  %v1432_v60 = vpop.f32.mrf.mxu0 }
 0x1c9   : > { %v1332_v26 = vadd.f32 %v1331_v18, %v1243_v23  ;;  %v1420_v12 = vpop.f32.mrf.mxu3  ;;  %v1521_v24 = vpop.f32.mrf.mxu1 }
 0x1ca   : > { %2626 = vmatpush.bf16.msra.mxu2 %v2614_v11  ;;  %v1522_v62 = vadd.f32 %v1521_v24, %v1432_v60 }
 0x1cb   : > { %v1421_v0 = vadd.f32 %v1420_v12, %v1332_v26  ;;  %1471 = vmatmul.bf16.gmra.mxu0 %v5161_v46 }
 0x1cc   : > { %1560 = vmatmul.bf16.gmra.mxu1 %v5162_v13  ;;  %v5172_v13 = vld [vmem:[#allocation15_spill] sm:$0xff] }
 0x1cd   : > { %v1810_v1 = vpack.c.bf16 %v1421_v0, %v1421_v0  ;;  %1649 = vmatmul.bf16.gmra.mxu2 %v5163_v2  ;;  %v5173_v2 = vld [vmem:[#allocation16_spill] sm:$0xff] }
 0x1ce   : > { %1738 = vmatmul.bf16.gmra.mxu3 %v5164_v22  ;;  %2627 = vmatpush.bf16.msra.mxu2 %v2612_v63  ;;  %v5171_v63 = vld [vmem:[#allocation14_spill] sm:$0xff]  ;;  %v5174_v22 = vld [vmem:[#allocation17_spill] sm:$0xff] }
 0x1cf   : > { %v2052_v14 = vunpack.c.l.b16 %v1810_v1 }
 0x1d0   : > { %v1610_v15 = vpop.f32.mrf.mxu2  ;;  %v1434_v52 = vpop.f32.mrf.mxu0 }
 0x1d1   : > { %v1611_v58 = vadd.f32 %v1610_v15, %v1522_v62  ;;  %v1699_v47 = vpop.f32.mrf.mxu3  ;;  %v4447_v59 = vpack.c.b16 %v2052_v14, %v2051_v3  ;;  %v1523_v33 = vpop.f32.mrf.mxu1 }
 0x1d2   : > { %2628 = vmatpush.bf16.msra.mxu2 %v2610_v29  ;;  %v1524_v34 = vadd.f32 %v1523_v33, %v1434_v52  ;;  %v5167_v29 = vld [vmem:[#allocation9_spill] sm:$0xff] }
 0x1d3   : > { %5165 = vst [vmem:[#allocation5_spill] sm:$0xff] %v4447_v59  ;;  %v1700_v54 = vadd.f32 %v1699_v47, %v1611_v58  ;;  %2736 = vrot.lane.b32.xlu0 %v4447_v59, %s3552_s29 }
 0x1d5   : > { %v1811_v36 = vpack.c.bf16 %v1700_v54, %v1700_v54 }
 0x1d6   : > { %2629 = vmatpush.bf16.msra.mxu2 %v2608_v37  ;;  %v5170_v37 = vld [vmem:[#allocation12_spill] sm:$0xff] }
 0x1d7   : > { %v4458_v49 = vunpack.c.l.b16 %v1811_v36 }
 0x1d8   : > { %v1612_v42 = vpop.f32.mrf.mxu2  ;;  %v1437_v45 = vpop.f32.mrf.mxu0 }
 0x1d9   : > { %v1613_v35 = vadd.f32 %v1612_v42, %v1524_v34  ;;  %v1701_v16 = vpop.f32.mrf.mxu3  ;;  %v1526_v28 = vpop.f32.mrf.mxu1 }
 0x1da   : > { %2630 = vmatpush.bf16.msra.mxu2 %v4433_v32  ;;  %v1527_v30 = vadd.f32 %v1526_v28, %v1437_v45 }
 0x1db   : > { %v1702_v20 = vadd.f32 %v1701_v16, %v1613_v35  ;;  %2601 = vrot.lane.b32.xlu0 %v5166_v44, %s3552_s29  ;;  %1476 = vmatmul.bf16.gmra.mxu0 %v5167_v29 }
 0x1dc   : > { %1565 = vmatmul.bf16.gmra.mxu1 %v5168_v17 }
 0x1dd   : > { %v1812_v31 = vpack.c.bf16 %v1702_v20, %v1702_v20  ;;  %1654 = vmatmul.bf16.gmra.mxu2 %v5169_v38  ;;  %v5176_v38 = vld [vmem:[#allocation20_spill] sm:$0xff] }
 0x1de   : > { %1743 = vmatmul.bf16.gmra.mxu3 %v5170_v37  ;;  %2631 = vmatpush.bf16.msra.mxu2 %v2604_v8  ;;  %v5177_v37 = vld [vmem:[#allocation21_spill] sm:$0xff] }
 0x1df   : > { %v4460_v21 = vunpack.c.l.b16 %v1812_v31  ;;  %v5175_v31 = vld [vmem:[#allocation19_spill] sm:$0xff] }
 0x1e0   : > { %v1615_v32 = vpop.f32.mrf.mxu2  ;;  %v1439_v10 = vpop.f32.mrf.mxu0 }
 0x1e1   : > { %v1616_v50 = vadd.f32 %v1615_v32, %v1527_v30  ;;  %v1704_v9 = vpop.f32.mrf.mxu3  ;;  %v1528_v11 = vpop.f32.mrf.mxu1  ;;  %v5178_v32 = vld [vmem:[#allocation22_spill] sm:$0xff] }
 0x1e2   : > { %v1529_v26 = vadd.f32 %v1528_v11, %v1439_v10 }
 0x1e3   : > { %v1705_v18 = vadd.f32 %v1704_v9, %v1616_v50 }
 0x1e5   : > { %v1813_v8 = vpack.c.bf16 %v1705_v18, %v1705_v18 }
 0x1e7   : > { %v4468_v3 = vunpack.c.l.b16 %v1813_v8 }
 0x1e8   : > { %v1617_v12 = vpop.f32.mrf.mxu2  ;;  %v1442_v61 = vpop.f32.mrf.mxu0 }
 0x1e9   : > { %v1618_v60 = vadd.f32 %v1617_v12, %v1529_v26  ;;  %v1706_v24 = vpop.f32.mrf.mxu3  ;;  %v1531_v0 = vpop.f32.mrf.mxu1 }
 0x1ea   : > { %v1532_v46 = vadd.f32 %v1531_v0, %v1442_v61 }
 0x1eb   : > { %v1707_v62 = vadd.f32 %v1706_v24, %v1618_v60  ;;  %1481 = vmatmul.bf16.gmra.mxu0 %v5171_v63 }
 0x1ec   : > { %1570 = vmatmul.bf16.gmra.mxu1 %v5172_v13 }
 0x1ed   : > { %v1814_v1 = vpack.c.bf16 %v1707_v62, %v1707_v62  ;;  %1659 = vmatmul.bf16.gmra.mxu2 %v5173_v2 }
 0x1ee   : > { %1748 = vmatmul.bf16.gmra.mxu3 %v5174_v22  ;;  %v5179_v22 = vld [vmem:[#allocation24_spill] sm:$0xff] }
 0x1ef   : > { %v4470_v14 = vunpack.c.l.b16 %v1814_v1 }
 0x1f0   : > { %v1620_v15 = vpop.f32.mrf.mxu2  ;;  %v1444_v52 = vpop.f32.mrf.mxu0 }
 0x1f1   : > { %v1621_v58 = vadd.f32 %v1620_v15, %v1532_v46  ;;  %v1709_v47 = vpop.f32.mrf.mxu3  ;;  %v1533_v54 = vpop.f32.mrf.mxu1 }
 0x1f2   : > { %v1534_v42 = vadd.f32 %v1533_v54, %v1444_v52  ;;  %v5182_v52 = vld [vmem:[#allocation27_spill] sm:$0xff] }
 0x1f3   : > { %v1710_v34 = vadd.f32 %v1709_v47, %v1621_v58  ;;  %v5180_v58 = vld [vmem:[#allocation25_spill] sm:$0xff]  ;;  %v5181_v47 = vld [vmem:[#allocation26_spill] sm:$0xff] }
 0x1f5   : > { %v1815_v20 = vpack.c.bf16 %v1710_v34, %v1710_v34 }
 0x1f7   : > { %v4478_v50 = vunpack.c.l.b16 %v1815_v20 }
 0x1f8   : > { %v1622_v35 = vpop.f32.mrf.mxu2  ;;  %v1447_v28 = vpop.f32.mrf.mxu0 }
 0x1f9   : > { %v1623_v16 = vadd.f32 %v1622_v35, %v1534_v42  ;;  %v1711_v45 = vpop.f32.mrf.mxu3  ;;  %v1536_v36 = vpop.f32.mrf.mxu1 }
 0x1fa   : > { %v1537_v29 = vadd.f32 %v1536_v36, %v1447_v28 }
 0x1fb   : > { %v1712_v30 = vadd.f32 %v1711_v45, %v1623_v16  ;;  %1486 = vmatmul.bf16.gmra.mxu0 %v5175_v31 }
 0x1fc   : > { %1575 = vmatmul.bf16.gmra.mxu1 %v5176_v38  ;;  %v5183_v38 = vld [vmem:[#allocation29_spill] sm:$0xff] }
 0x1fd   : > { %v1816_v17 = vpack.c.bf16 %v1712_v30, %v1712_v30  ;;  %1664 = vmatmul.bf16.gmra.mxu2 %v5177_v37  ;;  %v5184_v37 = vld [vmem:[#allocation30_spill] sm:$0xff] }
 0x1fe   : > { %1753 = vmatmul.bf16.gmra.mxu3 %v5178_v32  ;;  %v5185_v32 = vld [vmem:[#allocation31_spill] sm:$0xff] }
 0x1ff   : > { %v4480_v9 = vunpack.c.l.b16 %v1816_v17 }
 0x200   : > { %v1625_v10 = vpop.f32.mrf.mxu2  ;;  %v1449_v26 = vpop.f32.mrf.mxu0 }
 0x201   : > { %v1626_v11 = vadd.f32 %v1625_v10, %v1537_v29  ;;  %v1714_v18 = vpop.f32.mrf.mxu3  ;;  %v1538_v60 = vpop.f32.mrf.mxu1  ;;  %v5186_v10 = vld [vmem:[#allocation32_spill] sm:$0xff] }
 0x202   : > { %v1539_v61 = vadd.f32 %v1538_v60, %v1449_v26 }
 0x203   : > { %v1715_v24 = vadd.f32 %v1714_v18, %v1626_v11 }
 0x205   : > { %v1817_v1 = vpack.c.bf16 %v1715_v24, %v1715_v24 }
 0x207   : > { %v4488_v54 = vunpack.c.l.b16 %v1817_v1 }
 0x208   : > { %v1627_v0 = vpop.f32.mrf.mxu2  ;;  %v1452_v46 = vpop.f32.mrf.mxu0 }
 0x209   : > { %v1628_v8 = vadd.f32 %v1627_v0, %v1539_v61  ;;  %v1716_v62 = vpop.f32.mrf.mxu3  ;;  %v1541_v63 = vpop.f32.mrf.mxu1 }
 0x20a   : > { %v1542_v2 = vadd.f32 %v1541_v63, %v1452_v46 }
 0x20b   : > { %v1717_v13 = vadd.f32 %v1716_v62, %v1628_v8  ;;  %1491 = vmatmul.bf16.gmra.mxu0 %v5179_v22  ;;  %v5187_v62 = vld [vmem:[#allocation34_spill] sm:$0xff] }
 0x20c   : > { %1580 = vmatmul.bf16.gmra.mxu1 %v5180_v58 }
 0x20d   : > { %v1818_v15 = vpack.c.bf16 %v1717_v13, %v1717_v13  ;;  %1669 = vmatmul.bf16.gmra.mxu2 %v5181_v47 }
 0x20e   : > { %1758 = vmatmul.bf16.gmra.mxu3 %v5182_v52 }
 0x20f   : > { %v4490_v34 = vunpack.c.l.b16 %v1818_v15 }
 0x210   : > { %v1630_v42 = vpop.f32.mrf.mxu2  ;;  %v4492_v45 = vpop.f32.mrf.mxu0 }
 0x211   : > { %v1631_v35 = vadd.f32 %v1630_v42, %v1542_v2  ;;  %v1719_v16 = vpop.f32.mrf.mxu3  ;;  %v4496_v36 = vpop.f32.mrf.mxu1 }
 0x213   : > { %v4498_v20 = vadd.f32 %v1719_v16, %v1631_v35 }
 0x215   : > { %v2731_v47 = vpop.permute.xlu0 %2730 }
 0x218   : > { %v4500_v30 = vpop.f32.mrf.mxu2  ;;  %v1457_v31 = vpop.f32.mrf.mxu0 }
 0x219   : > { %v4502_v29 = vpop.f32.mrf.mxu3  ;;  %v1546_v17 = vpop.f32.mrf.mxu1 }
 0x21b   : > { %1496 = vmatmul.bf16.gmra.mxu0 %v5183_v38  ;;  %v2729_v38 = vpop.permute.xlu2 %2728 }
 0x21c   : > { %1585 = vmatmul.bf16.gmra.mxu1 %v5184_v37 }
 0x21d   : > { %1674 = vmatmul.bf16.gmra.mxu2 %v5185_v32 }
 0x21e   : > { %1763 = vmatmul.bf16.gmra.mxu3 %v5186_v10 }
 0x220   : > { %v4508_v11 = vpop.f32.mrf.mxu2  ;;  %v1459_v26 = vpop.f32.mrf.mxu0 }
 0x221   : > { %v4510_v18 = vpop.f32.mrf.mxu3  ;;  %v1548_v60 = vpop.f32.mrf.mxu1 }
 0x228   : > { %v1637_v24 = vpop.f32.mrf.mxu2  ;;  %v1462_v0 = vpop.f32.mrf.mxu0 }
 0x229   : > { %v4512_v61 = vpop.f32.mrf.mxu3  ;;  %v1551_v8 = vpop.f32.mrf.mxu1 }
 0x22a   : > { %v1552_v37 = vadd.f32 %v1551_v8, %v1462_v0  ;;  %v1547_v0 = vadd.f32 %v1546_v17, %v1457_v31  ;;  %v1549_v8 = vadd.f32 %v1548_v60, %v1459_v26 }
 0x22b   : > { %1501 = vmatmul.bf16.gmra.mxu0 %v4317_v48 }
 0x22c   : > { %1590 = vmatmul.bf16.gmra.mxu1 %v4328_v43  ;;  %v4522_v43 = vpop.permute.xlu1 %2726 }
 0x22d   : > { %1679 = vmatmul.bf16.gmra.mxu2 %v4330_v56 }
 0x22e   : > { %1768 = vmatmul.bf16.gmra.mxu3 %v5187_v62 }
 0x230   : > { %v1640_v46 = vpop.f32.mrf.mxu2  ;;  %v1464_v1 = vpop.f32.mrf.mxu0 }
 0x231   : > { %v1729_v63 = vpop.f32.mrf.mxu3  ;;  %v1553_v13 = vpop.f32.mrf.mxu1  ;;  %v1641_v33 = vadd.f32 %v1640_v46, %v1552_v37  ;;  %v1636_v37 = vadd.f32 %v4508_v11, %v1547_v0 }
 0x232   : > { %v1554_v32 = vadd.f32 %v1553_v13, %v1464_v1 }
 0x233   : > { %v1730_v1 = vadd.f32 %v1729_v63, %v1641_v33  ;;  %v1725_v11 = vadd.f32 %v4510_v18, %v1636_v37 }
 0x235   : > { %v2735_v23 = vpop.permute.xlu1 %2734 }
 0x238   : > { %v1642_v2 = vpop.f32.mrf.mxu2  ;;  %v1467_v15 = vpop.f32.mrf.mxu0 }
 0x239   : > { %v1731_v22 = vpop.f32.mrf.mxu3  ;;  %v1556_v58 = vpop.f32.mrf.mxu1 }
 0x23a   : > { %v1557_v48 = vadd.f32 %v1556_v58, %v1467_v15 }
 0x23b   : > { %1506 = vmatmul.bf16.gmra.mxu0 %v4365_v51  ;;  %v1643_v51 = vadd.f32 %v1642_v2, %v1554_v32 }
 0x23c   : > { %1595 = vmatmul.bf16.gmra.mxu1 %v4367_v7 }
 0x23d   : > { %1684 = vmatmul.bf16.gmra.mxu2 %v4369_v57  ;;  %v1732_v28 = vadd.f32 %v1731_v22, %v1643_v51 }
 0x23e   : > { %1773 = vmatmul.bf16.gmra.mxu3 %v4371_v25 }
 0x240   : > { %v1645_v56 = vpop.f32.mrf.mxu2  ;;  %v1469_v42 = vpop.f32.mrf.mxu0 }
 0x241   : > { %v1734_v52 = vpop.f32.mrf.mxu3  ;;  %v1558_v35 = vpop.f32.mrf.mxu1  ;;  %v1646_v16 = vadd.f32 %v1645_v56, %v1557_v48 }
 0x242   : > { %v1559_v7 = vadd.f32 %v1558_v35, %v1469_v42  ;;  %v2733_v56 = vpop.permute.xlu2 %2732  ;;  %v1824_v42 = vpack.c.bf16 %v1732_v28, %v1732_v28  ;;  %v1544_v28 = vadd.f32 %v4496_v36, %v4492_v45 }
 0x243   : > { %v1735_v62 = vadd.f32 %v1734_v52, %v1646_v16  ;;  %v1638_v52 = vadd.f32 %v1637_v24, %v1549_v8 }
 0x244   : > { %v1912_v33 = vunpack.c.l.b16 %v1824_v42  ;;  %v1633_v60 = vadd.f32 %v4500_v30, %v1544_v28 }
 0x245   : > { %v2737_v10 = vpop.permute.xlu0 %2736  ;;  %v1825_v59 = vpack.c.bf16 %v1735_v62, %v1735_v62 }
 0x246   : > { %2746 = vmatpush.bf16.msra.mxu3 %v2737_v10 }
 0x247   : > { %v1913_v46 = vunpack.c.l.b16 %v1825_v59 }
 0x248   : > { %v1647_v57 = vpop.f32.mrf.mxu2  ;;  %v1472_v58 = vpop.f32.mrf.mxu0 }
 0x249   : > { %v1648_v25 = vadd.f32 %v1647_v57, %v1559_v7  ;;  %v1736_v15 = vpop.f32.mrf.mxu3  ;;  %v1561_v12 = vpop.f32.mrf.mxu1  ;;  %v1722_v57 = vadd.f32 %v4502_v29, %v1633_v60 }
 0x24a   : > { %2747 = vmatpush.bf16.msra.mxu3 %v2735_v23  ;;  %v1562_v48 = vadd.f32 %v1561_v12, %v1472_v58  ;;  %v1823_v23 = vpack.c.bf16 %v1730_v1, %v1730_v1  ;;  %v1819_v58 = vpack.c.bf16 %v4498_v20, %v4498_v20 }
 0x24b   : > { %v1737_v39 = vadd.f32 %v1736_v15, %v1648_v25  ;;  %v1820_v30 = vpack.c.bf16 %v1722_v57, %v1722_v57 }
 0x24c   : > { %v1911_v26 = vunpack.c.l.b16 %v1823_v23 }
 0x24d   : > { %v1826_v13 = vpack.c.bf16 %v1737_v39, %v1737_v39  ;;  %v2602_v2 = vpop.permute.xlu0 %2601  ;;  %v1727_v39 = vadd.f32 %v4512_v61, %v1638_v52  ;;  %v1821_v61 = vpack.c.bf16 %v1725_v11, %v1725_v11 }
 0x24e   : > { %2632 = vmatpush.bf16.msra.mxu2 %v2602_v2  ;;  %2748 = vmatpush.bf16.msra.mxu3 %v2733_v56  ;;  %v1921_v63 = vpack.c.b16 %v1912_v33, %v1911_v26  ;;  %v5188_v33 = vpack.c.b16 %v4490_v34, %v4488_v54 }
 0x24f   : > { %v1914_v35 = vunpack.c.l.b16 %v1826_v13  ;;  %v1822_v24 = vpack.c.bf16 %v1727_v39, %v1727_v39  ;;  %v1907_v13 = vunpack.c.l.b16 %v1819_v58 }
 0x250   : > { %v1650_v16 = vpop.f32.mrf.mxu2  ;;  %v4525_v12 = vpop.f32.mrf.mxu0  ;;  %v1967_v18 = vsel %vm1923_vm0, %v1921_v63, 0  ;;  %v5189_v63 = vpack.c.b16 %v4480_v9, %v4478_v50 }
 0x251   : > { %v1922_v22 = vpack.c.b16 %v1914_v35, %v1913_v46  ;;  %v1651_v32 = vadd.f32 %v1650_v16, %v1562_v48  ;;  %v1739_v10 = vpop.f32.mrf.mxu3  ;;  %v4527_v31 = vpop.f32.mrf.mxu1  ;;  %v1910_v45 = vunpack.c.l.b16 %v1822_v24 }
 0x252   : > { %2749 = vmatpush.bf16.msra.mxu3 %v2731_v47 }
 0x253   : > { %v4530_v17 = vadd.f32 %v1739_v10, %v1651_v32  ;;  %v1970_v59 = vsel %vm1923_vm0, %v1922_v22, 0 }
 0x254   : > { %1972 = vmatpush.bf16.xpose.msra.mxu0 %v1970_v59  ;;  %v1958_v59 = vsel %vm1923_vm0, %v5188_v33, 0 }
 0x256   : > { %2750 = vmatpush.bf16.msra.mxu3 %v2729_v38  ;;  %v1909_v38 = vunpack.c.l.b16 %v1821_v61  ;;  %v1955_v61 = vsel %vm1923_vm0, %v5189_v63, 0 }
 0x258   : > { %v4537_v47 = vpop.f32.mrf.mxu2  ;;  %v1477_v62 = vpop.f32.mrf.mxu0  ;;  %v1920_v25 = vpack.c.b16 %v1910_v45, %v1909_v38 }
 0x259   : > { %v4539_v51 = vpop.f32.mrf.mxu3  ;;  %v1566_v7 = vpop.f32.mrf.mxu1 }
 0x25a   : > { %2751 = vmatpush.bf16.msra.mxu3 %v4522_v43  ;;  %v1567_v36 = vadd.f32 %v1566_v7, %v1477_v62  ;;  %v1908_v43 = vunpack.c.l.b16 %v1820_v30  ;;  %v1964_v1 = vsel %vm1923_vm0, %v1920_v25, 0 }
 0x25c   : > { %1973 = vmatpush.bf16.xpose.msra.mxu0 %v1967_v18  ;;  %v1919_v2 = vpack.c.b16 %v1908_v43, %v1907_v13 }
 0x25e   : > { %v1961_v16 = vsel %vm1923_vm0, %v1919_v2, 0 }
 0x260   : > { %v1655_v15 = vpop.f32.mrf.mxu2  ;;  %v4546_v0 = vpop.f32.mrf.mxu0 }
 0x261   : > { %v1656_v48 = vadd.f32 %v1655_v15, %v1567_v36  ;;  %v1744_v56 = vpop.f32.mrf.mxu3  ;;  %v4548_v8 = vpop.f32.mrf.mxu1  ;;  %v5190_v36 = vpack.c.b16 %v4470_v14, %v4468_v3  ;;  %v5191_v15 = vpack.c.b16 %v4460_v21, %v4458_v49 }
 0x263   : > { %v4550_v29 = vadd.f32 %v1744_v56, %v1656_v48  ;;  %v1952_v18 = vsel %vm1923_vm0, %v5190_v36, 0  ;;  %v1949_v58 = vsel %vm1923_vm0, %v5191_v15, 0 }
 0x264   : > { %1974 = vmatpush.bf16.xpose.msra.mxu0 %v1964_v1 }
 0x268   : > { %v4553_v52 = vpop.f32.mrf.mxu2  ;;  %v1482_v46 = vpop.f32.mrf.mxu0 }
 0x269   : > { %v4555_v42 = vpop.f32.mrf.mxu3  ;;  %v1571_v20 = vpop.f32.mrf.mxu1 }
 0x26a   : > { %v1572_v35 = vadd.f32 %v1571_v20, %v1482_v46 }
 0x26c   : > { %1975 = vmatpush.bf16.xpose.msra.mxu0 %v1961_v16 }
 0x270   : > { %v1660_v37 = vpop.f32.mrf.mxu2  ;;  %v4558_v32 = vpop.f32.mrf.mxu0 }
 0x271   : > { %v1661_v23 = vadd.f32 %v1660_v37, %v1572_v35  ;;  %v1749_v22 = vpop.f32.mrf.mxu3  ;;  %v4560_v10 = vpop.f32.mrf.mxu1 }
 0x273   : > { %v4562_v39 = vadd.f32 %v1749_v22, %v1661_v23 }
 0x274   : > { %1976 = vmatpush.bf16.xpose.msra.mxu0 %v1958_v59 }
 0x278   : > { %v4568_v28 = vpop.f32.mrf.mxu2  ;;  %v1487_v26 = vpop.f32.mrf.mxu0 }
 0x279   : > { %v4570_v11 = vpop.f32.mrf.mxu3  ;;  %v1576_v60 = vpop.f32.mrf.mxu1 }
 0x27a   : > { %v1577_v24 = vadd.f32 %v1576_v60, %v1487_v26 }
 0x27c   : > { %1977 = vmatpush.bf16.xpose.msra.mxu0 %v1955_v61 }
 0x280   : > { %v1665_v62 = vpop.f32.mrf.mxu2  ;;  %v4576_v54 = vpop.f32.mrf.mxu0 }
 0x281   : > { %v1666_v7 = vadd.f32 %v1665_v62, %v1577_v24  ;;  %v1754_v57 = vpop.f32.mrf.mxu3  ;;  %v4578_v34 = vpop.f32.mrf.mxu1 }
 0x283   : > { %v4580_v45 = vadd.f32 %v1754_v57, %v1666_v7 }
 0x284   : > { %1978 = vmatpush.bf16.xpose.msra.mxu0 %v1952_v18 }
 0x288   : > { %v4586_v38 = vpop.f32.mrf.mxu2  ;;  %v1492_v9 = vpop.f32.mrf.mxu0 }
 0x289   : > { %v4588_v50 = vpop.f32.mrf.mxu3  ;;  %v1581_v30 = vpop.f32.mrf.mxu1 }
 0x28a   : > { %v1582_v25 = vadd.f32 %v1581_v30, %v1492_v9  ;;  %v5193_v30 = vld [vmem:[#allocation23_spill] sm:$0xff] }
 0x28c   : > { %1979 = vmatpush.bf16.xpose.msra.mxu0 %v1949_v58 }
 0x290   : > { %v1670_v48 = vpop.f32.mrf.mxu2  ;;  %v1494_v3 = vpop.f32.mrf.mxu0 }
 0x291   : > { %v1671_v56 = vadd.f32 %v1670_v48, %v1582_v25  ;;  %v1759_v43 = vpop.f32.mrf.mxu3  ;;  %v1583_v14 = vpop.f32.mrf.mxu1 }
 0x292   : > { %v1584_v13 = vadd.f32 %v1583_v14, %v1494_v3 }
 0x293   : > { %v1760_v1 = vadd.f32 %v1759_v43, %v1671_v56  ;;  %3229 = vmatmul.msk.bf16.vlgmr.msra.gmra.mxu0 %vm1923_vm0, %v5166_v44  ;;  %v5192_v44 = vld [vmem:[#allocation18_spill] sm:$0xff] }
 0x295   : > { %v1835_v37 = vpack.c.bf16 %v1760_v1, %v1760_v1  ;;  %v5194_v1 = vld [vmem:[#allocation28_spill] sm:$0xff] }
 0x297   : > { %v4596_v23 = vunpack.c.l.b16 %v1835_v37 }
 0x298   : > { %v1672_v2 = vpop.f32.mrf.mxu2  ;;  %v1497_v35 = vpop.f32.mrf.mxu0 }
 0x299   : > { %v1673_v46 = vadd.f32 %v1672_v2, %v1584_v13  ;;  %v1761_v20 = vpop.f32.mrf.mxu3  ;;  %v1586_v16 = vpop.f32.mrf.mxu1 }
 0x29b   : > { %v1762_v49 = vadd.f32 %v1761_v20, %v1673_v46 }
 0x29d   : > { %v1836_v21 = vpack.c.bf16 %v1762_v49, %v1762_v49 }
 0x29f   : > { %v4598_v22 = vunpack.c.l.b16 %v1836_v21 }
 0x2a0   : > { %v1675_v33 = vpop.f32.mrf.mxu2  ;;  %v1499_v60 = vpop.f32.mrf.mxu0 }
 0x2a1   : > { %v1764_v26 = vpop.f32.mrf.mxu3  ;;  %v1588_v24 = vpop.f32.mrf.mxu1 }
 0x2a2   : > { %v1589_v40 = vadd.f32 %v1588_v24, %v1499_v60  ;;  %v1574_v24 = vadd.f32 %v4560_v10, %v4558_v32 }
 0x2a3   : > { %3230 = vmatmul.msk.bf16.gmra.mxu0 %vm1923_vm0, %v5192_v44 }
 0x2a8   : > { %v1677_v63 = vpop.f32.mrf.mxu2  ;;  %v1502_v62 = vpop.f32.mrf.mxu0 }
 0x2a9   : > { %v1766_v61 = vpop.f32.mrf.mxu3  ;;  %v1591_v7 = vpop.f32.mrf.mxu1  ;;  %v1678_v53 = vadd.f32 %v1677_v63, %v1589_v40  ;;  %v1663_v63 = vadd.f32 %v4568_v28, %v1574_v24 }
 0x2aa   : > { %v1592_v46 = vadd.f32 %v1591_v7, %v1502_v62 }
 0x2b0   : > { %v1680_v57 = vpop.f32.mrf.mxu2  ;;  %v1504_v18 = vpop.f32.mrf.mxu0 }
 0x2b1   : > { %v1769_v36 = vpop.f32.mrf.mxu3  ;;  %v1593_v9 = vpop.f32.mrf.mxu1 }
 0x2b2   : > { %v1594_v20 = vadd.f32 %v1593_v9, %v1504_v18  ;;  %v1767_v9 = vadd.f32 %v1766_v61, %v1678_v53 }
 0x2b3   : > { %3231 = vmatmul.msk.bf16.gmra.mxu0 %vm1923_vm0, %v5193_v30  ;;  %v1681_v30 = vadd.f32 %v1680_v57, %v1592_v46 }
 0x2b8   : > { %v1682_v25 = vpop.f32.mrf.mxu2  ;;  %v1507_v58 = vpop.f32.mrf.mxu0 }
 0x2b9   : > { %v1771_v15 = vpop.f32.mrf.mxu3  ;;  %v1596_v48 = vpop.f32.mrf.mxu1  ;;  %v1683_v37 = vadd.f32 %v1682_v25, %v1594_v20 }
 0x2ba   : > { %v1597_v56 = vadd.f32 %v1596_v48, %v1507_v58  ;;  %v1587_v48 = vadd.f32 %v1586_v16, %v1497_v35  ;;  %v1838_v16 = vpack.c.bf16 %v1767_v9, %v1767_v9  ;;  %v5201_v9 = vld [vmem:[#allocation39_spill] sm:$0xff] }
 0x2bb   : > { %v1772_v19 = vadd.f32 %v1771_v15, %v1683_v37 }
 0x2bc   : > { %v1676_v62 = vadd.f32 %v1675_v33, %v1587_v48  ;;  %v2088_v40 = vunpack.c.l.b16 %v1838_v16 }
 0x2c0   : > { %v1685_v43 = vpop.f32.mrf.mxu2  ;;  %v1509_v13 = vpop.f32.mrf.mxu0 }
 0x2c1   : > { %v1774_v3 = vpop.f32.mrf.mxu3  ;;  %v1686_v14 = vadd.f32 %v1685_v43, %v1597_v56  ;;  %v1598_v2 = vpop.f32.mrf.mxu1  ;;  %v1770_v56 = vadd.f32 %v1769_v36, %v1681_v30  ;;  %v1569_v36 = vadd.f32 %v4548_v8, %v4546_v0  ;;  %v1564_v0 = vadd.f32 %v4527_v31, %v4525_v12 }
 0x2c2   : > { %v1599_v21 = vadd.f32 %v1598_v2, %v1509_v13  ;;  %v1827_v12 = vpack.c.bf16 %v4530_v17, %v4530_v17 }
 0x2c3   : > { %3232 = vmatmul.msk.bf16.gmra.mxu0 %vm1923_vm0, %v5194_v1  ;;  %v1775_v49 = vadd.f32 %v1774_v3, %v1686_v14  ;;  %v1840_v1 = vpack.c.bf16 %v1772_v19, %v1772_v19  ;;  %v1839_v7 = vpack.c.bf16 %v1770_v56, %v1770_v56  ;;  %v5195_v3 = vld [vmem:[#allocation33_spill] sm:$0xff]  ;;  %v1658_v32 = vadd.f32 %v4553_v52, %v1569_v36 }
 0x2c4   : > { %v1653_v52 = vadd.f32 %v4537_v47, %v1564_v0 }
 0x2c5   : > { %v1841_v55 = vpack.c.bf16 %v1775_v49, %v1775_v49  ;;  %v2090_v25 = vunpack.c.l.b16 %v1840_v1  ;;  %v2089_v35 = vunpack.c.l.b16 %v1839_v7  ;;  %v5197_v49 = vld [vmem:[#allocation35_spill] sm:$0xff]  ;;  %v5199_v7 = vld [vmem:[#allocation37_spill] sm:$0xff] }
 0x2c7   : > { %v2091_v6 = vunpack.c.l.b16 %v1841_v55 }
 0x2c8   : > { %v1687_v44 = vpop.f32.mrf.mxu2 }
 0x2c9   : > { %v1688_v59 = vadd.f32 %v1687_v44, %v1599_v21  ;;  %v1776_v41 = vpop.f32.mrf.mxu3  ;;  %v2198_v21 = vlaneseq }
 0x2cb   : > { %v1777_v58 = vadd.f32 %v1776_v41, %v1688_v59  ;;  %v1765_v41 = vadd.f32 %v1764_v26, %v1676_v62  ;;  %v2099_v59 = vpack.c.b16 %v2090_v25, %v2089_v35  ;;  %v4650_v44 = vshrl.u32 %v2198_v21, 7 }
 0x2cc   : > { %v4652_v30 = vand.u32 127, %v2198_v21 }
 0x2cd   : > { %v1842_v43 = vpack.c.bf16 %v1777_v58, %v1777_v58  ;;  %v1837_v60 = vpack.c.bf16 %v1765_v41, %v1765_v41  ;;  %v2144_v55 = vsel %vm1923_vm0, %v2099_v59, 0  ;;  %v2200_v56 = vadd.s32 8, %v4650_v44  ;;  %v5202_v41 = vld [vmem:[#allocation40_spill] sm:$0xff] }
 0x2ce   : > { %vm2217_vm1 = vcmp.le.s32.totalorder %v4652_v30, %v4650_v44  ;;  %v2203_v16 = vadd.s32 32, %v4650_v44 }
 0x2cf   : > { %v2092_v4 = vunpack.c.l.b16 %v1842_v43  ;;  %v5198_v43 = vld [vmem:[#allocation36_spill] sm:$0xff]  ;;  %vm2218_vm2 = vcmp.le.s32.totalorder %v4652_v30, %v2200_v56 }
 0x2d0   : > { %vm2221_vm4 = vcmp.le.s32.totalorder %v4652_v30, %v2203_v16  ;;  %v2209_v16 = vadd.s32 80, %v4650_v44 }
 0x2d1   : > { %v2100_v18 = vpack.c.b16 %v2092_v4, %v2091_v6  ;;  %v1579_v4 = vadd.f32 %v4578_v34, %v4576_v54  ;;  %v2087_v6 = vunpack.c.l.b16 %v1837_v60  ;;  %v1833_v54 = vpack.c.bf16 %v4580_v45, %v4580_v45 }
 0x2d2   : > { %v1752_v34 = vadd.f32 %v4570_v11, %v1663_v63  ;;  %v1831_v45 = vpack.c.bf16 %v4562_v39, %v4562_v39  ;;  %v1747_v11 = vadd.f32 %v4555_v42, %v1658_v32  ;;  %v1829_v39 = vpack.c.bf16 %v4550_v29, %v4550_v29 }
 0x2d3   : > { %3233 = vmatmul.msk.bf16.gmra.mxu0 %vm1923_vm0, %v5195_v3  ;;  %v2147_v57 = vsel %vm1923_vm0, %v2100_v18, 0  ;;  %v1668_v53 = vadd.f32 %v4586_v38, %v1579_v4  ;;  %v2098_v19 = vpack.c.b16 %v2088_v40, %v2087_v6  ;;  %v2083_v15 = vunpack.c.l.b16 %v1833_v54  ;;  %v5200_v18 = vld [vmem:[#allocation38_spill] sm:$0xff]  ;;  %v5203_v40 = vld [vmem:[#allocation41_spill] sm:$0xff] }
 0x2d4   : > { %2149 = vmatpush.bf16.xpose.msra.mxu1 %v2147_v57  ;;  %v1832_v10 = vpack.c.bf16 %v1752_v34, %v1752_v34  ;;  %v2081_v8 = vunpack.c.l.b16 %v1831_v45  ;;  %v1742_v42 = vadd.f32 %v4539_v51, %v1653_v52  ;;  %v2077_v29 = vunpack.c.l.b16 %v1827_v12  ;;  %v5205_v4 = vld [vmem:[#allocation5_spill] sm:$0xff] }
 0x2d5   : > { %v1757_v33 = vadd.f32 %v4588_v50, %v1668_v53  ;;  %v2141_v26 = vsel %vm1923_vm0, %v2098_v19, 0  ;;  %v5196_v50 = vpack.c.b16 %v4598_v22, %v4596_v23  ;;  %v1830_v22 = vpack.c.bf16 %v1747_v11, %v1747_v11 }
 0x2d6   : > { %v2082_v14 = vunpack.c.l.b16 %v1832_v10  ;;  %v1828_v20 = vpack.c.bf16 %v1742_v42, %v1742_v42  ;;  %v2202_v3 = vadd.s32 24, %v4650_v44  ;;  %v2201_v32 = vadd.s32 16, %v4650_v44 }
 0x2d7   : > { %v1834_v61 = vpack.c.bf16 %v1757_v33, %v1757_v33  ;;  %v2080_v2 = vunpack.c.l.b16 %v1830_v22  ;;  %vm2227_vm13 = vcmp.le.s32.totalorder %v4652_v30, %v2209_v16 }
 0x2d8   : > { %v2095_v13 = vpack.c.b16 %v2082_v14, %v2081_v8  ;;  %v2078_v31 = vunpack.c.l.b16 %v1828_v20  ;;  %vm2220_vm3 = vcmp.le.s32.totalorder %v4652_v30, %v2202_v3  ;;  %vm2219_vm5 = vcmp.le.s32.totalorder %v4652_v30, %v2201_v32 }
 0x2d9   : > { %v2084_v38 = vunpack.c.l.b16 %v1834_v61  ;;  %v2206_v20 = vadd.s32 56, %v4650_v44 }
 0x2da   : > { %v2132_v46 = vsel %vm1923_vm0, %v2095_v13, 0  ;;  %v2093_v51 = vpack.c.b16 %v2078_v31, %v2077_v29  ;;  %v2204_v13 = vadd.s32 40, %v4650_v44 }
 0x2db   : > { %v2096_v28 = vpack.c.b16 %v2084_v38, %v2083_v15  ;;  %vm2224_vm8 = vcmp.le.s32.totalorder %v4652_v30, %v2206_v20 }
 0x2dc   : > { %2150 = vmatpush.bf16.xpose.msra.mxu1 %v2144_v55  ;;  %v2126_v58 = vsel %vm1923_vm0, %v2093_v51, 0  ;;  %v5204_v55 = vld [vmem:[#allocation42_spill] sm:$0xff]  ;;  %vm2222_vm6 = vcmp.le.s32.totalorder %v4652_v30, %v2204_v13 }
 0x2dd   : > { %v2135_v23 = vsel %vm1923_vm0, %v2096_v28, 0 }
 0x2e3   : > { %3234 = vmatmul.msk.bf16.gmra.mxu0 %vm1923_vm0, %v4361_v5  ;;  %v2138_v5 = vsel %vm1923_vm0, %v5196_v50, 0 }
 0x2e4   : > { %2151 = vmatpush.bf16.xpose.msra.mxu1 %v2141_v26 }
 0x2ec   : > { %2152 = vmatpush.bf16.xpose.msra.mxu1 %v2138_v5 }
 0x2f3   : > { %3235 = vmatmul.msk.bf16.gmra.mxu0 %vm1923_vm0, %v4377_v27  ;;  %v2079_v27 = vunpack.c.l.b16 %v1829_v39 }
 0x2f4   : > { %2153 = vmatpush.bf16.xpose.msra.mxu1 %v2135_v23 }
 0x2f5   : > { %v2094_v37 = vpack.c.b16 %v2080_v2, %v2079_v27  ;;  %v2205_v27 = vadd.s32 48, %v4650_v44 }
 0x2f7   : > { %v2129_v47 = vsel %vm1923_vm0, %v2094_v37, 0  ;;  %vm2223_vm7 = vcmp.le.s32.totalorder %v4652_v30, %v2205_v27 }
 0x2fc   : > { %2154 = vmatpush.bf16.xpose.msra.mxu1 %v2132_v46 }
 0x303   : > { %3236 = vmatmul.msk.bf16.gmra.mxu0 %vm1923_vm0, %v5197_v49  ;;  %v2207_v49 = vadd.s32 64, %v4650_v44 }
 0x304   : > { %2155 = vmatpush.bf16.xpose.msra.mxu1 %v2129_v47 }
 0x305   : > { %vm2225_vm9 = vcmp.le.s32.totalorder %v4652_v30, %v2207_v49 }
 0x30c   : > { %2156 = vmatpush.bf16.xpose.msra.mxu1 %v2126_v58 }
 0x310   : > { %v1981_v17 = vpop.f32.mrf.mxu0 }
 0x311   : > { %v2265_v48 = vsel %vm2217_vm1, %v1981_v17, -inf }
 0x312   : > { %2297 = vmax.xlane.f32.xlu1 %v2265_v48 }
 0x313   : > { %3237 = vmatmul.msk.bf16.vlgmr.msra.gmra.mxu1 %vm1923_vm0, %v5198_v43 }
 0x318   : > { %v1983_v1 = vpop.f32.mrf.mxu0 }
 0x319   : > { %v2266_v62 = vsel %vm2218_vm2, %v1983_v1, -inf }
 0x31a   : > { %2299 = vmax.xlane.f32.xlu2 %v2266_v62 }
 0x320   : > { %v1986_v25 = vpop.f32.mrf.mxu0 }
 0x321   : > { %v4719_v0 = vsel %vm2219_vm5, %v1986_v25, -inf }
 0x323   : > { %3238 = vmatmul.msk.bf16.gmra.mxu1 %vm1923_vm0, %v5199_v7 }
 0x328   : > { %v1988_v57 = vpop.f32.mrf.mxu0 }
 0x329   : > { %v4680_v35 = vsel %vm2220_vm3, %v1988_v57, -inf }
 0x32b   : > { %2724 = vrot.lane.b32.xlu1 %v5199_v7, %s3552_s29  ;;  %v2208_v7 = vadd.s32 72, %v4650_v44 }
 0x32d   : > { %vm2226_vm11 = vcmp.le.s32.totalorder %v4652_v30, %v2208_v7 }
 0x330   : > { %v1991_v59 = vpop.f32.mrf.mxu0 }
 0x331   : > { %v4687_v60 = vsel %vm2221_vm4, %v1991_v59, -inf }
 0x333   : > { %3239 = vmatmul.msk.bf16.gmra.mxu1 %vm1923_vm0, %v5200_v18 }
 0x338   : > { %v1993_v34 = vpop.f32.mrf.mxu0 }
 0x339   : > { %v4733_v42 = vsel %vm2222_vm6, %v1993_v34, -inf }
 0x340   : > { %v1996_v14 = vpop.f32.mrf.mxu0 }
 0x341   : > { %v4747_v12 = vsel %vm2223_vm7, %v1996_v14, -inf }
 0x343   : > { %3240 = vmatmul.msk.bf16.gmra.mxu1 %vm1923_vm0, %v5201_v9 }
 0x348   : > { %v1998_v8 = vpop.f32.mrf.mxu0 }
 0x349   : > { %v4749_v31 = vsel %vm2224_vm8, %v1998_v8, -inf }
 0x350   : > { %v2001_v46 = vpop.f32.mrf.mxu0 }
 0x351   : > { %v4755_v21 = vsel %vm2225_vm9, %v2001_v46, -inf }
 0x353   : > { %3241 = vmatmul.msk.bf16.gmra.mxu1 %vm1923_vm0, %v5202_v41  ;;  %v2211_v41 = vadd.s32 96, %v4650_v44 }
 0x355   : > { %2303 = vmax.xlane.f32.xlu1 %v4680_v35  ;;  %vm2229_vm12 = vcmp.le.s32.totalorder %v4652_v30, %v2211_v41 }
 0x358   : > { %v2003_v47 = vpop.f32.mrf.mxu0 }
 0x35d   : > { %2305 = vmax.xlane.f32.xlu1 %v4687_v60 }
 0x360   : > { %v2006_v51 = vpop.f32.mrf.mxu0 }
 0x361   : > { %v4823_v34 = vsel %vm2227_vm13, %v2006_v51, -inf }
 0x363   : > { %3242 = vmatmul.msk.bf16.gmra.mxu1 %vm1923_vm0, %v5203_v40 }
 0x368   : > { %v2008_v56 = vpop.f32.mrf.mxu0 }
 0x370   : > { %v2011_v57 = vpop.f32.mrf.mxu0 }
 0x373   : > { %3243 = vmatmul.msk.bf16.gmra.mxu1 %vm1923_vm0, %v5204_v55  ;;  %v4799_v55 = vsel %vm2229_vm12, %v2011_v57, -inf }
 0x383   : > { %3244 = vmatmul.msk.bf16.gmra.mxu1 %vm1923_vm0, %v5205_v4 }
 0x385   : > { %v2298_v6 = vpop.xlane.xlu1 %2297 }
 0x386   : > { %v2361_v53 = vsub.f32 %v2265_v48, %v2298_v6  ;;  %v2212_v6 = vadd.s32 104, %v4650_v44 }
 0x388   : > { %v2393_v19 = vmul.f32 1.442695, %v2361_v53  ;;  %v2013_v53 = vpop.f32.mrf.mxu0  ;;  %vm2230_vm14 = vcmp.le.s32.totalorder %v4652_v30, %v2212_v6 }
 0x38a   : > { %3356 = vpow2.f32 %v2393_v19  ;;  %v4811_v19 = vsel %vm2226_vm11, %v2003_v47, -inf }
 0x38d   : > { %v2300_v33 = vpop.xlane.xlu2 %2299 }
 0x38e   : > { %v2362_v26 = vsub.f32 %v2266_v62, %v2300_v33  ;;  %v2210_v62 = vadd.s32 88, %v4650_v44 }
 0x390   : > { %v2395_v24 = vmul.f32 1.442695, %v2362_v26  ;;  %v2158_v63 = vpop.f32.mrf.mxu1  ;;  %v4702_v54 = vpop.eup %3356  ;;  %vm2228_vm10 = vcmp.le.s32.totalorder %v4652_v30, %v2210_v62  ;;  %v4816_v26 = vsel %vm2230_vm14, %v2013_v53, -inf }
 0x391   : > { %v4699_v61 = vsel %vm2217_vm1, %v2158_v63, -inf  ;;  %v2521_v38 = vpack.c.bf16 %v4702_v54, %v4702_v54  ;;  %v4780_v25 = vsel %vm2228_vm10, %v2008_v56, -inf  ;;  %v2016_v63 = vpop.f32.mrf.mxu0 }
 0x392   : > { %3358 = vpow2.f32 %v2395_v24  ;;  %2329 = vmax.xlane.f32.xlu0 %v4699_v61  ;;  %v2213_v24 = vadd.s32 112, %v4650_v44 }
 0x393   : > { %v2569_v10 = vunpack.c.l.b16 %v2521_v38 }
 0x394   : > { %vm2231_vm15 = vcmp.le.s32.totalorder %v4652_v30, %v2213_v24 }
 0x398   : > { %v4706_v50 = vpop.eup %3358  ;;  %v2160_v5 = vpop.f32.mrf.mxu1 }
 0x399   : > { %v2522_v36 = vpack.c.bf16 %v4706_v50, %v4706_v50  ;;  %v4712_v15 = vsel %vm2218_vm2, %v2160_v5, -inf  ;;  %v4828_v5 = vsel %vm2231_vm15, %v2016_v63, -inf  ;;  %v2018_v13 = vpop.f32.mrf.mxu0 }
 0x39a   : > { %2331 = vmax.xlane.f32.xlu2 %v4712_v15 }
 0x39b   : > { %v2570_v28 = vunpack.c.l.b16 %v2522_v36 }
 0x39d   : > { %v2585_v45 = vpack.c.b16 %v2570_v28, %v2569_v10  ;;  %v2725_v11 = vpop.permute.xlu1 %2724 }
 0x39e   : > { %2752 = vmatpush.bf16.msra.mxu3 %v2725_v11 }
 0x39f   : > { %2633 = vmatmul.bf16.vlgmr.msra.gmra.mxu2 %v2585_v45 }
 0x3a0   : > { %v2163_v23 = vpop.f32.mrf.mxu1 }
 0x3a1   : > { %v4763_v48 = vsel %vm2219_vm5, %v2163_v23, -inf  ;;  %v2214_v23 = vadd.s32 120, %v4650_v44 }
 0x3a2   : > { %2301 = vmax.xlane.f32.xlu2 %v4719_v0 }
 0x3a3   : > { %vm2232_vm1 = vcmp.le.s32.totalorder %v4652_v30, %v2214_v23 }
 0x3a4   : > { %v4855_v20 = vsel %vm2232_vm1, %v2018_v13, -inf }
 0x3a6   : > { %2722 = vrot.lane.b32.xlu0 %v5198_v43, %s3552_s29 }
 0x3a8   : > { %v2165_v52 = vpop.f32.mrf.mxu1 }
 0x3a9   : > { %v4726_v22 = vsel %vm2220_vm3, %v2165_v52, -inf }
 0x3aa   : > { %2335 = vmax.xlane.f32.xlu2 %v4726_v22 }
 0x3b0   : > { %v2168_v39 = vpop.f32.mrf.mxu1 }
 0x3b1   : > { %v4737_v2 = vsel %vm2221_vm4, %v2168_v39, -inf }
 0x3b2   : > { %2307 = vmax.xlane.f32.xlu2 %v4733_v42  ;;  %2337 = vmax.xlane.f32.xlu1 %v4737_v2 }
 0x3b8   : > { %v2170_v37 = vpop.f32.mrf.mxu1 }
 0x3b9   : > { %v4774_v18 = vsel %vm2222_vm6, %v2170_v37, -inf }
 0x3ba   : > { %2309 = vmax.xlane.f32.xlu2 %v4747_v12  ;;  %2311 = vmax.xlane.f32.xlu1 %v4749_v31 }
 0x3c0   : > { %v2173_v29 = vpop.f32.mrf.mxu1 }
 0x3c1   : > { %v4793_v59 = vsel %vm2223_vm7, %v2173_v29, -inf }
 0x3c2   : > { %2313 = vmax.xlane.f32.xlu1 %v4755_v21 }
 0x3c8   : > { %v2175_v58 = vpop.f32.mrf.mxu1  ;;  %v2304_v36 = vpop.xlane.xlu1 %2303 }
 0x3c9   : > { %v4758_v17 = vsel %vm2224_vm8, %v2175_v58, -inf  ;;  %v2364_v37 = vsub.f32 %v4680_v35, %v2304_v36 }
 0x3ca   : > { %2343 = vmax.xlane.f32.xlu2 %v4758_v17 }
 0x3cb   : > { %v2399_v30 = vmul.f32 1.442695, %v2364_v37 }
 0x3d0   : > { %v2178_v43 = vpop.f32.mrf.mxu1  ;;  %2333 = vmax.xlane.f32.xlu0 %v4763_v48  ;;  %v2306_v11 = vpop.xlane.xlu1 %2305 }
 0x3d1   : > { %v4766_v1 = vsel %vm2225_vm9, %v2178_v43, -inf  ;;  %v2365_v52 = vsub.f32 %v4687_v60, %v2306_v11 }
 0x3d2   : > { %2345 = vmax.xlane.f32.xlu2 %v4766_v1 }
 0x3d3   : > { %v2401_v27 = vmul.f32 1.442695, %v2365_v52 }
 0x3d5   : > { %3360 = vpow2.f32 %v2401_v27 }
 0x3d8   : > { %v2180_v9 = vpop.f32.mrf.mxu1  ;;  %2339 = vmax.xlane.f32.xlu0 %v4774_v18 }
 0x3d9   : > { %v4784_v3 = vsel %vm2226_vm11, %v2180_v9, -inf }
 0x3da   : > { %2319 = vmax.xlane.f32.xlu2 %v4780_v25  ;;  %2347 = vmax.xlane.f32.xlu1 %v4784_v3 }
 0x3db   : > { %v3361_v51 = vpop.eup %3360 }
 0x3dc   : > { %v2525_v13 = vpack.c.bf16 %v3361_v51, %v3361_v51 }
 0x3de   : > { %v2573_v37 = vunpack.c.l.b16 %v2525_v13 }
 0x3e0   : > { %v2183_v40 = vpop.f32.mrf.mxu1  ;;  %2341 = vmax.xlane.f32.xlu0 %v4793_v59 }
 0x3e1   : > { %v4803_v4 = vsel %vm2227_vm13, %v2183_v40, -inf }
 0x3e2   : > { %2321 = vmax.xlane.f32.xlu2 %v4799_v55  ;;  %2349 = vmax.xlane.f32.xlu1 %v4803_v4 }
 0x3e8   : > { %v2185_v33 = vpop.f32.mrf.mxu1  ;;  %2315 = vmax.xlane.f32.xlu0 %v4811_v19 }
 0x3e9   : > { %v4833_v32 = vsel %vm2228_vm10, %v2185_v33, -inf }
 0x3ea   : > { %2323 = vmax.xlane.f32.xlu1 %v4816_v26 }
 0x3f0   : > { %v2188_v38 = vpop.f32.mrf.mxu1  ;;  %2317 = vmax.xlane.f32.xlu0 %v4823_v34 }
 0x3f1   : > { %v4843_v45 = vsel %vm2229_vm12, %v2188_v38, -inf }
 0x3f2   : > { %2325 = vmax.xlane.f32.xlu1 %v4828_v5 }
 0x3f8   : > { %v2190_v10 = vpop.f32.mrf.mxu1  ;;  %2351 = vmax.xlane.f32.xlu0 %v4833_v32 }
 0x3f9   : > { %v4838_v28 = vsel %vm2230_vm14, %v2190_v10, -inf }
 0x3fa   : > { %2355 = vmax.xlane.f32.xlu2 %v4838_v28 }
 0x400   : > { %2353 = vmax.xlane.f32.xlu0 %v4843_v45  ;;  %v2193_v14 = vpop.f32.mrf.mxu1 }
 0x401   : > { %v4849_v8 = vsel %vm2231_vm15, %v2193_v14, -inf }
 0x402   : > { %2357 = vmax.xlane.f32.xlu2 %v4849_v8 }
 0x405   : > { %v2330_v39 = vpop.xlane.xlu0 %2329 }
 0x406   : > { %v2377_v46 = vsub.f32 %v4699_v61, %v2330_v39 }
 0x408   : > { %2327 = vmax.xlane.f32.xlu0 %v4855_v20  ;;  %v2195_v44 = vpop.f32.mrf.mxu1  ;;  %v2425_v47 = vmul.f32 1.442695, %v2377_v46 }
 0x409   : > { %v4859_v49 = vsel %vm2232_vm1, %v2195_v44, -inf }
 0x40a   : > { %2459 = vadd.xlane.f32.xlu2 %v4706_v50  ;;  %2359 = vmax.xlane.f32.xlu1 %v4859_v49  ;;  %3362 = vpow2.f32 %v2425_v47 }
 0x40b   : > { %3364 = vpow2.f32 %v2399_v30 }
 0x40d   : > { %v2332_v60 = vpop.xlane.xlu2 %2331 }
 0x40e   : > { %v2378_v61 = vsub.f32 %v4712_v15, %v2332_v60 }
 0x410   : > { %v2427_v29 = vmul.f32 1.442695, %v2378_v61  ;;  %2457 = vadd.xlane.f32.xlu0 %v4702_v54  ;;  %v4865_v35 = vpop.eup %3362 }
 0x411   : > { %v3365_v56 = vpop.eup %3364  ;;  %v2537_v43 = vpack.c.bf16 %v4865_v35, %v4865_v35 }
 0x412   : > { %3366 = vpow2.f32 %v2427_v29  ;;  %2465 = vadd.xlane.f32.xlu2 %v3361_v51 }
 0x413   : > { %v2690_v9 = vunpack.c.l.b16 %v2537_v43 }
 0x415   : > { %v2302_v58 = vpop.xlane.xlu2 %2301 }
 0x416   : > { %v2363_v50 = vsub.f32 %v4719_v0, %v2302_v58  ;;  %v2524_v0 = vpack.c.bf16 %v3365_v56, %v3365_v56 }
 0x418   : > { %v4870_v62 = vpop.eup %3366  ;;  %v2397_v7 = vmul.f32 1.442695, %v2363_v50  ;;  %2463 = vadd.xlane.f32.xlu0 %v3365_v56  ;;  %v2723_v15 = vpop.permute.xlu0 %2722  ;;  %v2572_v33 = vunpack.c.l.b16 %v2524_v0 }
 0x419   : > { %v2538_v54 = vpack.c.bf16 %v4870_v62, %v4870_v62  ;;  %2753 = vmatpush.bf16.msra.mxu3 %v2723_v15 }
 0x41a   : > { %3368 = vpow2.f32 %v2397_v7 }
 0x41b   : > { %v2691_v57 = vunpack.c.l.b16 %v2538_v54 }
 0x41d   : > { %v2706_v41 = vpack.c.b16 %v2691_v57, %v2690_v9  ;;  %v2336_v16 = vpop.xlane.xlu2 %2335 }
 0x41f   : > { %2754 = vmatmul.bf16.vlgmr.msra.gmra.mxu3 %v2706_v41 }
 0x420   : > { %v3369_v40 = vpop.eup %3368 }
 0x421   : > { %2461 = vadd.xlane.f32.xlu1 %v3369_v40  ;;  %v2523_v6 = vpack.c.bf16 %v3369_v40, %v3369_v40 }
 0x423   : > { %v2571_v53 = vunpack.c.l.b16 %v2523_v6 }
 0x425   : > { %v2308_v24 = vpop.xlane.xlu2 %2307  ;;  %v2338_v63 = vpop.xlane.xlu1 %2337  ;;  %v2586_v38 = vpack.c.b16 %v2572_v33, %v2571_v53 }
 0x426   : > { %v2366_v36 = vsub.f32 %v4733_v42, %v2308_v24  ;;  %v2381_v0 = vsub.f32 %v4737_v2, %v2338_v63 }
 0x427   : > { %2638 = vmatmul.bf16.gmra.mxu2 %v2586_v38 }
 0x428   : > { %v2403_v10 = vmul.f32 1.442695, %v2366_v36 }
 0x42a   : > { %3370 = vpow2.f32 %v2403_v10  ;;  %v2433_v10 = vmul.f32 1.442695, %v2381_v0 }
 0x42d   : > { %v2310_v11 = vpop.xlane.xlu2 %2309  ;;  %v2312_v14 = vpop.xlane.xlu1 %2311 }
 0x42e   : > { %v2367_v23 = vsub.f32 %v4747_v12, %v2310_v11  ;;  %v2368_v52 = vsub.f32 %v4749_v31, %v2312_v14  ;;  %v2380_v31 = vsub.f32 %v4726_v22, %v2336_v16 }
 0x430   : > { %v3371_v39 = vpop.eup %3370  ;;  %v2405_v46 = vmul.f32 1.442695, %v2367_v23  ;;  %v2407_v27 = vmul.f32 1.442695, %v2368_v52  ;;  %v2431_v43 = vmul.f32 1.442695, %v2380_v31 }
 0x431   : > { %2467 = vadd.xlane.f32.xlu1 %v3371_v39  ;;  %v2526_v44 = vpack.c.bf16 %v3371_v39, %v3371_v39 }
 0x432   : > { %3372 = vpow2.f32 %v2405_v46 }
 0x433   : > { %3374 = vpow2.f32 %v2407_v27  ;;  %v2574_v47 = vunpack.c.l.b16 %v2526_v44 }
 0x435   : > { %v2314_v42 = vpop.xlane.xlu1 %2313  ;;  %v2587_v30 = vpack.c.b16 %v2574_v47, %v2573_v37 }
 0x436   : > { %v2369_v60 = vsub.f32 %v4755_v21, %v2314_v42 }
 0x437   : > { %2643 = vmatmul.bf16.gmra.mxu2 %v2587_v30 }
 0x438   : > { %v3373_v61 = vpop.eup %3372  ;;  %v2409_v29 = vmul.f32 1.442695, %v2369_v60 }
 0x439   : > { %v3375_v12 = vpop.eup %3374  ;;  %2469 = vadd.xlane.f32.xlu0 %v3373_v61  ;;  %v2527_v58 = vpack.c.bf16 %v3373_v61, %v3373_v61 }
 0x43a   : > { %3376 = vpow2.f32 %v2409_v29  ;;  %2471 = vadd.xlane.f32.xlu2 %v3375_v12  ;;  %v2528_v50 = vpack.c.bf16 %v3375_v12, %v3375_v12 }
 0x43b   : > { %v2575_v7 = vunpack.c.l.b16 %v2527_v58  ;;  %3378 = vpow2.f32 %v2431_v43 }
 0x43c   : > { %v2576_v15 = vunpack.c.l.b16 %v2528_v50 }
 0x43d   : > { %v2344_v51 = vpop.xlane.xlu2 %2343 }
 0x43e   : > { %v2588_v57 = vpack.c.b16 %v2576_v15, %v2575_v7  ;;  %v2384_v44 = vsub.f32 %v4758_v17, %v2344_v51 }
 0x440   : > { %v4879_v56 = vpop.eup %3376  ;;  %v2439_v31 = vmul.f32 1.442695, %v2384_v44 }
 0x441   : > { %2473 = vadd.xlane.f32.xlu1 %v4879_v56  ;;  %v4885_v22 = vpop.eup %3378  ;;  %v2529_v51 = vpack.c.bf16 %v4879_v56, %v4879_v56 }
 0x442   : > { %v2540_v33 = vpack.c.bf16 %v4885_v22, %v4885_v22 }
 0x443   : > { %v2334_v21 = vpop.xlane.xlu0 %2333 }
 0x444   : > { %v2379_v54 = vsub.f32 %v4763_v48, %v2334_v21  ;;  %v2693_v63 = vunpack.c.l.b16 %v2540_v33 }
 0x445   : > { %v4883_v9 = vpop.xlane.xlu2 %2345 }
 0x446   : > { %v2429_v41 = vmul.f32 1.442695, %v2379_v54  ;;  %v2385_v33 = vsub.f32 %v4766_v1, %v4883_v9 }
 0x447   : > { %2648 = vmatmul.bf16.gmra.mxu2 %v2588_v57 }
 0x448   : > { %3380 = vpow2.f32 %v2429_v41 }
 0x44b   : > { %v2340_v16 = vpop.xlane.xlu0 %2339 }
 0x44c   : > { %v2382_v40 = vsub.f32 %v4774_v18, %v2340_v16  ;;  %v2577_v16 = vunpack.c.l.b16 %v2529_v51 }
 0x44d   : > { %v2320_v6 = vpop.xlane.xlu2 %2319  ;;  %v4889_v53 = vpop.xlane.xlu1 %2347 }
 0x44e   : > { %v4893_v48 = vpop.eup %3380  ;;  %v2435_v24 = vmul.f32 1.442695, %v2382_v40  ;;  %v2372_v38 = vsub.f32 %v4780_v25, %v2320_v6  ;;  %v2386_v56 = vsub.f32 %v4784_v3, %v4889_v53 }
 0x44f   : > { %v2539_v36 = vpack.c.bf16 %v4893_v48, %v4893_v48 }
 0x450   : > { %v2415_v11 = vmul.f32 1.442695, %v2372_v38  ;;  %3382 = vpow2.f32 %v2435_v24  ;;  %v2443_v3 = vmul.f32 1.442695, %v2386_v56 }
 0x451   : > { %v2692_v2 = vunpack.c.l.b16 %v2539_v36 }
 0x452   : > { %3384 = vpow2.f32 %v2415_v11 }
 0x453   : > { %v2342_v18 = vpop.xlane.xlu0 %2341  ;;  %v2707_v14 = vpack.c.b16 %v2693_v63, %v2692_v2  ;;  %3386 = vpow2.f32 %v2433_v10  ;;  %v2441_v2 = vmul.f32 1.442695, %v2385_v33 }
 0x454   : > { %v2383_v39 = vsub.f32 %v4793_v59, %v2342_v18 }
 0x455   : > { %v4898_v23 = vpop.xlane.xlu1 %2349  ;;  %2759 = vmatmul.bf16.gmra.mxu3 %v2707_v14  ;;  %v2322_v37 = vpop.xlane.xlu2 %2321 }
 0x456   : > { %v4900_v52 = vpop.eup %3382  ;;  %v2437_v60 = vmul.f32 1.442695, %v2383_v39  ;;  %v2373_v29 = vsub.f32 %v4799_v55, %v2322_v37 }
 0x457   : > { %v2542_v27 = vpack.c.bf16 %v4900_v52, %v4900_v52 }
 0x458   : > { %v4902_v13 = vpop.eup %3384  ;;  %v2417_v58 = vmul.f32 1.442695, %v2373_v29 }
 0x459   : > { %2479 = vadd.xlane.f32.xlu1 %v4902_v13  ;;  %v4905_v25 = vpop.eup %3386  ;;  %v2695_v12 = vunpack.c.l.b16 %v2542_v27  ;;  %v2532_v39 = vpack.c.bf16 %v4902_v13, %v4902_v13 }
 0x45a   : > { %v2541_v30 = vpack.c.bf16 %v4905_v25, %v4905_v25 }
 0x45b   : > { %v2316_v46 = vpop.xlane.xlu0 %2315  ;;  %v2580_v37 = vunpack.c.l.b16 %v2532_v39 }
 0x45c   : > { %v2370_v47 = vsub.f32 %v4811_v19, %v2316_v46  ;;  %v2694_v59 = vunpack.c.l.b16 %v2541_v30 }
 0x45d   : > { %v2324_v42 = vpop.xlane.xlu1 %2323 }
 0x45e   : > { %v2411_v61 = vmul.f32 1.442695, %v2370_v47  ;;  %v2708_v43 = vpack.c.b16 %v2695_v12, %v2694_v59  ;;  %v2374_v57 = vsub.f32 %v4816_v26, %v2324_v42  ;;  %v2634_v42 = vpop.f32.mrf.mxu2 }
 0x460   : > { %3388 = vpow2.f32 %v2411_v61  ;;  %v2419_v24 = vmul.f32 1.442695, %v2374_v57 }
 0x461   : > { %3390 = vpow2.f32 %v2437_v60  ;;  %v2387_v60 = vsub.f32 %v4803_v4, %v4898_v23 }
 0x462   : > { %3392 = vpow2.f32 %v2439_v31 }
 0x463   : > { %v2318_v50 = vpop.xlane.xlu0 %2317  ;;  %3394 = vpow2.f32 %v2417_v58 }
 0x464   : > { %v2371_v17 = vsub.f32 %v4823_v34, %v2318_v50 }
 0x465   : > { %v2326_v19 = vpop.xlane.xlu1 %2325  ;;  %2764 = vmatmul.bf16.gmra.mxu3 %v2708_v43 }
 0x466   : > { %v3389_v7 = vpop.eup %3388  ;;  %v2413_v15 = vmul.f32 1.442695, %v2371_v17  ;;  %v2375_v55 = vsub.f32 %v4828_v5, %v2326_v19  ;;  %v2636_v19 = vpop.f32.mrf.mxu2 }
 0x467   : > { %2475 = vadd.xlane.f32.xlu0 %v3389_v7  ;;  %v2530_v21 = vpack.c.bf16 %v3389_v7, %v3389_v7  ;;  %v4919_v54 = vpop.eup %3390 }
 0x468   : > { %3396 = vpow2.f32 %v2413_v15  ;;  %v2421_v41 = vmul.f32 1.442695, %v2375_v55  ;;  %v4922_v0 = vpop.eup %3392  ;;  %v2543_v5 = vpack.c.bf16 %v4919_v54, %v4919_v54 }
 0x469   : > { %v2578_v34 = vunpack.c.l.b16 %v2530_v21  ;;  %v4930_v26 = vpop.eup %3394  ;;  %v2544_v36 = vpack.c.bf16 %v4922_v0, %v4922_v0 }
 0x46a   : > { %3398 = vpow2.f32 %v2421_v41  ;;  %v2696_v53 = vunpack.c.l.b16 %v2543_v5 }
 0x46b   : > { %v2352_v40 = vpop.xlane.xlu0 %2351  ;;  %v2589_v6 = vpack.c.b16 %v2578_v34, %v2577_v16  ;;  %3400 = vpow2.f32 %v2419_v24  ;;  %v2697_v1 = vunpack.c.l.b16 %v2544_v36 }
 0x46c   : > { %3402 = vpow2.f32 %v2443_v3  ;;  %v2388_v30 = vsub.f32 %v4833_v32, %v2352_v40  ;;  %v2445_v32 = vmul.f32 1.442695, %v2387_v60 }
 0x46d   : > { %v4932_v38 = vpop.xlane.xlu2 %2355  ;;  %2653 = vmatmul.bf16.gmra.mxu2 %v2589_v6  ;;  %v2709_v63 = vpack.c.b16 %v2697_v1, %v2696_v53  ;;  %3404 = vpow2.f32 %v2441_v2 }
 0x46e   : > { %v3397_v10 = vpop.eup %3396  ;;  %v2447_v59 = vmul.f32 1.442695, %v2388_v30  ;;  %v2390_v21 = vsub.f32 %v4838_v28, %v4932_v38 }
 0x46f   : > { %2481 = vadd.xlane.f32.xlu0 %v4930_v26  ;;  %2477 = vadd.xlane.f32.xlu2 %v3397_v10  ;;  %v2531_v18 = vpack.c.bf16 %v3397_v10, %v3397_v10 }
 0x470   : > { %v4937_v11 = vpop.eup %3398  ;;  %v2451_v6 = vmul.f32 1.442695, %v2390_v21 }
 0x471   : > { %2485 = vadd.xlane.f32.xlu1 %v4937_v11  ;;  %v3401_v46 = vpop.eup %3400  ;;  %v2579_v27 = vunpack.c.l.b16 %v2531_v18 }
 0x472   : > { %v4948_v44 = vpop.eup %3402  ;;  %v2534_v43 = vpack.c.bf16 %v3401_v46, %v3401_v46 }
 0x473   : > { %v4940_v9 = vpop.xlane.xlu0 %2353  ;;  %v4951_v47 = vpop.eup %3404  ;;  %v2590_v61 = vpack.c.b16 %v2580_v37, %v2579_v27  ;;  %v2546_v29 = vpack.c.bf16 %v4948_v44, %v4948_v44 }
 0x474   : > { %v2545_v31 = vpack.c.bf16 %v4951_v47, %v4951_v47  ;;  %v2582_v7 = vunpack.c.l.b16 %v2534_v43  ;;  %v2389_v16 = vsub.f32 %v4843_v45, %v4940_v9 }
 0x475   : > { %2769 = vmatmul.bf16.gmra.mxu3 %v2709_v63  ;;  %v4942_v14 = vpop.xlane.xlu2 %2357  ;;  %v2699_v4 = vunpack.c.l.b16 %v2546_v29 }
 0x476   : > { %v2698_v23 = vunpack.c.l.b16 %v2545_v31  ;;  %v2449_v5 = vmul.f32 1.442695, %v2389_v16  ;;  %v2391_v3 = vsub.f32 %v4849_v8, %v4942_v14 }
 0x477   : > { %2483 = vadd.xlane.f32.xlu2 %v3401_v46 }
 0x478   : > { %v2710_v50 = vpack.c.b16 %v2699_v4, %v2698_v23 }
 0x479   : > { %2491 = vadd.xlane.f32.xlu1 %v4870_v62 }
 0x47b   : > { %v2328_v13 = vpop.xlane.xlu0 %2327 }
 0x47c   : > { %v2376_v12 = vsub.f32 %v4855_v20, %v2328_v13 }
 0x47d   : > { %2658 = vmatmul.bf16.gmra.mxu2 %v2590_v61  ;;  %v2460_v62 = vpop.xlane.xlu2 %2459  ;;  %v2360_v24 = vpop.xlane.xlu1 %2359 }
 0x47e   : > { %v2423_v58 = vmul.f32 1.442695, %v2376_v12  ;;  %3406 = vrcp.f32 %v2460_v62 }
 0x47f   : > { %2489 = vadd.xlane.f32.xlu2 %v4865_v35 }
 0x480   : > { %3408 = vpow2.f32 %v2423_v58 }
 0x481   : > { %2497 = vadd.xlane.f32.xlu1 %v4905_v25  ;;  %3410 = vpow2.f32 %v2447_v59  ;;  %v2533_v25 = vpack.c.bf16 %v4930_v26, %v4930_v26  ;;  %v2535_v26 = vpack.c.bf16 %v4937_v11, %v4937_v11  ;;  %v2453_v11 = vmul.f32 1.442695, %v2391_v3 }
 0x482   : > { %3412 = vpow2.f32 %v2445_v32 }
 0x483   : > { %v2458_v20 = vpop.xlane.xlu0 %2457  ;;  %v2581_v57 = vunpack.c.l.b16 %v2533_v25  ;;  %v2583_v10 = vunpack.c.l.b16 %v2535_v26 }
 0x484   : > { %v3407_v17 = vpop.eup %3406  ;;  %3414 = vrcp.f32 %v2458_v20 }
 0x485   : > { %v2828_v35 = vmul.f32 %v3407_v17, %v2636_v19  ;;  %2774 = vmatmul.bf16.gmra.mxu3 %v2710_v50  ;;  %v2591_v56 = vpack.c.b16 %v2582_v7, %v2581_v57  ;;  %3416 = vpow2.f32 %v2451_v6  ;;  %v2466_v30 = vpop.xlane.xlu2 %2465 }
 0x486   : > { %v3409_v51 = vpop.eup %3408  ;;  %3418 = vpow2.f32 %v2449_v5 }
 0x487   : > { %2860 = vst.msk [vmem:[%s4966_s5 + $0x8] sm:$0xff] %vm1923_vm0, %v2828_v35  ;;  %2487 = vadd.xlane.f32.xlu0 %v3409_v51  ;;  %2495 = vadd.xlane.f32.xlu2 %v4885_v22  ;;  %v3411_v15 = vpop.eup %3410  ;;  %v2536_v45 = vpack.c.bf16 %v3409_v51, %v3409_v51 }
 0x488   : > { %v3413_v55 = vpop.eup %3412  ;;  %v2548_v40 = vpack.c.bf16 %v3411_v15, %v3411_v15 }
 0x489   : > { %2503 = vadd.xlane.f32.xlu1 %v4922_v0  ;;  %v2547_v22 = vpack.c.bf16 %v3413_v55, %v3413_v55 }
 0x48a   : > { %v3415_v41 = vpop.eup %3414  ;;  %v2701_v28 = vunpack.c.l.b16 %v2548_v40 }
 0x48b   : > { %v2827_v34 = vmul.f32 %v3415_v41, %v2634_v42  ;;  %v2700_v0 = vunpack.c.l.b16 %v2547_v22  ;;  %v3417_v38 = vpop.eup %3416  ;;  %v2464_v14 = vpop.xlane.xlu0 %2463 }
 0x48c   : > { %v3419_v36 = vpop.eup %3418  ;;  %v2550_v9 = vpack.c.bf16 %v3417_v38, %v3417_v38 }
 0x48d   : > { %2859 = vst.msk [vmem:[%s4966_s5] sm:$0xff] %vm1923_vm0, %v2827_v34  ;;  %2663 = vmatmul.bf16.gmra.mxu2 %v2591_v56  ;;  %v2711_v33 = vpack.c.b16 %v2701_v28, %v2700_v0  ;;  %v2549_v2 = vpack.c.bf16 %v3419_v36, %v3419_v36 }
 0x48e   : > { %v2703_v18 = vunpack.c.l.b16 %v2550_v9 }
 0x48f   : > { %2493 = vadd.xlane.f32.xlu0 %v4893_v48  ;;  %2501 = vadd.xlane.f32.xlu2 %v4919_v54  ;;  %v2584_v48 = vunpack.c.l.b16 %v2536_v45  ;;  %v2392_v54 = vsub.f32 %v4859_v49, %v2360_v24 }
 0x491   : > { %2509 = vadd.xlane.f32.xlu1 %v3413_v55  ;;  %v2592_v53 = vpack.c.b16 %v2584_v48, %v2583_v10  ;;  %v2455_v1 = vmul.f32 1.442695, %v2392_v54 }
 0x493   : > { %3420 = vpow2.f32 %v2455_v1 }
 0x494   : > { %v2462_v63 = vpop.xlane.xlu1 %2461  ;;  %3422 = vpow2.f32 %v2453_v11 }
 0x495   : > { %2779 = vmatmul.bf16.gmra.mxu3 %v2711_v33  ;;  %3424 = vrcp.f32 %v2462_v63 }
 0x496   : > { %3426 = vrcp.f32 %v2464_v14 }
 0x497   : > { %2499 = vadd.xlane.f32.xlu0 %v4900_v52  ;;  %2507 = vadd.xlane.f32.xlu2 %v4948_v44  ;;  %v2702_v52 = vunpack.c.l.b16 %v2549_v2  ;;  %3428 = vrcp.f32 %v2466_v30 }
 0x499   : > { %2515 = vadd.xlane.f32.xlu1 %v3417_v38  ;;  %v2712_v49 = vpack.c.b16 %v2703_v18, %v2702_v52  ;;  %v3421_v39 = vpop.eup %3420 }
 0x49a   : > { %v3423_v8 = vpop.eup %3422  ;;  %v2552_v37 = vpack.c.bf16 %v3421_v39, %v3421_v39 }
 0x49b   : > { %v3425_v46 = vpop.eup %3424 }
 0x49c   : > { %v2705_v42 = vunpack.c.l.b16 %v2552_v37  ;;  %v3427_v13 = vpop.eup %3426 }
 0x49d   : > { %2668 = vmatmul.bf16.gmra.mxu2 %v2592_v53  ;;  %v3429_v31 = vpop.eup %3428 }
 0x49f   : > { %2505 = vadd.xlane.f32.xlu0 %v4951_v47  ;;  %2513 = vadd.xlane.f32.xlu2 %v3419_v36  ;;  %v2551_v47 = vpack.c.bf16 %v3423_v8, %v3423_v8 }
 0x4a1   : > { %v2704_v60 = vunpack.c.l.b16 %v2551_v47 }
 0x4a2   : > { %v2755_v50 = vpop.f32.mrf.mxu3 }
 0x4a3   : > { %v2713_v12 = vpack.c.b16 %v2705_v42, %v2704_v60 }
 0x4a4   : > { %v2468_v62 = vpop.xlane.xlu1 %2467 }
 0x4a5   : > { %2784 = vmatmul.bf16.gmra.mxu3 %v2712_v49  ;;  %3430 = vrcp.f32 %v2468_v62 }
 0x4a7   : > { %2511 = vadd.xlane.f32.xlu0 %v3411_v15  ;;  %2519 = vadd.xlane.f32.xlu2 %v3421_v39 }
 0x4aa   : > { %v2639_v27 = vpop.f32.mrf.mxu2  ;;  %v2757_v25 = vpop.f32.mrf.mxu3 }
 0x4ab   : > { %v2829_v44 = vmul.f32 %v3425_v46, %v2639_v27  ;;  %v3431_v4 = vpop.eup %3430 }
 0x4ac   : > { %v2470_v32 = vpop.xlane.xlu0 %2469 }
 0x4ad   : > { %2861 = vst.msk [vmem:[%s4966_s5 + $0x10] sm:$0xff] %vm1923_vm0, %v2829_v44  ;;  %3432 = vrcp.f32 %v2470_v32  ;;  %v2472_v43 = vpop.xlane.xlu2 %2471 }
 0x4ae   : > { %3434 = vrcp.f32 %v2472_v43 }
 0x4af   : > { %2517 = vadd.xlane.f32.xlu0 %v3423_v8 }
 0x4b2   : > { %v2641_v61 = vpop.f32.mrf.mxu2 }
 0x4b3   : > { %v2830_v29 = vmul.f32 %v3427_v13, %v2641_v61  ;;  %v3433_v17 = vpop.eup %3432 }
 0x4b4   : > { %v3435_v51 = vpop.eup %3434  ;;  %v2474_v55 = vpop.xlane.xlu1 %2473 }
 0x4b5   : > { %2862 = vst.msk [vmem:[%s4966_s5 + $0x18] sm:$0xff] %vm1923_vm0, %v2830_v29  ;;  %2789 = vmatmul.bf16.gmra.mxu3 %v2713_v12  ;;  %3436 = vrcp.f32 %v2474_v55 }
 0x4ba   : > { %v2644_v59 = vpop.f32.mrf.mxu2 }
 0x4bb   : > { %v2831_v58 = vmul.f32 %v3429_v31, %v2644_v59  ;;  %v3437_v5 = vpop.eup %3436 }
 0x4bd   : > { %2863 = vst.msk [vmem:[%s4966_s5 + $0x20] sm:$0xff] %vm1923_vm0, %v2831_v58 }
 0x4c2   : > { %v2646_v23 = vpop.f32.mrf.mxu2 }
 0x4c3   : > { %v2832_v20 = vmul.f32 %v3431_v4, %v2646_v23 }
 0x4c5   : > { %2864 = vst.msk [vmem:[%s4966_s5 + $0x28] sm:$0xff] %vm1923_vm0, %v2832_v20 }
 0x4ca   : > { %v2649_v19 = vpop.f32.mrf.mxu2 }
 0x4cb   : > { %v2833_v35 = vmul.f32 %v3433_v17, %v2649_v19 }
 0x4cc   : > { %v2480_v57 = vpop.xlane.xlu1 %2479 }
 0x4cd   : > { %2865 = vst.msk [vmem:[%s4966_s5 + $0x30] sm:$0xff] %vm1923_vm0, %v2833_v35 }
 0x4d2   : > { %v2651_v7 = vpop.f32.mrf.mxu2 }
 0x4d3   : > { %v2834_v15 = vmul.f32 %v3435_v51, %v2651_v7 }
 0x4d5   : > { %2866 = vst.msk [vmem:[%s4966_s5 + $0x38] sm:$0xff] %vm1923_vm0, %v2834_v15 }
 0x4d8   : > { %v5002_v21 = vpop.f32.mrf.mxu3 }
 0x4da   : > { %v2476_v56 = vpop.xlane.xlu0 %2475 }
 0x4e0   : > { %v2762_v41 = vpop.f32.mrf.mxu3 }
 0x4e2   : > { %v2478_v16 = vpop.xlane.xlu2 %2477  ;;  %v2482_v45 = vpop.xlane.xlu0 %2481 }
 0x4e4   : > { %v5004_v34 = vpop.xlane.xlu1 %2485 }
 0x4e8   : > { %v2765_v40 = vpop.f32.mrf.mxu3 }
 0x4ea   : > { %v5006_v6 = vpop.xlane.xlu2 %2483 }
 0x4ec   : > { %v2492_v22 = vpop.xlane.xlu1 %2491 }
 0x4ed   : > { %3438 = vrcp.f32 %v2492_v22 }
 0x4ee   : > { %3440 = vrcp.f32 %v2476_v56 }
 0x4f0   : > { %v2654_v28 = vpop.f32.mrf.mxu2  ;;  %v5008_v0 = vpop.f32.mrf.mxu3 }
 0x4f1   : > { %v2835_v33 = vmul.f32 %v3437_v5, %v2654_v28 }
 0x4f2   : > { %v2490_v24 = vpop.xlane.xlu2 %2489 }
 0x4f3   : > { %v3439_v26 = vpop.eup %3438  ;;  %2867 = vst.msk [vmem:[%s4966_s5 + $0x40] sm:$0xff] %vm1923_vm0, %v2835_v33  ;;  %3442 = vrcp.f32 %v2490_v24 }
 0x4f4   : > { %v2844_v38 = vmul.f32 %v3439_v26, %v2757_v25  ;;  %v2498_v48 = vpop.xlane.xlu1 %2497  ;;  %v3441_v36 = vpop.eup %3440 }
 0x4f5   : > { %3444 = vrcp.f32 %v2498_v48 }
 0x4f6   : > { %2876 = vst.msk [vmem:[%s4966_s5 + $0x88] sm:$0xff] %vm1923_vm0, %v2844_v38  ;;  %3446 = vrcp.f32 %v2478_v16 }
 0x4f8   : > { %v2656_v54 = vpop.f32.mrf.mxu2  ;;  %v2770_v10 = vpop.f32.mrf.mxu3 }
 0x4f9   : > { %v3443_v3 = vpop.eup %3442  ;;  %v2836_v53 = vmul.f32 %v3441_v36, %v2656_v54 }
 0x4fa   : > { %v2843_v2 = vmul.f32 %v3443_v3, %v2755_v50  ;;  %v5014_v1 = vpop.xlane.xlu0 %2487  ;;  %v2496_v9 = vpop.xlane.xlu2 %2495 }
 0x4fb   : > { %v3445_v11 = vpop.eup %3444  ;;  %2868 = vst.msk [vmem:[%s4966_s5 + $0x48] sm:$0xff] %vm1923_vm0, %v2836_v53  ;;  %3448 = vrcp.f32 %v2496_v9 }
 0x4fc   : > { %2875 = vst.msk [vmem:[%s4966_s5 + $0x80] sm:$0xff] %vm1923_vm0, %v2843_v2  ;;  %v2847_v52 = vmul.f32 %v3445_v11, %v2765_v40  ;;  %v2504_v63 = vpop.xlane.xlu1 %2503  ;;  %v3447_v18 = vpop.eup %3446 }
 0x4fd   : > { %3450 = vrcp.f32 %v2504_v63 }
 0x4fe   : > { %2879 = vst.msk [vmem:[%s4966_s5 + $0xa0] sm:$0xff] %vm1923_vm0, %v2847_v52  ;;  %3452 = vrcp.f32 %v2480_v57 }
 0x500   : > { %v2659_v49 = vpop.f32.mrf.mxu2  ;;  %v2772_v39 = vpop.f32.mrf.mxu3 }
 0x501   : > { %v2837_v8 = vmul.f32 %v3447_v18, %v2659_v49  ;;  %v3449_v14 = vpop.eup %3448 }
 0x502   : > { %v2494_v46 = vpop.xlane.xlu0 %2493  ;;  %v2502_v27 = vpop.xlane.xlu2 %2501  ;;  %v2846_v37 = vmul.f32 %v3449_v14, %v2762_v41 }
 0x503   : > { %v3451_v44 = vpop.eup %3450  ;;  %2869 = vst.msk [vmem:[%s4966_s5 + $0x50] sm:$0xff] %vm1923_vm0, %v2837_v8  ;;  %3454 = vrcp.f32 %v2494_v46 }
 0x504   : > { %v2850_v47 = vmul.f32 %v3451_v44, %v2772_v39  ;;  %3456 = vrcp.f32 %v2502_v27  ;;  %2878 = vst.msk [vmem:[%s4966_s5 + $0x98] sm:$0xff] %vm1923_vm0, %v2846_v37  ;;  %v3453_v42 = vpop.eup %3452  ;;  %v2510_v58 = vpop.xlane.xlu1 %2509 }
 0x505   : > { %3458 = vrcp.f32 %v2482_v45 }
 0x506   : > { %2882 = vst.msk [vmem:[%s4966_s5 + $0xb8] sm:$0xff] %vm1923_vm0, %v2850_v47 }
 0x508   : > { %v2661_v30 = vpop.f32.mrf.mxu2  ;;  %v2775_v60 = vpop.f32.mrf.mxu3 }
 0x509   : > { %v3455_v13 = vpop.eup %3454  ;;  %v2838_v61 = vmul.f32 %v3453_v42, %v2661_v30 }
 0x50a   : > { %v3457_v29 = vpop.eup %3456  ;;  %v2845_v12 = vmul.f32 %v3455_v13, %v5002_v21  ;;  %v2500_v62 = vpop.xlane.xlu0 %2499 }
 0x50b   : > { %v2508_v31 = vpop.xlane.xlu2 %2507  ;;  %v2849_v59 = vmul.f32 %v3457_v29, %v2770_v10  ;;  %2870 = vst.msk [vmem:[%s4966_s5 + $0x58] sm:$0xff] %vm1923_vm0, %v2838_v61  ;;  %3460 = vrcp.f32 %v2500_v62  ;;  %v3459_v32 = vpop.eup %3458 }
 0x50c   : > { %2877 = vst.msk [vmem:[%s4966_s5 + $0x90] sm:$0xff] %vm1923_vm0, %v2845_v12  ;;  %3462 = vrcp.f32 %v2508_v31  ;;  %v2516_v33 = vpop.xlane.xlu1 %2515 }
 0x50d   : > { %2881 = vst.msk [vmem:[%s4966_s5 + $0xb0] sm:$0xff] %vm1923_vm0, %v2849_v59  ;;  %3464 = vrcp.f32 %v5006_v6 }
 0x50e   : > { %3466 = vrcp.f32 %v2510_v58 }
 0x510   : > { %v2664_v4 = vpop.f32.mrf.mxu2  ;;  %v2777_v23 = vpop.f32.mrf.mxu3 }
 0x511   : > { %v3461_v20 = vpop.eup %3460  ;;  %v2839_v50 = vmul.f32 %v3459_v32, %v2664_v4 }
 0x512   : > { %v3463_v43 = vpop.eup %3462  ;;  %v2848_v17 = vmul.f32 %v3461_v20, %v5008_v0  ;;  %v2506_v19 = vpop.xlane.xlu0 %2505 }
 0x513   : > { %2871 = vst.msk [vmem:[%s4966_s5 + $0x60] sm:$0xff] %vm1923_vm0, %v2839_v50  ;;  %v2852_v35 = vmul.f32 %v3463_v43, %v2777_v23  ;;  %3468 = vrcp.f32 %v2506_v19  ;;  %v3465_v25 = vpop.eup %3464  ;;  %v2514_v56 = vpop.xlane.xlu2 %2513 }
 0x514   : > { %2880 = vst.msk [vmem:[%s4966_s5 + $0xa8] sm:$0xff] %vm1923_vm0, %v2848_v17  ;;  %v3467_v51 = vpop.eup %3466  ;;  %3470 = vrcp.f32 %v5004_v34 }
 0x515   : > { %2884 = vst.msk [vmem:[%s4966_s5 + $0xc8] sm:$0xff] %vm1923_vm0, %v2852_v35 }
 0x518   : > { %v2666_v7 = vpop.f32.mrf.mxu2  ;;  %v2780_v15 = vpop.f32.mrf.mxu3 }
 0x519   : > { %v3469_v55 = vpop.eup %3468  ;;  %v2840_v21 = vmul.f32 %v3465_v25, %v2666_v7  ;;  %v2853_v57 = vmul.f32 %v3467_v51, %v2780_v15 }
 0x51a   : > { %v2851_v41 = vmul.f32 %v3469_v55, %v2775_v60  ;;  %v2512_v16 = vpop.xlane.xlu0 %2511  ;;  %v3471_v40 = vpop.eup %3470 }
 0x51b   : > { %2872 = vst.msk [vmem:[%s4966_s5 + $0x68] sm:$0xff] %vm1923_vm0, %v2840_v21  ;;  %3472 = vrcp.f32 %v2512_v16  ;;  %v2520_v53 = vpop.xlane.xlu2 %2519 }
 0x51c   : > { %2883 = vst.msk [vmem:[%s4966_s5 + $0xc0] sm:$0xff] %vm1923_vm0, %v2851_v41  ;;  %3474 = vrcp.f32 %v5014_v1 }
 0x51d   : > { %2885 = vst.msk [vmem:[%s4966_s5 + $0xd0] sm:$0xff] %vm1923_vm0, %v2853_v57  ;;  %3476 = vrcp.f32 %v2514_v56 }
 0x51e   : > { %3478 = vrcp.f32 %v2516_v33 }
 0x520   : > { %v2669_v6 = vpop.f32.mrf.mxu2  ;;  %v2782_v22 = vpop.f32.mrf.mxu3 }
 0x521   : > { %v3473_v5 = vpop.eup %3472  ;;  %v2841_v34 = vmul.f32 %v3471_v40, %v2669_v6 }
 0x522   : > { %v2854_v28 = vmul.f32 %v3473_v5, %v2782_v22  ;;  %v3475_v0 = vpop.eup %3474  ;;  %v2518_v36 = vpop.xlane.xlu0 %2517 }
 0x523   : > { %2873 = vst.msk [vmem:[%s4966_s5 + $0x70] sm:$0xff] %vm1923_vm0, %v2841_v34  ;;  %v3477_v45 = vpop.eup %3476  ;;  %3480 = vrcp.f32 %v2518_v36 }
 0x524   : > { %2886 = vst.msk [vmem:[%s4966_s5 + $0xd8] sm:$0xff] %vm1923_vm0, %v2854_v28  ;;  %v3479_v54 = vpop.eup %3478  ;;  %3482 = vrcp.f32 %v2520_v53 }
 0x528   : > { %v2671_v24 = vpop.f32.mrf.mxu2  ;;  %v2785_v26 = vpop.f32.mrf.mxu3 }
 0x529   : > { %v2842_v38 = vmul.f32 %v3475_v0, %v2671_v24  ;;  %v2855_v48 = vmul.f32 %v3477_v45, %v2785_v26  ;;  %v3481_v2 = vpop.eup %3480 }
 0x52a   : > { %v3483_v11 = vpop.eup %3482 }
 0x52b   : > { %2874 = vst.msk [vmem:[%s4966_s5 + $0x78] sm:$0xff] %vm1923_vm0, %v2842_v38 }
 0x52c   : > { %2887 = vst.msk [vmem:[%s4966_s5 + $0xe0] sm:$0xff] %vm1923_vm0, %v2855_v48 }
 0x530   : > { %v2787_v10 = vpop.f32.mrf.mxu3 }
 0x531   : > { %v2856_v3 = vmul.f32 %v3479_v54, %v2787_v10 }
 0x533   : > { %2888 = vst.msk [vmem:[%s4966_s5 + $0xe8] sm:$0xff] %vm1923_vm0, %v2856_v3 }
 0x538   : > { %v2790_v1 = vpop.f32.mrf.mxu3 }
 0x539   : > { %v2857_v9 = vmul.f32 %v3481_v2, %v2790_v1 }
 0x53b   : > { %2889 = vst.msk [vmem:[%s4966_s5 + $0xf0] sm:$0xff] %vm1923_vm0, %v2857_v9 }
 0x540   : > { %v2792_v52 = vpop.f32.mrf.mxu3 }
 0x541   : > { %v2858_v63 = vmul.f32 %v3483_v11, %v2792_v52 }
 0x543   : > { %2890 = vst.msk [vmem:[%s4966_s5 + $0xf8] sm:$0xff] %vm1923_vm0, %v2858_v63 }
 0x544 PF: > { %p12_p7 = scmp.ge.s32.totalorder %s3588_s14, 4   ;;  %s5206_s9 = smov %s3540_s10 }
 0x545   : > { %s5207_s10 = smov %s3544_s11  ;;  %s5208_s11 = smov %s3598_s17 }
 0x546   : > { %s5209_s12 = smov %s3588_s14  ;;  %14 = sbr.rel (!%p12_p7) target bundleno = 3 (0x3), region = 68 }
 0x54b   :  { %2915 = vsyncpa [#allocation3], 1 }
 0x54c   :  { %2917 = vsyncpa [#allocation3 + $0x1], 1 }

</bundles_post_ra>
